<compile_context>
chip_gen: v7x
topology: tpu7x:2x2x1
jax: 0.10.0
libtpu: 0.0.40
codegen_flags: <defaults>
</compile_context>

<pallas_src>
import math

import jax
import jax.numpy as jnp
from jax.experimental import pallas as pl
from jax.experimental.pallas import tpu as pltpu

EPS = 1e-5  # nn.LayerNorm default eps


# ---- small layout helper (einshape is the documented lane-layout-aware path) ----
if hasattr(pltpu, "einshape"):
    def _to_head_major(x):      # (tokens, H, Dh) -> (H, tokens, Dh)
        return pltpu.einshape("shd->hsd", x)
else:  # older jax fallback
    def _to_head_major(x):
        return jnp.swapaxes(x, 0, 1)


def _recip(x, approx):
    if hasattr(pl, "reciprocal"):
        return pl.reciprocal(x, approx=approx)
    return 1.0 / x


def _layernorm(x, g, b):
    mean = jnp.mean(x, axis=-1, keepdims=True)
    var = jnp.mean(jnp.square(x - mean), axis=-1, keepdims=True)
    return (x - mean) * jax.lax.rsqrt(var + EPS) * g + b


def make_kernel(Bt, S, E, H, compute_dtype, approx_recip):
    Dh = E // H
    S3 = 3 * S

    def kernel(feats_ref, ln_ref, wq_ref, wkv_ref, wo_ref, b_ref, out_ref):
        # ---- LayerNorm over all 3 features and Bt batch elements at once (f32) ----
        x = feats_ref[...].astype(jnp.float32)                 # (Bt, 3, S, E)
        gamma = ln_ref[0][None, :, None, :]                    # (1, 3, 1, E)
        beta = ln_ref[1][None, :, None, :]
        mean = jnp.mean(x, axis=-1, keepdims=True)
        xc = x - mean
        var = jnp.mean(xc * xc, axis=-1, keepdims=True)
        n = xc * jax.lax.rsqrt(var + EPS) * gamma + beta       # (Bt, 3, S, E)

        nq = n[:, 2].reshape(Bt * S, E)                        # normalized query / residual (f32)
        kv = n.reshape(Bt * S3, E)                             # per-batch [n0; n1; n2] tokens

        bq = b_ref[0:1, :E]                                    # already * 1/sqrt(Dh)
        bo = b_ref[0:1, E:]
        bkv = b_ref[1:2, :]

        # ---- fused in-projections (weights pre-transposed, q-scale pre-folded) ----
        q = jnp.dot(nq.astype(compute_dtype), wq_ref[...],
                    preferred_element_type=jnp.float32) + bq            # (Bt*S, E)
        kvp = jnp.dot(kv.astype(compute_dtype), wkv_ref[...],
                      preferred_element_type=jnp.float32) + bkv         # (Bt*3S, 2E)

        # head-major batching: cast first (halves relayout traffic), then (H*Bt, seq, Dh)
        qc = q.astype(compute_dtype)
        kc = kvp[:, :E].astype(compute_dtype)
        vc = kvp[:, E:].astype(compute_dtype)
        qh = _to_head_major(qc.reshape(Bt * S, H, Dh)).reshape(H * Bt, S, Dh)
        kh = _to_head_major(kc.reshape(Bt * S3, H, Dh)).reshape(H * Bt, S3, Dh)
        vh = _to_head_major(vc.reshape(Bt * S3, H, Dh)).reshape(H * Bt, S3, Dh)

        # ---- attention: all (head, batch) pairs batched through the MXU at once ----
        # TODO(synk): for S >~ 256 add a kv grid axis with online softmax (m/l/acc VMEM
        # scratch + pl.when init/finalize) so the (H*Bt, S, 3S) scores stay O(tile) on
        # v7x's 64 MiB VMEM.
        s = jnp.einsum("bqd,bkd->bqk", qh, kh,
                       preferred_element_type=jnp.float32)              # (H*Bt, S, 3S)
        s = s - jnp.max(s, axis=-1, keepdims=True)
        p = jnp.exp(s)
        p = p * _recip(jnp.sum(p, axis=-1, keepdims=True), approx_recip)
        o = jnp.einsum("bqk,bkd->bqd", p.astype(compute_dtype), vh,
                       preferred_element_type=jnp.float32)              # (H*Bt, S, Dh)

        # ---- out-projection folded per head (no head->seq transpose / lane merge) ----
        # wo_ref: (H, Dh, E);  out[n, e] = sum_h sum_d o[h, n, d] * wo[h, d, e]
        oh = o.reshape(H, Bt * S, Dh).astype(compute_dtype)
        proj = jnp.einsum("hnd,hde->hne", oh, wo_ref[...],
                          preferred_element_type=jnp.float32)           # (H, Bt*S, E)
        out = jnp.sum(proj, axis=0) + bo + nq                           # + residual (f32)
        out_ref[...] = out.reshape(Bt, S, E).astype(out_ref.dtype)

    return kernel


def _tpu_defaults():
    """(vmem_limit_bytes, cores) derived from the local chip, with safe fallbacks."""
    vmem_cap = 64 * 1024 * 1024   # conservative fallback (v7x-sized)
    cores = 1
    try:
        info = pltpu.get_tpu_info()
        cap = getattr(info, "vmem_capacity_bytes", None)
        if cap:
            vmem_cap = int(cap)
        for name in ("num_cores", "tensorcore_count", "num_tensorcores", "cores_per_chip"):
            v = getattr(info, name, None)
            if isinstance(v, int) and v > 1:
                cores = v
                break
    except Exception:
        pass
    # ~96 MiB on v5e/v6e (128 MiB physical), ~48 MiB on v7x (64 MiB physical)
    vmem_limit = int(min(vmem_cap * 3 // 4, 100 * 1024 * 1024))
    return vmem_limit, cores


def _pick_batch_block(B, S, E, H, in_bytes, out_bytes, cdt_bytes, vmem_budget,
                      max_block=16, min_grid_steps=1):
    """Largest divisor of B (<= max_block) whose per-step working set fits the budget."""
    S3 = 3 * S
    # resident packed weights / biases (single-buffered VMEM operands)
    fixed = 4 * E * E * cdt_bytes + (2 * 3 * E + 2 * 2 * E) * 4
    per_b = (
        2 * 3 * S * E * in_bytes + 2 * S * E * out_bytes   # double-buffered in/out blocks
        + 4 * (2 * 3 * S * E                               # f32 features + LN output
               + 8 * S * E                                 # q / packed kv / residual f32 temps
               + H * S * E)                                # per-head out-proj intermediate (f32)
        + 3 * H * S * S3 * 4                               # f32 scores + probs (+ slack)
        + cdt_bytes * (8 * S * E + H * S * S3)             # compute-dtype operand copies
    )
    avail = max(vmem_budget - fixed, per_b)
    bt = int(max(1, min(max_block, avail // max(per_b, 1), B)))
    while B % bt:
        bt -= 1
    # keep >= min_grid_steps grid steps so multi-TensorCore chips (v7x) get parallel work
    while bt > 1 and B // bt < min_grid_steps:
        bt -= 1
        while B % bt:
            bt -= 1
    return bt


def cross_attention_fusion(features, params, num_heads, *, batch_block=None,
                           compute_dtype=jnp.bfloat16, approx_recip=True):
    f0, f1, f2 = features
    B, S, E = f0.shape
    assert f1.shape == (B, S, E) and f2.shape == (B, S, E)
    H = num_heads
    assert E % H == 0
    Dh = E // H
    scale = 1.0 / math.sqrt(Dh)

    # ---- coalesce & pre-transform parameters once, outside the kernel ----
    feats = jnp.stack([f0, f1, f2], axis=1)                              # (B, 3, S, E)
    ln = jnp.stack([params["ln_gamma"], params["ln_beta"]], axis=0).astype(jnp.float32)

    in_w = params["in_proj_weight"]                                      # (3E, E) rows: q, k, v
    in_b = params["in_proj_bias"]                                        # (3E,)
    # TODO(synk): for Dh < 128 at large E, zero-pad each head's Dh to 128 here (and in
    # wo_h) for lane-aligned head slices and full-width MXU pushes.
    wq_t = (in_w[:E].T * scale).astype(compute_dtype)                    # (E, E), 1/sqrt(Dh) folded
    wkv_t = jnp.concatenate([in_w[E:2 * E].T, in_w[2 * E:].T],
                            axis=1).astype(compute_dtype)                # (E, 2E) = [Wk^T | Wv^T]
    wo_h = params["out_proj_weight"].T.reshape(H, Dh, E).astype(compute_dtype)
    # biases packed: row 0 = [bq*scale | bo], row 1 = [bk | bv]
    b_all = jnp.stack([
        jnp.concatenate([in_b[:E] * scale, params["out_proj_bias"]]),
        in_b[E:],
    ], axis=0).astype(jnp.float32)                                       # (2, 2E)

    vmem_limit, cores = _tpu_defaults()
    if batch_block is None:
        batch_block = _pick_batch_block(
            B, S, E, H,
            in_bytes=feats.dtype.itemsize, out_bytes=f2.dtype.itemsize,
            cdt_bytes=jnp.dtype(compute_dtype).itemsize,
            vmem_budget=vmem_limit, max_block=16,
            min_grid_steps=2 if cores > 1 else 1)
    Bt = batch_block
    assert B % Bt == 0, "batch_block must divide the batch size"
    grid = (B // Bt,)

    kernel = make_kernel(Bt, S, E, H, compute_dtype, approx_recip)

    def call(single_buffer_consts):
        if single_buffer_consts:
            # Constants as whole-array VMEM operands: one resident copy, no pointless
            # double-buffering of grid-invariant weights.
            const_specs = [pl.BlockSpec(memory_space=pltpu.MemorySpace.VMEM)
                           for _ in range(5)]
        else:
            def cs(shape):
                return pl.BlockSpec(shape, lambda b, _n=len(shape): (0,) * _n)
            const_specs = [cs((2, 3, E)), cs((E, E)), cs((E, 2 * E)),
                           cs((H, Dh, E)), cs((2, 2 * E))]
        return pl.pallas_call(
            kernel,
            out_shape=jax.ShapeDtypeStruct((B, S, E), f2.dtype),
            grid=grid,
            in_specs=[pl.BlockSpec((Bt, 3, S, E), lambda b: (b, 0, 0, 0))] + const_specs,
            out_specs=pl.BlockSpec((Bt, S, E), lambda b: (b, 0, 0)),
            compiler_params=pltpu.CompilerParams(
                dimension_semantics=("parallel",),
                vmem_limit_bytes=vmem_limit),
        )(feats, ln, wq_t, wkv_t, wo_h, b_all)

    try:
        return call(True)
    except Exception:
        # Fallback for jax versions that reject untiled VMEM-space operands: use the
        # (previously validated) grid-invariant blocked constant specs.
        return call(False)


def reference(features, params, num_heads):
    """Pure-JAX reference mirroring nn.MultiheadAttention (batch-first reading)."""
    f0, f1, f2 = features
    B, S, E = f0.shape
    H = num_heads
    Dh = E // H
    g, bt = params["ln_gamma"], params["ln_beta"]
    n = [_layernorm(f, g[i], bt[i]) for i, f in enumerate([f0, f1, f2])]
    kv = jnp.concatenate(n, axis=1)                 # (B, 3S, E)
    q_in = n[2]                                     # (B, S, E)
    in_w, in_b = params["in_proj_weight"], params["in_proj_bias"]
    wq, wk, wv = in_w[:E], in_w[E:2 * E], in_w[2 * E:]
    bq, bk, bv = in_b[:E], in_b[E:2 * E], in_b[2 * E:]
    q = q_in @ wq.T + bq
    k = kv @ wk.T + bk
    v = kv @ wv.T + bv
    qh = q.reshape(B, S, H, Dh).transpose(0, 2, 1, 3)
    kh = k.reshape(B, 3 * S, H, Dh).transpose(0, 2, 1, 3)
    vh = v.reshape(B, 3 * S, H, Dh).transpose(0, 2, 1, 3)
    s = jnp.einsum("bhqd,bhkd->bhqk", qh, kh) / math.sqrt(Dh)
    p = jax.nn.softmax(s, axis=-1)
    o = jnp.einsum("bhqk,bhkd->bhqd", p, vh).transpose(0, 2, 1, 3).reshape(B, S, E)
    out = o @ params["out_proj_weight"].T + params["out_proj_bias"]
    return out + q_in


if __name__ == "__main__":
    B, S, E, H = 2, 8, 32, 4      # batch, seq, embed_dim, num_heads

    key = jax.random.PRNGKey(0)
    keys = jax.random.split(key, 10)

    features = (
        jax.random.normal(keys[0], (B, S, E), jnp.float32),
        jax.random.normal(keys[1], (B, S, E), jnp.float32),
        jax.random.normal(keys[2], (B, S, E), jnp.float32),
    )

    # Deterministic synthetic parameters (shapes match the PyTorch module).
    xavier = math.sqrt(6.0 / (E + E))
    params = {
        "ln_gamma": 1.0 + 0.1 * jax.random.normal(keys[3], (3, E), jnp.float32),
        "ln_beta": 0.05 * jax.random.normal(keys[4], (3, E), jnp.float32),
        "in_proj_weight": jax.random.uniform(keys[5], (3 * E, E), jnp.float32,
                                             -xavier, xavier),
        "in_proj_bias": 0.02 * jax.random.normal(keys[6], (3 * E,), jnp.float32),
        "out_proj_weight": jax.random.uniform(keys[7], (E, E), jnp.float32,
                                              -1.0 / math.sqrt(E), 1.0 / math.sqrt(E)),
        "out_proj_bias": 0.02 * jax.random.normal(keys[8], (E,), jnp.float32),
    }

    ref = reference(features, params, H)

    # Default (fast) path: bf16 MXU operands + EUP approximate reciprocal.
    out = cross_attention_fusion(features, params, H)
    out = jax.block_until_ready(out)
    assert out.shape == (B, S, E)
    assert jnp.allclose(out, ref, rtol=1e-1, atol=1e-1), \
        "mismatch vs JAX reference (bf16 + approx-reciprocal path)"

    # Exact path: f32 compute + exact reciprocal -> tight check of the kernel math.
    out_exact = cross_attention_fusion(features, params, H,
                                       compute_dtype=jnp.float32, approx_recip=False)
    out_exact = jax.block_until_ready(out_exact)
    assert jnp.allclose(out_exact, ref, rtol=1e-4, atol=1e-4), \
        "mismatch vs JAX reference (exact path)"

    # Exercise the multi-step grid path regardless of chip (batch_block=1 -> 2 steps).
    out_b1 = cross_attention_fusion(features, params, H, batch_block=1,
                                    compute_dtype=jnp.float32, approx_recip=False)
    out_b1 = jax.block_until_ready(out_b1)
    assert jnp.allclose(out_b1, ref, rtol=1e-4, atol=1e-4), \
        "mismatch vs JAX reference (batch_block=1 path)"

    print("KERNEL_OK")
</pallas_src>

<mosaic_0001>
module attributes {stable_mosaic.version = 11 : i64} {
  func.func @kernel(%arg0: i32, %arg1: memref<2x3x8x32xf32, #tpu.memory_space<vmem>>, %arg2: memref<2x3x32xf32, #tpu.memory_space<vmem>>, %arg3: memref<32x32xbf16, #tpu.memory_space<vmem>>, %arg4: memref<32x64xbf16, #tpu.memory_space<vmem>>, %arg5: memref<4x8x32xbf16, #tpu.memory_space<vmem>>, %arg6: memref<2x64xf32, #tpu.memory_space<vmem>>, %arg7: memref<2x8x32xf32, #tpu.memory_space<vmem>>) attributes {dimension_semantics = [#tpu.dimension_semantics<parallel>], iteration_bounds = array<i64: 1>, scalar_prefetch = 0 : i64, scratch_operands = 0 : i64, tpu.core_type = #tpu.core_type<tc>, window_params = [{transform_indices = @transform_0, window_bounds = array<i64: 2, 3, 8, 32>}, {pipeline_mode = #tpu.pipeline_mode<synchronous>, transform_indices = @transform_1, window_bounds = array<i64: 2, 3, 32>}, {pipeline_mode = #tpu.pipeline_mode<synchronous>, transform_indices = @transform_2, window_bounds = array<i64: 32, 32>}, {pipeline_mode = #tpu.pipeline_mode<synchronous>, transform_indices = @transform_3, window_bounds = array<i64: 32, 64>}, {pipeline_mode = #tpu.pipeline_mode<synchronous>, transform_indices = @transform_4, window_bounds = array<i64: 4, 8, 32>}, {pipeline_mode = #tpu.pipeline_mode<synchronous>, transform_indices = @transform_5, window_bounds = array<i64: 2, 64>}, {transform_indices = @transform_6, window_bounds = array<i64: 2, 8, 32>}]} {
    %c0 = arith.constant 0 : index
    %c0_0 = arith.constant 0 : index
    %c0_1 = arith.constant 0 : index
    %c0_2 = arith.constant 0 : index
    %0 = vector.load %arg1[%c0, %c0_0, %c0_1, %c0_2] : memref<2x3x8x32xf32, #tpu.memory_space<vmem>>, vector<2x3x8x32xf32>
    %c0_3 = arith.constant 0 : index
    %c0_4 = arith.constant 0 : index
    %c0_5 = arith.constant 0 : index
    %1 = vector.load %arg2[%c0_3, %c0_4, %c0_5] : memref<2x3x32xf32, #tpu.memory_space<vmem>>, vector<1x3x32xf32>
    %2 = vector.shape_cast %1 : vector<1x3x32xf32> to vector<3x32xf32>
    %3 = vector.shape_cast %2 : vector<3x32xf32> to vector<1x3x1x32xf32>
    %c1 = arith.constant 1 : index
    %c0_6 = arith.constant 0 : index
    %c0_7 = arith.constant 0 : index
    %4 = vector.load %arg2[%c1, %c0_6, %c0_7] : memref<2x3x32xf32, #tpu.memory_space<vmem>>, vector<1x3x32xf32>
    %5 = vector.shape_cast %4 : vector<1x3x32xf32> to vector<3x32xf32>
    %6 = vector.shape_cast %5 : vector<3x32xf32> to vector<1x3x1x32xf32>
    %cst = arith.constant dense<0.000000e+00> : vector<2x3x8xf32>
    %7 = vector.multi_reduction <add>, %0, %cst [3] : vector<2x3x8x32xf32> to vector<2x3x8xf32>
    %8 = vector.shape_cast %7 : vector<2x3x8xf32> to vector<2x3x8x1xf32>
    %cst_8 = arith.constant 3.200000e+01 : f32
    %9 = vector.broadcast %cst_8 : f32 to vector<2x3x8x1xf32>
    %10 = arith.divf %8, %9 : vector<2x3x8x1xf32>
    %11 = vector.broadcast %10 : vector<2x3x8x1xf32> to vector<2x3x8x32xf32>
    %12 = arith.subf %0, %11 : vector<2x3x8x32xf32>
    %13 = arith.mulf %12, %12 : vector<2x3x8x32xf32>
    %cst_9 = arith.constant dense<0.000000e+00> : vector<2x3x8xf32>
    %14 = vector.multi_reduction <add>, %13, %cst_9 [3] : vector<2x3x8x32xf32> to vector<2x3x8xf32>
    %15 = vector.shape_cast %14 : vector<2x3x8xf32> to vector<2x3x8x1xf32>
    %cst_10 = arith.constant 3.200000e+01 : f32
    %16 = vector.broadcast %cst_10 : f32 to vector<2x3x8x1xf32>
    %17 = arith.divf %15, %16 : vector<2x3x8x1xf32>
    %cst_11 = arith.constant 9.99999974E-6 : f32
    %18 = vector.broadcast %cst_11 : f32 to vector<2x3x8x1xf32>
    %19 = arith.addf %17, %18 : vector<2x3x8x1xf32>
    %20 = math.rsqrt %19 : vector<2x3x8x1xf32>
    %21 = vector.broadcast %20 : vector<2x3x8x1xf32> to vector<2x3x8x32xf32>
    %22 = arith.mulf %12, %21 : vector<2x3x8x32xf32>
    %23 = vector.broadcast %3 : vector<1x3x1x32xf32> to vector<2x3x8x32xf32>
    %24 = arith.mulf %22, %23 : vector<2x3x8x32xf32>
    %25 = vector.broadcast %6 : vector<1x3x1x32xf32> to vector<2x3x8x32xf32>
    %26 = arith.addf %24, %25 : vector<2x3x8x32xf32>
    %27 = vector.extract_strided_slice %26 {offsets = [0, 2, 0, 0], sizes = [2, 1, 8, 32], strides = [1, 1, 1, 1]} : vector<2x3x8x32xf32> to vector<2x1x8x32xf32>
    %28 = vector.shape_cast %27 : vector<2x1x8x32xf32> to vector<2x8x32xf32>
    %29 = vector.shape_cast %28 : vector<2x8x32xf32> to vector<16x32xf32>
    %30 = vector.shape_cast %26 : vector<2x3x8x32xf32> to vector<48x32xf32>
    %c0_12 = arith.constant 0 : index
    %c0_13 = arith.constant 0 : index
    %31 = vector.load %arg6[%c0_12, %c0_13] : memref<2x64xf32, #tpu.memory_space<vmem>>, vector<1x32xf32>
    %c0_14 = arith.constant 0 : index
    %c32 = arith.constant 32 : index
    %32 = vector.load %arg6[%c0_14, %c32] : memref<2x64xf32, #tpu.memory_space<vmem>>, vector<1x32xf32>
    %c1_15 = arith.constant 1 : index
    %c0_16 = arith.constant 0 : index
    %33 = vector.load %arg6[%c1_15, %c0_16] : memref<2x64xf32, #tpu.memory_space<vmem>>, vector<1x64xf32>
    %34 = arith.truncf %29 : vector<16x32xf32> to vector<16x32xbf16>
    %c0_17 = arith.constant 0 : index
    %c0_18 = arith.constant 0 : index
    %35 = vector.load %arg3[%c0_17, %c0_18] : memref<32x32xbf16, #tpu.memory_space<vmem>>, vector<32x32xbf16>
    %cst_19 = arith.constant dense<0.000000e+00> : vector<16x32xf32>
    %36 = tpu.matmul %34, %35, %cst_19 {dimension_numbers = #tpu.dot_dimension_numbers<[1], [0], [0], [1], [0, 0, 1, 1], [], []>} : vector<16x32xbf16>, vector<32x32xbf16>, vector<16x32xf32> -> vector<16x32xf32>
    %37 = vector.broadcast %31 : vector<1x32xf32> to vector<16x32xf32>
    %38 = arith.addf %36, %37 : vector<16x32xf32>
    %39 = arith.truncf %30 : vector<48x32xf32> to vector<48x32xbf16>
    %c0_20 = arith.constant 0 : index
    %c0_21 = arith.constant 0 : index
    %40 = vector.load %arg4[%c0_20, %c0_21] : memref<32x64xbf16, #tpu.memory_space<vmem>>, vector<32x64xbf16>
    %cst_22 = arith.constant dense<0.000000e+00> : vector<48x64xf32>
    %41 = tpu.matmul %39, %40, %cst_22 {dimension_numbers = #tpu.dot_dimension_numbers<[1], [0], [0], [1], [0, 0, 1, 1], [], []>} : vector<48x32xbf16>, vector<32x64xbf16>, vector<48x64xf32> -> vector<48x64xf32>
    %42 = vector.broadcast %33 : vector<1x64xf32> to vector<48x64xf32>
    %43 = arith.addf %41, %42 : vector<48x64xf32>
    %44 = arith.truncf %38 : vector<16x32xf32> to vector<16x32xbf16>
    %45 = vector.extract_strided_slice %43 {offsets = [0, 0], sizes = [48, 32], strides = [1, 1]} : vector<48x64xf32> to vector<48x32xf32>
    %46 = arith.truncf %45 : vector<48x32xf32> to vector<48x32xbf16>
    %47 = vector.extract_strided_slice %43 {offsets = [0, 32], sizes = [48, 32], strides = [1, 1]} : vector<48x64xf32> to vector<48x32xf32>
    %48 = arith.truncf %47 : vector<48x32xf32> to vector<48x32xbf16>
    %49 = vector.shape_cast %44 : vector<16x32xbf16> to vector<16x4x8xbf16>
    %50 = tpu.transpose %49, [1, 0, 2] : vector<16x4x8xbf16> -> vector<4x16x8xbf16>
    %51 = vector.shape_cast %50 : vector<4x16x8xbf16> to vector<8x8x8xbf16>
    %52 = vector.shape_cast %46 : vector<48x32xbf16> to vector<48x4x8xbf16>
    %53 = tpu.transpose %52, [1, 0, 2] : vector<48x4x8xbf16> -> vector<4x48x8xbf16>
    %54 = vector.shape_cast %53 : vector<4x48x8xbf16> to vector<8x24x8xbf16>
    %55 = vector.shape_cast %48 : vector<48x32xbf16> to vector<48x4x8xbf16>
    %56 = tpu.transpose %55, [1, 0, 2] : vector<48x4x8xbf16> -> vector<4x48x8xbf16>
    %57 = vector.shape_cast %56 : vector<4x48x8xbf16> to vector<8x24x8xbf16>
    "tpu.trace_start"() <{level = 10 : i32, message = "bqd,bkd->bqk"}> : () -> ()
    %cst_23 = arith.constant dense<0.000000e+00> : vector<8x8x24xf32>
    %58 = tpu.matmul %51, %54, %cst_23 {dimension_numbers = #tpu.dot_dimension_numbers<[2], [2], [1], [1], [0, 0, 0, 1, 1, 1], [0], [0]>} : vector<8x8x8xbf16>, vector<8x24x8xbf16>, vector<8x8x24xf32> -> vector<8x8x24xf32>
    "tpu.trace_stop"() : () -> ()
    %cst_24 = arith.constant dense<0xFF800000> : vector<8x8xf32>
    %59 = vector.multi_reduction <maximumf>, %58, %cst_24 [2] : vector<8x8x24xf32> to vector<8x8xf32>
    %60 = vector.shape_cast %59 : vector<8x8xf32> to vector<8x8x1xf32>
    %61 = vector.broadcast %60 : vector<8x8x1xf32> to vector<8x8x24xf32>
    %62 = arith.subf %58, %61 : vector<8x8x24xf32>
    %63 = math.exp %62 : vector<8x8x24xf32>
    %cst_25 = arith.constant dense<0.000000e+00> : vector<8x8xf32>
    %64 = vector.multi_reduction <add>, %63, %cst_25 [2] : vector<8x8x24xf32> to vector<8x8xf32>
    %65 = vector.shape_cast %64 : vector<8x8xf32> to vector<8x8x1xf32>
    %66 = tpu.reciprocal %65 {approx = true} : vector<8x8x1xf32> -> vector<8x8x1xf32>
    %67 = vector.broadcast %66 : vector<8x8x1xf32> to vector<8x8x24xf32>
    %68 = arith.mulf %63, %67 : vector<8x8x24xf32>
    %69 = arith.truncf %68 : vector<8x8x24xf32> to vector<8x8x24xbf16>
    "tpu.trace_start"() <{level = 10 : i32, message = "bqk,bkd->bqd"}> : () -> ()
    %cst_26 = arith.constant dense<0.000000e+00> : vector<8x8x8xf32>
    %70 = tpu.matmul %69, %57, %cst_26 {dimension_numbers = #tpu.dot_dimension_numbers<[2], [1], [1], [2], [0, 0, 0, 1, 1, 2], [0], [0]>} : vector<8x8x24xbf16>, vector<8x24x8xbf16>, vector<8x8x8xf32> -> vector<8x8x8xf32>
    "tpu.trace_stop"() : () -> ()
    %71 = vector.shape_cast %70 : vector<8x8x8xf32> to vector<4x16x8xf32>
    %72 = arith.truncf %71 : vector<4x16x8xf32> to vector<4x16x8xbf16>
    %c0_27 = arith.constant 0 : index
    %c0_28 = arith.constant 0 : index
    %c0_29 = arith.constant 0 : index
    %73 = vector.load %arg5[%c0_27, %c0_28, %c0_29] : memref<4x8x32xbf16, #tpu.memory_space<vmem>>, vector<4x8x32xbf16>
    "tpu.trace_start"() <{level = 10 : i32, message = "hnd,hde->hne"}> : () -> ()
    %cst_30 = arith.constant dense<0.000000e+00> : vector<4x16x32xf32>
    %74 = tpu.matmul %72, %73, %cst_30 {dimension_numbers = #tpu.dot_dimension_numbers<[2], [1], [1], [2], [0, 0, 0, 1, 1, 2], [0], [0]>} : vector<4x16x8xbf16>, vector<4x8x32xbf16>, vector<4x16x32xf32> -> vector<4x16x32xf32>
    "tpu.trace_stop"() : () -> ()
    %cst_31 = arith.constant dense<0.000000e+00> : vector<16x32xf32>
    %75 = vector.multi_reduction <add>, %74, %cst_31 [0] : vector<4x16x32xf32> to vector<16x32xf32>
    %76 = vector.broadcast %32 : vector<1x32xf32> to vector<16x32xf32>
    %77 = arith.addf %75, %76 : vector<16x32xf32>
    %78 = arith.addf %77, %29 : vector<16x32xf32>
    %79 = vector.shape_cast %78 : vector<16x32xf32> to vector<2x8x32xf32>
    %c0_32 = arith.constant 0 : index
    %c0_33 = arith.constant 0 : index
    %c0_34 = arith.constant 0 : index
    %80 = vector.load %arg7[%c0_32, %c0_33, %c0_34] : memref<2x8x32xf32, #tpu.memory_space<vmem>>, vector<2x8x32xf32>
    tpu.vector_store %arg7[%c0_32, %c0_33, %c0_34], %79 {strides = array<i32>} : memref<2x8x32xf32, #tpu.memory_space<vmem>>, vector<2x8x32xf32>,
    return
  }
  func.func @transform_0(%arg0: i32) -> (i32, i32, i32, i32) {
    %c0_i32 = arith.constant 0 : i32
    %c0_i32_0 = arith.constant 0 : i32
    %c0_i32_1 = arith.constant 0 : i32
    %c0_i32_2 = arith.constant 0 : i32
    return %arg0, %c0_i32, %c0_i32_0, %c0_i32_1 : i32, i32, i32, i32
  }
  func.func @transform_1(%arg0: i32) -> (i32, i32, i32) {
    %c0_i32 = arith.constant 0 : i32
    %c0_i32_0 = arith.constant 0 : i32
    %c0_i32_1 = arith.constant 0 : i32
    %c0_i32_2 = arith.constant 0 : i32
    return %c0_i32, %c0_i32_0, %c0_i32_1 : i32, i32, i32
  }
  func.func @transform_2(%arg0: i32) -> (i32, i32) {
    %c0_i32 = arith.constant 0 : i32
    %c0_i32_0 = arith.constant 0 : i32
    %c0_i32_1 = arith.constant 0 : i32
    return %c0_i32, %c0_i32_0 : i32, i32
  }
  func.func @transform_3(%arg0: i32) -> (i32, i32) {
    %c0_i32 = arith.constant 0 : i32
    %c0_i32_0 = arith.constant 0 : i32
    %c0_i32_1 = arith.constant 0 : i32
    return %c0_i32, %c0_i32_0 : i32, i32
  }
  func.func @transform_4(%arg0: i32) -> (i32, i32, i32) {
    %c0_i32 = arith.constant 0 : i32
    %c0_i32_0 = arith.constant 0 : i32
    %c0_i32_1 = arith.constant 0 : i32
    %c0_i32_2 = arith.constant 0 : i32
    return %c0_i32, %c0_i32_0, %c0_i32_1 : i32, i32, i32
  }
  func.func @transform_5(%arg0: i32) -> (i32, i32) {
    %c0_i32 = arith.constant 0 : i32
    %c0_i32_0 = arith.constant 0 : i32
    %c0_i32_1 = arith.constant 0 : i32
    return %c0_i32, %c0_i32_0 : i32, i32
  }
  func.func @transform_6(%arg0: i32) -> (i32, i32, i32) {
    %c0_i32 = arith.constant 0 : i32
    %c0_i32_0 = arith.constant 0 : i32
    %c0_i32_1 = arith.constant 0 : i32
    return %arg0, %c0_i32, %c0_i32_0 : i32, i32, i32
  }
}

module attributes {stable_mosaic.version = 11 : i64} {
  func.func @kernel(%arg0: i32, %arg1: memref<2x3x8x32xf32, #tpu.memory_space<vmem>>, %arg2: memref<2x3x32xf32, #tpu.memory_space<vmem>>, %arg3: memref<32x32xbf16, #tpu.memory_space<vmem>>, %arg4: memref<32x64xbf16, #tpu.memory_space<vmem>>, %arg5: memref<4x8x32xbf16, #tpu.memory_space<vmem>>, %arg6: memref<2x64xf32, #tpu.memory_space<vmem>>, %arg7: memref<2x8x32xf32, #tpu.memory_space<vmem>>) attributes {dimension_semantics = [#tpu.dimension_semantics<parallel>], iteration_bounds = array<i64: 1>, scalar_prefetch = 0 : i64, scratch_operands = 0 : i64, tpu.core_type = #tpu.core_type<tc>, window_params = [{transform_indices = @transform_0, window_bounds = array<i64: 2, 3, 8, 32>}, {pipeline_mode = #tpu.pipeline_mode<synchronous>, transform_indices = @transform_1, window_bounds = array<i64: 2, 3, 32>}, {pipeline_mode = #tpu.pipeline_mode<synchronous>, transform_indices = @transform_2, window_bounds = array<i64: 32, 32>}, {pipeline_mode = #tpu.pipeline_mode<synchronous>, transform_indices = @transform_3, window_bounds = array<i64: 32, 64>}, {pipeline_mode = #tpu.pipeline_mode<synchronous>, transform_indices = @transform_4, window_bounds = array<i64: 4, 8, 32>}, {pipeline_mode = #tpu.pipeline_mode<synchronous>, transform_indices = @transform_5, window_bounds = array<i64: 2, 64>}, {transform_indices = @transform_6, window_bounds = array<i64: 2, 8, 32>}]} {
    %c0 = arith.constant 0 : index
    %c0_0 = arith.constant 0 : index
    %c0_1 = arith.constant 0 : index
    %c0_2 = arith.constant 0 : index
    %0 = vector.load %arg1[%c0, %c0_0, %c0_1, %c0_2] : memref<2x3x8x32xf32, #tpu.memory_space<vmem>>, vector<2x3x8x32xf32>
    %c0_3 = arith.constant 0 : index
    %c0_4 = arith.constant 0 : index
    %c0_5 = arith.constant 0 : index
    %1 = vector.load %arg2[%c0_3, %c0_4, %c0_5] : memref<2x3x32xf32, #tpu.memory_space<vmem>>, vector<1x3x32xf32>
    %2 = vector.shape_cast %1 : vector<1x3x32xf32> to vector<3x32xf32>
    %3 = vector.shape_cast %2 : vector<3x32xf32> to vector<1x3x1x32xf32>
    %c1 = arith.constant 1 : index
    %c0_6 = arith.constant 0 : index
    %c0_7 = arith.constant 0 : index
    %4 = vector.load %arg2[%c1, %c0_6, %c0_7] : memref<2x3x32xf32, #tpu.memory_space<vmem>>, vector<1x3x32xf32>
    %5 = vector.shape_cast %4 : vector<1x3x32xf32> to vector<3x32xf32>
    %6 = vector.shape_cast %5 : vector<3x32xf32> to vector<1x3x1x32xf32>
    %cst = arith.constant dense<0.000000e+00> : vector<2x3x8xf32>
    %7 = vector.multi_reduction <add>, %0, %cst [3] : vector<2x3x8x32xf32> to vector<2x3x8xf32>
    %8 = vector.shape_cast %7 : vector<2x3x8xf32> to vector<2x3x8x1xf32>
    %cst_8 = arith.constant 3.200000e+01 : f32
    %9 = vector.broadcast %cst_8 : f32 to vector<2x3x8x1xf32>
    %10 = arith.divf %8, %9 : vector<2x3x8x1xf32>
    %11 = vector.broadcast %10 : vector<2x3x8x1xf32> to vector<2x3x8x32xf32>
    %12 = arith.subf %0, %11 : vector<2x3x8x32xf32>
    %13 = arith.mulf %12, %12 : vector<2x3x8x32xf32>
    %cst_9 = arith.constant dense<0.000000e+00> : vector<2x3x8xf32>
    %14 = vector.multi_reduction <add>, %13, %cst_9 [3] : vector<2x3x8x32xf32> to vector<2x3x8xf32>
    %15 = vector.shape_cast %14 : vector<2x3x8xf32> to vector<2x3x8x1xf32>
    %cst_10 = arith.constant 3.200000e+01 : f32
    %16 = vector.broadcast %cst_10 : f32 to vector<2x3x8x1xf32>
    %17 = arith.divf %15, %16 : vector<2x3x8x1xf32>
    %cst_11 = arith.constant 9.99999974E-6 : f32
    %18 = vector.broadcast %cst_11 : f32 to vector<2x3x8x1xf32>
    %19 = arith.addf %17, %18 : vector<2x3x8x1xf32>
    %20 = math.rsqrt %19 : vector<2x3x8x1xf32>
    %21 = vector.broadcast %20 : vector<2x3x8x1xf32> to vector<2x3x8x32xf32>
    %22 = arith.mulf %12, %21 : vector<2x3x8x32xf32>
    %23 = vector.broadcast %3 : vector<1x3x1x32xf32> to vector<2x3x8x32xf32>
    %24 = arith.mulf %22, %23 : vector<2x3x8x32xf32>
    %25 = vector.broadcast %6 : vector<1x3x1x32xf32> to vector<2x3x8x32xf32>
    %26 = arith.addf %24, %25 : vector<2x3x8x32xf32>
    %27 = vector.extract_strided_slice %26 {offsets = [0, 2, 0, 0], sizes = [2, 1, 8, 32], strides = [1, 1, 1, 1]} : vector<2x3x8x32xf32> to vector<2x1x8x32xf32>
    %28 = vector.shape_cast %27 : vector<2x1x8x32xf32> to vector<2x8x32xf32>
    %29 = vector.shape_cast %28 : vector<2x8x32xf32> to vector<16x32xf32>
    %30 = vector.shape_cast %26 : vector<2x3x8x32xf32> to vector<48x32xf32>
    %c0_12 = arith.constant 0 : index
    %c0_13 = arith.constant 0 : index
    %31 = vector.load %arg6[%c0_12, %c0_13] : memref<2x64xf32, #tpu.memory_space<vmem>>, vector<1x32xf32>
    %c0_14 = arith.constant 0 : index
    %c32 = arith.constant 32 : index
    %32 = vector.load %arg6[%c0_14, %c32] : memref<2x64xf32, #tpu.memory_space<vmem>>, vector<1x32xf32>
    %c1_15 = arith.constant 1 : index
    %c0_16 = arith.constant 0 : index
    %33 = vector.load %arg6[%c1_15, %c0_16] : memref<2x64xf32, #tpu.memory_space<vmem>>, vector<1x64xf32>
    %34 = arith.truncf %29 : vector<16x32xf32> to vector<16x32xbf16>
    %c0_17 = arith.constant 0 : index
    %c0_18 = arith.constant 0 : index
    %35 = vector.load %arg3[%c0_17, %c0_18] : memref<32x32xbf16, #tpu.memory_space<vmem>>, vector<32x32xbf16>
    %cst_19 = arith.constant dense<0.000000e+00> : vector<16x32xf32>
    %36 = tpu.matmul %34, %35, %cst_19 {dimension_numbers = #tpu.dot_dimension_numbers<[1], [0], [0], [1], [0, 0, 1, 1], [], []>} : vector<16x32xbf16>, vector<32x32xbf16>, vector<16x32xf32> -> vector<16x32xf32>
    %37 = vector.broadcast %31 : vector<1x32xf32> to vector<16x32xf32>
    %38 = arith.addf %36, %37 : vector<16x32xf32>
    %39 = arith.truncf %30 : vector<48x32xf32> to vector<48x32xbf16>
    %c0_20 = arith.constant 0 : index
    %c0_21 = arith.constant 0 : index
    %40 = vector.load %arg4[%c0_20, %c0_21] : memref<32x64xbf16, #tpu.memory_space<vmem>>, vector<32x64xbf16>
    %cst_22 = arith.constant dense<0.000000e+00> : vector<48x64xf32>
    %41 = tpu.matmul %39, %40, %cst_22 {dimension_numbers = #tpu.dot_dimension_numbers<[1], [0], [0], [1], [0, 0, 1, 1], [], []>} : vector<48x32xbf16>, vector<32x64xbf16>, vector<48x64xf32> -> vector<48x64xf32>
    %42 = vector.broadcast %33 : vector<1x64xf32> to vector<48x64xf32>
    %43 = arith.addf %41, %42 : vector<48x64xf32>
    %44 = arith.truncf %38 : vector<16x32xf32> to vector<16x32xbf16>
    %45 = vector.extract_strided_slice %43 {offsets = [0, 0], sizes = [48, 32], strides = [1, 1]} : vector<48x64xf32> to vector<48x32xf32>
    %46 = arith.truncf %45 : vector<48x32xf32> to vector<48x32xbf16>
    %47 = vector.extract_strided_slice %43 {offsets = [0, 32], sizes = [48, 32], strides = [1, 1]} : vector<48x64xf32> to vector<48x32xf32>
    %48 = arith.truncf %47 : vector<48x32xf32> to vector<48x32xbf16>
    %49 = vector.shape_cast %44 : vector<16x32xbf16> to vector<16x4x8xbf16>
    %50 = tpu.transpose %49, [1, 0, 2] : vector<16x4x8xbf16> -> vector<4x16x8xbf16>
    %51 = vector.shape_cast %50 : vector<4x16x8xbf16> to vector<8x8x8xbf16>
    %52 = vector.shape_cast %46 : vector<48x32xbf16> to vector<48x4x8xbf16>
    %53 = tpu.transpose %52, [1, 0, 2] : vector<48x4x8xbf16> -> vector<4x48x8xbf16>
    %54 = vector.shape_cast %53 : vector<4x48x8xbf16> to vector<8x24x8xbf16>
    %55 = vector.shape_cast %48 : vector<48x32xbf16> to vector<48x4x8xbf16>
    %56 = tpu.transpose %55, [1, 0, 2] : vector<48x4x8xbf16> -> vector<4x48x8xbf16>
    %57 = vector.shape_cast %56 : vector<4x48x8xbf16> to vector<8x24x8xbf16>
    "tpu.trace_start"() <{level = 10 : i32, message = "bqd,bkd->bqk"}> : () -> ()
    %cst_23 = arith.constant dense<0.000000e+00> : vector<8x8x24xf32>
    %58 = tpu.matmul %51, %54, %cst_23 {dimension_numbers = #tpu.dot_dimension_numbers<[2], [2], [1], [1], [0, 0, 0, 1, 1, 1], [0], [0]>} : vector<8x8x8xbf16>, vector<8x24x8xbf16>, vector<8x8x24xf32> -> vector<8x8x24xf32>
    "tpu.trace_stop"() : () -> ()
    %cst_24 = arith.constant dense<0xFF800000> : vector<8x8xf32>
    %59 = vector.multi_reduction <maximumf>, %58, %cst_24 [2] : vector<8x8x24xf32> to vector<8x8xf32>
    %60 = vector.shape_cast %59 : vector<8x8xf32> to vector<8x8x1xf32>
    %61 = vector.broadcast %60 : vector<8x8x1xf32> to vector<8x8x24xf32>
    %62 = arith.subf %58, %61 : vector<8x8x24xf32>
    %63 = math.exp %62 : vector<8x8x24xf32>
    %cst_25 = arith.constant dense<0.000000e+00> : vector<8x8xf32>
    %64 = vector.multi_reduction <add>, %63, %cst_25 [2] : vector<8x8x24xf32> to vector<8x8xf32>
    %65 = vector.shape_cast %64 : vector<8x8xf32> to vector<8x8x1xf32>
    %66 = tpu.reciprocal %65 {approx = true} : vector<8x8x1xf32> -> vector<8x8x1xf32>
    %67 = vector.broadcast %66 : vector<8x8x1xf32> to vector<8x8x24xf32>
    %68 = arith.mulf %63, %67 : vector<8x8x24xf32>
    %69 = arith.truncf %68 : vector<8x8x24xf32> to vector<8x8x24xbf16>
    "tpu.trace_start"() <{level = 10 : i32, message = "bqk,bkd->bqd"}> : () -> ()
    %cst_26 = arith.constant dense<0.000000e+00> : vector<8x8x8xf32>
    %70 = tpu.matmul %69, %57, %cst_26 {dimension_numbers = #tpu.dot_dimension_numbers<[2], [1], [1], [2], [0, 0, 0, 1, 1, 2], [0], [0]>} : vector<8x8x24xbf16>, vector<8x24x8xbf16>, vector<8x8x8xf32> -> vector<8x8x8xf32>
    "tpu.trace_stop"() : () -> ()
    %71 = vector.shape_cast %70 : vector<8x8x8xf32> to vector<4x16x8xf32>
    %72 = arith.truncf %71 : vector<4x16x8xf32> to vector<4x16x8xbf16>
    %c0_27 = arith.constant 0 : index
    %c0_28 = arith.constant 0 : index
    %c0_29 = arith.constant 0 : index
    %73 = vector.load %arg5[%c0_27, %c0_28, %c0_29] : memref<4x8x32xbf16, #tpu.memory_space<vmem>>, vector<4x8x32xbf16>
    "tpu.trace_start"() <{level = 10 : i32, message = "hnd,hde->hne"}> : () -> ()
    %cst_30 = arith.constant dense<0.000000e+00> : vector<4x16x32xf32>
    %74 = tpu.matmul %72, %73, %cst_30 {dimension_numbers = #tpu.dot_dimension_numbers<[2], [1], [1], [2], [0, 0, 0, 1, 1, 2], [0], [0]>} : vector<4x16x8xbf16>, vector<4x8x32xbf16>, vector<4x16x32xf32> -> vector<4x16x32xf32>
    "tpu.trace_stop"() : () -> ()
    %cst_31 = arith.constant dense<0.000000e+00> : vector<16x32xf32>
    %75 = vector.multi_reduction <add>, %74, %cst_31 [0] : vector<4x16x32xf32> to vector<16x32xf32>
    %76 = vector.broadcast %32 : vector<1x32xf32> to vector<16x32xf32>
    %77 = arith.addf %75, %76 : vector<16x32xf32>
    %78 = arith.addf %77, %29 : vector<16x32xf32>
    %79 = vector.shape_cast %78 : vector<16x32xf32> to vector<2x8x32xf32>
    %c0_32 = arith.constant 0 : index
    %c0_33 = arith.constant 0 : index
    %c0_34 = arith.constant 0 : index
    %80 = vector.load %arg7[%c0_32, %c0_33, %c0_34] : memref<2x8x32xf32, #tpu.memory_space<vmem>>, vector<2x8x32xf32>
    tpu.vector_store %arg7[%c0_32, %c0_33, %c0_34], %79 {strides = array<i32>} : memref<2x8x32xf32, #tpu.memory_space<vmem>>, vector<2x8x32xf32>,
    return
  }
  func.func @transform_0(%arg0: i32) -> (i32, i32, i32, i32) {
    %c0_i32 = arith.constant 0 : i32
    %c0_i32_0 = arith.constant 0 : i32
    %c0_i32_1 = arith.constant 0 : i32
    %c0_i32_2 = arith.constant 0 : i32
    return %arg0, %c0_i32, %c0_i32_0, %c0_i32_1 : i32, i32, i32, i32
  }
  func.func @transform_1(%arg0: i32) -> (i32, i32, i32) {
    %c0_i32 = arith.constant 0 : i32
    %c0_i32_0 = arith.constant 0 : i32
    %c0_i32_1 = arith.constant 0 : i32
    %c0_i32_2 = arith.constant 0 : i32
    return %c0_i32, %c0_i32_0, %c0_i32_1 : i32, i32, i32
  }
  func.func @transform_2(%arg0: i32) -> (i32, i32) {
    %c0_i32 = arith.constant 0 : i32
    %c0_i32_0 = arith.constant 0 : i32
    %c0_i32_1 = arith.constant 0 : i32
    return %c0_i32, %c0_i32_0 : i32, i32
  }
  func.func @transform_3(%arg0: i32) -> (i32, i32) {
    %c0_i32 = arith.constant 0 : i32
    %c0_i32_0 = arith.constant 0 : i32
    %c0_i32_1 = arith.constant 0 : i32
    return %c0_i32, %c0_i32_0 : i32, i32
  }
  func.func @transform_4(%arg0: i32) -> (i32, i32, i32) {
    %c0_i32 = arith.constant 0 : i32
    %c0_i32_0 = arith.constant 0 : i32
    %c0_i32_1 = arith.constant 0 : i32
    %c0_i32_2 = arith.constant 0 : i32
    return %c0_i32, %c0_i32_0, %c0_i32_1 : i32, i32, i32
  }
  func.func @transform_5(%arg0: i32) -> (i32, i32) {
    %c0_i32 = arith.constant 0 : i32
    %c0_i32_0 = arith.constant 0 : i32
    %c0_i32_1 = arith.constant 0 : i32
    return %c0_i32, %c0_i32_0 : i32, i32
  }
  func.func @transform_6(%arg0: i32) -> (i32, i32, i32) {
    %c0_i32 = arith.constant 0 : i32
    %c0_i32_0 = arith.constant 0 : i32
    %c0_i32_1 = arith.constant 0 : i32
    return %arg0, %c0_i32, %c0_i32_0 : i32, i32, i32
  }
}

</mosaic_0001>

<bundles_post_ra>
// kernel: tpu_custom_call.1
= control target key start
LH: loop header
LB: loop body
LE: loop exit
PB: predicated region body
PF: predicated region fallthrough
CT: control target
= control target key end

     0   :  { %11 = vsyncpa [#allocation3], 0  ;;  %s4877_s0 = inlined_call_operand.hbm [shape: f32[2,3,8,32], index: 0, kind: input, shape index: {}]   ;;  %s4878_s1 = inlined_call_operand.vmem [shape: f32[2,3,32], index: 1, kind: input, shape index: {}]   ;;  %s4879_s2 = inlined_call_operand.vmem [shape: bf16[32,32], index: 2, kind: input, shape index: {}]   ;;  %s4880_s3 = inlined_call_operand.hbm [shape: bf16[32,64], index: 3, kind: input, shape index: {}]   ;;  %s4881_s4 = inlined_call_operand.hbm [shape: bf16[4,8,32], index: 4, kind: input, shape index: {}]   ;;  %s4882_s5 = inlined_call_operand.vmem [shape: f32[2,64], index: 5, kind: input, shape index: {}]   ;;  %s4883_s6 = inlined_call_operand.hbm [shape: f32[2,8,32], index: 6, kind: output, shape index: {}]  }
   0x1   :  { %12 = vsyncpa [#allocation6], 0 }
   0x2   :  { %13 = vsyncpa [#allocation4], 0  ;;  %s3970_s21 = smov [#allocation5]   ;;  %s3876_s25 = scalar_lea.hbm %s4880_s3, 256 }
   0x3   :  { %s35_s22 = sshll.u32 %s3970_s21, 4  ;;  %p3877_p0 = scmp.ne.s32.totalorder %s4880_s3, %s3876_s25  ;;  %s36_s22 = int_to_ptr.vmem [resolvable:$true] %s35_s22 }
   0x4   :  { %p3880_p1 = scmp.lt.u32.totalorder %s3876_s25, %s4880_s3 }
   0x6   :  { %p3882_p2 = pnand %p3880_p1, %p3877_p0 }
   0x8   :  { %3885 = shalt.err (!%p3882_p2)
}
   0x9   :  { %s3886_s30 = scalar_lea.vmem %s36_s22, 256  ;;  %p3891_p4 = scmp.lt.s32.totalorder %s36_s22, %s36_s22 }
   0xa   :  { %p3887_p3 = scmp.ne.s32.totalorder %s36_s22, %s3886_s30  ;;  %p3892_p5 = scmp.lt.s32.totalorder %s3886_s30, %s3886_s30 }
   0xc   :  { %p3893_p6 = por %p3892_p5, %p3891_p4 }
   0xe   :  { %p3894_p7 = pnand %p3893_p6, %p3887_p3 }
  0x10   :  { %3897 = shalt.err (!%p3894_p7)
}
  0x11   :  { %s3971_s7 = smov 64   ;;  %s3972_s8 = smov 4  }
  0x12   :  { %41 = dma.hbm_to_vmem [thread:$0]  %s4880_s3, 256, %s36_s22, [#allocation6], %s3971_s7, %s3971_s7, %s3972_s8  }
  0x13   :  { %s3973_s11 = smov [#allocation2]   ;;  %s3898_s15 = scalar_lea.hbm %s4877_s0, 768 }
  0x14   :  { %s19_s12 = sshll.u32 %s3973_s11, 4  ;;  %p3899_p8 = scmp.ne.s32.totalorder %s4877_s0, %s3898_s15  ;;  %s20_s12 = int_to_ptr.vmem [resolvable:$true] %s19_s12 }
  0x15   :  { %p3902_p9 = scmp.lt.u32.totalorder %s3898_s15, %s4877_s0 }
  0x17   :  { %p3904_p10 = pnand %p3902_p9, %p3899_p8 }
  0x19   :  { %3907 = shalt.err (!%p3904_p10)
}
  0x1a   :  { %s3908_s20 = scalar_lea.vmem %s20_s12, 768  ;;  %p3913_p12 = scmp.lt.s32.totalorder %s20_s12, %s20_s12 }
  0x1b   :  { %p3909_p11 = scmp.ne.s32.totalorder %s20_s12, %s3908_s20  ;;  %p3914_p13 = scmp.lt.s32.totalorder %s3908_s20, %s3908_s20 }
  0x1d   :  { %p3915_p0 = por %p3914_p13, %p3913_p12 }
  0x1f   :  { %p3916_p1 = pnand %p3915_p0, %p3909_p11 }
  0x21   :  { %3919 = shalt.err (!%p3916_p1)
}
  0x22   :  { %s3974_s3 = smov 128   ;;  %s3975_s21 = smov 8  }
  0x23   :  { %25 = dma.hbm_to_vmem [thread:$0]  %s4877_s0, 768, %s20_s12, [#allocation3], %s3974_s3, %s3974_s3, %s3975_s21  }
  0x24   :  { %s3976_s24 = smov [#allocation7]   ;;  %s3920_s28 = scalar_lea.hbm %s4881_s4, 256 }
  0x25   :  { %s47_s25 = sshll.u32 %s3976_s24, 4  ;;  %p3921_p2 = scmp.ne.s32.totalorder %s4881_s4, %s3920_s28  ;;  %s48_s25 = int_to_ptr.vmem [resolvable:$true] %s47_s25 }
  0x26   :  { %p3924_p3 = scmp.lt.u32.totalorder %s3920_s28, %s4881_s4 }
  0x28   :  { %p3926_p4 = pnand %p3924_p3, %p3921_p2 }
  0x2a   :  { %3929 = shalt.err (!%p3926_p4)
}
  0x2b   :  { %s3930_s11 = scalar_lea.vmem %s48_s25, 256  ;;  %p3935_p6 = scmp.lt.s32.totalorder %s48_s25, %s48_s25 }
  0x2c   :  { %p3931_p5 = scmp.ne.s32.totalorder %s48_s25, %s3930_s11  ;;  %p3936_p7 = scmp.lt.s32.totalorder %s3930_s11, %s3930_s11 }
  0x2e   :  { %p3937_p8 = por %p3936_p7, %p3935_p6 }
  0x30   :  { %p3938_p9 = pnand %p3937_p8, %p3931_p5 }
  0x32   :  { %3941 = shalt.err (!%p3938_p9)
}
  0x33   :  { %53 = dma.hbm_to_vmem [thread:$0]  %s4881_s4, 256, %s48_s25, [#allocation6], %s3971_s7, %s3971_s7, %s3972_s8  }
  0x34   :  { %3964 = dma.done.wait [#allocation3], 768  }
  0x35   :  { %3965 = vsyncadd [#allocation3], 4294966528 }
  0x36   :  { %3966 = dma.done.wait [#allocation6], 512  }
  0x37   :  { %3967 = vsyncadd [#allocation6], 4294966784  ;;  %vm123_vm0 = vcmask 261120   ;;  %v66_v0 = vld [vmem:[#allocation2] sm:$0xff]  ;;  %v68_v1 = vld [vmem:[#allocation2 + $0x10] sm:$0xff]  ;;  %v3977_v43 = vmov 0.0   ;;  %v85_v50 = vlaneseq }
  0x38   :  { %v67_v2 = vld [vmem:[#allocation2 + $0x8] sm:$0xff]  ;;  %v124_v3 = vsel %vm123_vm0, %v66_v0, 0.0  ;;  %v130_v4 = vsel %vm123_vm0, %v68_v1, 0.0  ;;  %v69_v5 = vld [vmem:[#allocation2 + $0x18] sm:$0xff]  ;;  %v70_v8 = vld [vmem:[#allocation2 + $0x20] sm:$0xff]  ;;  %3641 = vmatprep.subr.bf16.mxu1 %v3977_v43  ;;  %3633 = vmatprep.subr.bf16.mxu0 %v3977_v43  ;;  %vm3978_vm1 = vmmov 0  }
  0x39   :  { %125 = vadd.xlane.f32.xlu0 %v124_v3  ;;  %131 = vadd.xlane.f32.xlu1 %v130_v4  ;;  %v127_v6 = vsel %vm123_vm0, %v67_v2, 0.0  ;;  %v133_v7 = vsel %vm123_vm0, %v69_v5, 0.0  ;;  %v71_v9 = vld [vmem:[#allocation2 + $0x28] sm:$0xff]  ;;  %v136_v10 = vsel %vm123_vm0, %v70_v8, 0.0  ;;  %v3827_v42 = vld [vmem:[#allocation5] sm:$0xff]   ;;  %v3828_v44 = vld [vmem:[#allocation5 + $0x8] sm:$0xff]  }
  0x3a   :  { %v139_v11 = vsel %vm123_vm0, %v71_v9, 0.0  ;;  %3642 = vmatpush3.bf16.msra.mxu1 %v3827_v42  ;;  %3645 = vmatprep.mubr.msk.bf16.mxu1 %vm3978_vm1, %v3977_v43  ;;  %v3829_v45 = vld [vmem:[%s4879_s2] sm:$0xff]   ;;  %v3830_v46 = vld [vmem:[%s4879_s2 + $0x8] sm:$0xff]   ;;  %v3979_v48 = vmov 1966171168   ;;  %v4120_v56 = vshrl.u32 %v85_v50, 7 }
  0x3b   :  { %3643 = vmatprep.subr.bf16.mxu1 %v3977_v43  ;;  %3637 = vmatprep.mubr.msk.bf16.mxu0 %vm3978_vm1, %v3977_v43  ;;  %v83_v49 = vunpack.c.l.s4 %v3979_v48  ;;  %v3486_v3 = vld.sshfl [vmem:[%s4878_s1 + $0x4] sm:$0x13 pattern:$0x75316420]  ;;  %s3980_s18 = smov 120   ;;  %s3981_s22 = smov 112  }
  0x3c   :  { %3634 = vmatpush3.bf16.msra.mxu0 %v3829_v45  ;;  %s3982_s23 = smov 104   ;;  %vm2349_vm2 = vcmask 64512   ;;  %vm2756_vm3 = vcmask 195584   ;;  %s3986_s24 = smov 96   ;;  %vm2859_vm4 = vcmask 1043456  }
  0x3d   :  { %128 = vadd.xlane.f32.xlu0 %v127_v6  ;;  %134 = vadd.xlane.f32.xlu1 %v133_v7  ;;  %v84_v55 = vunpack.c.0.s8 %v83_v49 }
  0x3e   :  { %3644 = vmatpush3.bf16.msra.mxu1 %v3828_v44  ;;  %3635 = vmatprep.subr.bf16.mxu0 %v3977_v43 }
  0x3f   :  { %3665 = vmatprep.subr.bf16.mxu1 %v3977_v43  ;;  %v87_v63 = vsub.s32 %v84_v55, %v4120_v56 }
  0x40   :  { %3636 = vmatpush3.bf16.msra.mxu0 %v3830_v46 }
  0x41   :  { %137 = vadd.xlane.f32.xlu0 %v136_v10  ;;  %140 = vadd.xlane.f32.xlu1 %v139_v11 }
  0x42   :  { %3657 = vmatprep.subr.bf16.mxu0 %v3977_v43 }
  0xc6   :  { %v126_v12 = vpop.xlane.xlu0 %125  ;;  %v132_v13 = vpop.xlane.xlu1 %131 }
  0xc7   :  { %v143_v14 = vmul.f32 0.03125, %v126_v12  ;;  %v145_v15 = vmul.f32 0.03125, %v132_v13 }
  0xc9   :  { %v4074_v16 = vsub.f32 %v66_v0, %v143_v14  ;;  %v4076_v17 = vsub.f32 %v68_v1, %v145_v15  ;;  %v3484_v1 = vld.sshfl [vmem:[%s4878_s1] sm:$0x13 pattern:$0x75316420] }
  0xca   :  { %v129_v18 = vpop.xlane.xlu0 %128  ;;  %v135_v19 = vpop.xlane.xlu1 %134  ;;  %v88_v7 = vrot.slane %v3484_v1, %v87_v63 }
  0xcb   :  { %v144_v20 = vmul.f32 0.03125, %v129_v18  ;;  %v146_v21 = vmul.f32 0.03125, %v135_v19  ;;  %v155_v22 = vmul.f32 %v4074_v16, %v4074_v16  ;;  %v157_v23 = vmul.f32 %v4076_v17, %v4076_v17 }
  0xcc   :  { %v114_v18 = vrot.slane %v3486_v3, %v87_v63 }
  0xcd   :  { %v4082_v24 = vsub.f32 %v67_v2, %v144_v20  ;;  %v4084_v25 = vsub.f32 %v69_v5, %v146_v21  ;;  %v161_v26 = vsel %vm123_vm0, %v155_v22, 0.0  ;;  %v167_v29 = vsel %vm123_vm0, %v157_v23, 0.0 }
  0xce   :  { %162 = vadd.xlane.f32.xlu0 %v161_v26  ;;  %v138_v27 = vpop.xlane.xlu0 %137  ;;  %v141_v28 = vpop.xlane.xlu1 %140  ;;  %v81_v2 = vcombine.high %v3484_v1, %v3484_v1  ;;  %v96_v23 = vcombine.high %v88_v7, %v88_v7 }
  0xcf   :  { %v147_v30 = vmul.f32 0.03125, %v138_v27  ;;  %v148_v31 = vmul.f32 0.03125, %v141_v28  ;;  %v156_v32 = vmul.f32 %v4082_v24, %v4082_v24  ;;  %v158_v33 = vmul.f32 %v4084_v25, %v4084_v25 }
  0xd0   :  { %v95_v11 = vrot.slane %v81_v2, %v87_v63 }
  0xd1   :  { %v4092_v34 = vsub.f32 %v70_v8, %v147_v30  ;;  %v4094_v35 = vsub.f32 %v71_v9, %v148_v31  ;;  %v164_v36 = vsel %vm123_vm0, %v156_v32, 0.0  ;;  %v170_v37 = vsel %vm123_vm0, %v158_v33, 0.0 }
  0xd2   :  { %168 = vadd.xlane.f32.xlu0 %v167_v29  ;;  %165 = vadd.xlane.f32.xlu1 %v164_v36  ;;  %v107_v8 = vcombine.high %v3486_v3, %v3486_v3  ;;  %v205_v9 = vsub.s32 0, %v4120_v56  ;;  %v122_v33 = vcombine.high %v114_v18, %v114_v18 }
  0xd3   :  { %v159_v38 = vmul.f32 %v4092_v34, %v4092_v34  ;;  %v160_v39 = vmul.f32 %v4094_v35, %v4094_v35 }
  0xd4   :  { %v121_v19 = vrot.slane %v107_v8, %v87_v63  ;;  %v206_v20 = vrot.slane %v88_v7, %v205_v9  ;;  %v210_v21 = vrot.slane %v95_v11, %v205_v9  ;;  %v227_v28 = vrot.slane %v114_v18, %v205_v9 }
  0xd5   :  { %v173_v40 = vsel %vm123_vm0, %v159_v38, 0.0  ;;  %v176_v41 = vsel %vm123_vm0, %v160_v39, 0.0  ;;  %v214_v36 = vrot.slane %v96_v23, %v205_v9  ;;  %v235_v45 = vrot.slane %v122_v33, %v205_v9 }
  0xd6   :  { %171 = vadd.xlane.f32.xlu1 %v170_v37  ;;  %174 = vadd.xlane.f32.xlu0 %v173_v40  ;;  %v231_v29 = vrot.slane %v121_v19, %v205_v9  ;;  %v3983_v23 = vmov 1983009808   ;;  %v3985_v33 = vmov 0  }
  0xda   :  { %177 = vadd.xlane.f32.xlu1 %v176_v41 }
 0x15b   :  { %v163_v47 = vpop.xlane.xlu0 %162 }
 0x15c   :  { %v179_v51 = vmul.f32 0.03125, %v163_v47 }
 0x15e   :  { %v185_v52 = vadd.f32 1e-05, %v179_v51 }
 0x15f   :  { %v166_v53 = vpop.xlane.xlu1 %165  ;;  %v169_v54 = vpop.xlane.xlu0 %168 }
 0x160   :  { %3831 = vrsqrt.f32 %v185_v52  ;;  %v180_v57 = vmul.f32 0.03125, %v166_v53  ;;  %v181_v58 = vmul.f32 0.03125, %v169_v54  ;;  %v3491_v53 = vld [vmem:[%s4882_s5 + $0x1] ss:$0 sm:$0xff] }
 0x162   :  { %v186_v59 = vadd.f32 1e-05, %v180_v57  ;;  %v187_v60 = vadd.f32 1e-05, %v181_v58 }
 0x163   :  { %v172_v61 = vpop.xlane.xlu1 %171  ;;  %v175_v62 = vpop.xlane.xlu0 %174 }
 0x164   :  { %3833 = vrsqrt.f32 %v186_v59  ;;  %v182_v0 = vmul.f32 0.03125, %v172_v61  ;;  %v183_v5 = vmul.f32 0.03125, %v175_v62  ;;  %v3487_v62 = vld [vmem:[%s4882_s5] ss:$0 sm:$0xff] }
 0x165   :  { %3835 = vrsqrt.f32 %v187_v60 }
 0x166   :  { %v188_v4 = vadd.f32 1e-05, %v182_v0  ;;  %v189_v13 = vadd.f32 1e-05, %v183_v5 }
 0x167   :  { %v178_v6 = vpop.xlane.xlu1 %177 }
 0x168   :  { %3837 = vrsqrt.f32 %v188_v4  ;;  %v184_v10 = vmul.f32 0.03125, %v178_v6 }
 0x16a   :  { %v3832_v12 = vpop.eup %3831  ;;  %v190_v14 = vadd.f32 1e-05, %v184_v10 }
 0x16b   :  { %v197_v15 = vmul.f32 %v3832_v12, %v4074_v16 }
 0x16c   :  { %3839 = vrsqrt.f32 %v190_v14 }
 0x16d   :  { %3841 = vrsqrt.f32 %v189_v13  ;;  %v218_v27 = vmul.f32 %v206_v20, %v197_v15 }
 0x16e   :  { %v3834_v22 = vpop.eup %3833 }
 0x16f   :  { %v198_v26 = vmul.f32 %v3834_v22, %v4082_v24  ;;  %v3836_v30 = vpop.eup %3835  ;;  %v239_v38 = vadd.f32 %v227_v28, %v218_v27  ;;  %v3984_v27 = vmov 1934713408  }
 0x170   :  { %v199_v16 = vmul.f32 %v3836_v30, %v4076_v17 }
 0x171   :  { %v219_v31 = vmul.f32 %v210_v21, %v198_v26  ;;  %v436_v26 = vunpack.c.l.s4 %v3983_v23 }
 0x172   :  { %v3838_v32 = vpop.eup %3837  ;;  %v220_v24 = vmul.f32 %v214_v36, %v199_v16 }
 0x173   :  { %v200_v37 = vmul.f32 %v3838_v32, %v4084_v25  ;;  %v240_v39 = vadd.f32 %v231_v29, %v219_v31  ;;  %v437_v30 = vunpack.c.0.s8 %v436_v26 }
 0x174   :  { %v4139_v25 = vadd.f32 %v235_v45, %v220_v24 }
 0x175   :  { %v312_v40 = vpack.c.bf16 %v240_v39, %v239_v38  ;;  %v221_v41 = vmul.f32 %v206_v20, %v200_v37 }
 0x176   :  { %v3840_v42 = vpop.eup %3839 }
 0x177   :  { %v202_v44 = vmul.f32 %v3840_v42, %v4094_v35  ;;  %3646 = vmatmul.mubr.msk.bf16.vlgmr.msra.gmra.mrb[0].mxu1 %vm123_vm0, %v312_v40  ;;  %v3842_v46 = vpop.eup %3841  ;;  %v242_v48 = vadd.f32 %v227_v28, %v221_v41  ;;  %v467_v28 = vunpack.c.l.s4 %v3984_v27  ;;  %v4202_v41 = vsub.s32 %v437_v30, %v4120_v56 }
 0x178   :  { %3649 = vmatprep.mubr.msk.bf16.mxu1 %vm3978_vm1, %v3977_v43  ;;  %v201_v17 = vmul.f32 %v3842_v46, %v4092_v34 }
 0x179   :  { %v223_v47 = vmul.f32 %v214_v36, %v202_v44  ;;  %v313_v35 = vpack.c.bf16 %v242_v48, %v4139_v25  ;;  %v4193_v36 = vpack.i.b16 %v3985_v33, %v3985_v33  ;;  %v468_v16 = vunpack.c.0.s8 %v467_v28 }
 0x17a   :  { %v222_v51 = vmul.f32 %v210_v21, %v201_v17 }
 0x17b   :  { %v4141_v49 = vadd.f32 %v235_v45, %v223_v47  ;;  %v4210_v47 = vsub.s32 %v468_v16, %v4120_v56 }
 0x17c   :  { %v243_v34 = vadd.f32 %v231_v29, %v222_v51 }
 0x17d   :  { %v247_v50 = vpack.c.bf16 %v4141_v49, %v4139_v25 }
 0x17e   :  { %v314_v52 = vpack.c.bf16 %v4141_v49, %v243_v34 }
 0x17f   :  { %3638 = vmatmul.mubr.msk.bf16.vlgmr.msra.gmra.mrb[0].mxu0 %vm123_vm0, %v247_v50  ;;  %3650 = vmatmul.mubr.msk.bf16.gmra.mrb[4].mxu1 %vm123_vm0, %v313_v35 }
 0x180   :  { %3653 = vmatprep.mubr.msk.bf16.mxu1 %vm3978_vm1, %v3977_v43  ;;  %3661 = vmatprep.mubr.msk.bf16.mxu0 %vm3978_vm1, %v3977_v43 }
 0x187   :  { %3654 = vmatmul.mubr.msk.bf16.gmra.mrb[8].mxu1 %vm123_vm0, %v314_v52 }
 0x188   :  { %3669 = vmatprep.mubr.msk.bf16.mxu1 %vm3978_vm1, %v3977_v43 }
 0x24a   :  { %v378_v54 = vpop.f32.mrb[0].mxu1 }
 0x24b   :  { %v3647_v55 = vpop.f32.mrb[1].mxu1  ;;  %v379_v58 = vadd.f32 %v3491_v53, %v378_v54 }
 0x24c   :  { %v381_v57 = vpop.f32.mrb[2].mxu1 }
 0x24d   :  { %v382_v59 = vadd.f32 %v3491_v53, %v381_v57  ;;  %v3648_v60 = vpop.f32.mrb[3].mxu1 }
 0x24f   :  { %v4159_v61 = vpack.c.bf16 %v382_v59, %v379_v58 }
 0x251   :  { %697 = vrot.lane.b32.xlu0 %v4159_v61, %s3980_s18  ;;  %v719_v35 = vshrl.u32 %v4159_v61, 16 }
 0x252   :  { %v305_v63 = vpop.f32.mrb[0].mxu0  ;;  %v386_v0 = vpop.f32.mrb[4].mxu1 }
 0x253   :  { %v3639_v1 = vpop.f32.mrb[1].mxu0  ;;  %v3651_v2 = vpop.f32.mrb[5].mxu1  ;;  %v306_v5 = vadd.f32 %v3487_v62, %v305_v63  ;;  %v387_v6 = vadd.f32 %v3491_v53, %v386_v0 }
 0x254   :  { %v308_v3 = vpop.f32.mrb[2].mxu0  ;;  %v389_v4 = vpop.f32.mrb[6].mxu1 }
 0x255   :  { %v309_v7 = vadd.f32 %v3487_v62, %v308_v3  ;;  %v390_v8 = vadd.f32 %v3491_v53, %v389_v4  ;;  %v3640_v9 = vpop.f32.mrb[3].mxu0  ;;  %v3652_v10 = vpop.f32.mrb[7].mxu1 }
 0x257   :  { %v4166_v11 = vpack.c.bf16 %v309_v7, %v306_v5  ;;  %v4168_v12 = vpack.c.bf16 %v390_v8, %v387_v6 }
 0x259   :  { %705 = vrot.lane.b32.xlu1 %v4168_v12, %s3981_s22  ;;  %699 = vrot.lane.b32.xlu0 %v4168_v12, %s3980_s18  ;;  %v735_v38 = vshrl.u32 %v4168_v12, 16  ;;  %v416_v33 = vshrl.u32 %v4166_v11, 16 }
 0x25a   :  { %v394_v13 = vpop.f32.mrb[8].mxu1 }
 0x25b   :  { %v3655_v14 = vpop.f32.mrb[9].mxu1  ;;  %v395_v18 = vadd.f32 %v3491_v53, %v394_v13 }
 0x25c   :  { %v397_v15 = vpop.f32.mrb[10].mxu1 }
 0x25d   :  { %v398_v19 = vadd.f32 %v3491_v53, %v397_v15  ;;  %711 = vrot.lane.b32.xlu0 %v4168_v12, %s3982_s23  ;;  %v3656_v20 = vpop.f32.mrb[11].mxu1 }
 0x25f   :  { %v4174_v21 = vpack.c.bf16 %v398_v19, %v395_v18 }
 0x261   :  { %709 = vrot.lane.b32.xlu0 %v4159_v61, %s3982_s23  ;;  %701 = vrot.lane.b32.xlu1 %v4174_v21, %s3980_s18 }
 0x265   :  { %408 = vrot.lane.b32.xlu0 %v4166_v11, %s3981_s22  ;;  %707 = vrot.lane.b32.xlu1 %v4174_v21, %s3981_s22 }
 0x269   :  { %713 = vrot.lane.b32.xlu1 %v4174_v21, %s3982_s23 }
 0x26d   :  { %703 = vrot.lane.b32.xlu1 %v4159_v61, %s3981_s22 }
 0x271   :  { %406 = vrot.lane.b32.xlu1 %v4166_v11, %s3980_s18 }
 0x275   :  { %410 = vrot.lane.b32.xlu1 %v4166_v11, %s3982_s23 }
 0x2c3   :  { %v4186_v22 = vpop.permute.xlu0 %697 }
 0x2c4   :  { %v720_v24 = vshrl.u32 %v4186_v22, 16  ;;  %v717_v51 = vpack.i.b16 %v4186_v22, %v4159_v61 }
 0x2c6   :  { %v721_v58 = vpack.i.b16 %v720_v24, %v719_v35  ;;  %v763_v7 = vcombine.high %v717_v51, %v4193_v36  ;;  %v4244_v28 = vrot.slane %v717_v51, %v4202_v41 }
 0x2c8   :  { %v829_v13 = vcombine.high %v721_v58, %v4193_v36  ;;  %v4251_v16 = vrot.slane %v763_v7, %v4202_v41 }
 0x2cb   :  { %v4188_v29 = vpop.permute.xlu0 %699  ;;  %v4195_v37 = vpop.permute.xlu1 %705 }
 0x2cc   :  { %v733_v31 = vpack.i.b16 %v4188_v29, %v4168_v12  ;;  %v736_v32 = vshrl.u32 %v4188_v29, 16  ;;  %v743_v45 = vshrl.u32 %v4195_v37, 16 }
 0x2ce   :  { %v895_v39 = vcombine.high %v733_v31, %v4193_v36  ;;  %v737_v42 = vpack.i.b16 %v736_v32, %v735_v38  ;;  %v902_v48 = vrot.slane %v733_v31, %v4202_v41  ;;  %v751_v31 = vshrl.u32 %v4174_v21, 16 }
 0x2cf   :  { %v4199_v40 = vpop.permute.xlu0 %711  ;;  %v4254_v38 = vrot.slane %v721_v58, %v4202_v41 }
 0x2d0   :  { %v741_v44 = vpack.i.b16 %v4199_v40, %v4195_v37  ;;  %v744_v46 = vshrl.u32 %v4199_v40, 16  ;;  %v909_v34 = vrot.slane %v895_v39, %v4202_v41  ;;  %v961_v54 = vcombine.high %v737_v42, %v4193_v36 }
 0x2d1   :  { %v968_v59 = vrot.slane %v737_v42, %v4202_v41 }
 0x2d2   :  { %v910_v17 = vcombine.high %v741_v44, %v4193_v36  ;;  %v917_v50 = vrot.slane %v741_v44, %v4202_v41  ;;  %v745_v52 = vpack.i.b16 %v744_v46, %v743_v45  ;;  %v975_v8 = vrot.slane %v961_v54, %v4202_v41 }
 0x2d3   :  { %v4219_v53 = vpop.permute.xlu1 %701  ;;  %v4241_v27 = vpop.permute.xlu0 %709  ;;  %v4257_v44 = vrot.slane %v829_v13, %v4202_v41 }
 0x2d4   :  { %v924_v56 = vrot.slane %v910_v17, %v4202_v41  ;;  %v925_v55 = vcombine.low %v902_v48, %v917_v50  ;;  %v926_v57 = vcombine.high %v902_v48, %v917_v50  ;;  %v976_v60 = vcombine.high %v745_v52, %v4193_v36 }
 0x2d5   :  { %v983_v62 = vrot.slane %v745_v52, %v4202_v41  ;;  %v749_v15 = vpack.i.b16 %v4219_v53, %v4174_v21  ;;  %v752_v18 = vshrl.u32 %v4219_v53, 16  ;;  %v728_v46 = vshrl.u32 %v4241_v27, 16 }
 0x2d6   :  { %v933_v63 = vrot.slane %v925_v55, %v4210_v47  ;;  %v940_v0 = vrot.slane %v926_v57, %v4210_v47  ;;  %v941_v1 = vcombine.low %v909_v34, %v924_v56  ;;  %v942_v2 = vcombine.high %v909_v34, %v924_v56 }
 0x2d7   :  { %v990_v3 = vrot.slane %v976_v60, %v4202_v41  ;;  %v991_v4 = vcombine.low %v968_v59, %v983_v62  ;;  %v992_v5 = vcombine.high %v968_v59, %v983_v62  ;;  %v4229_v6 = vpop.permute.xlu1 %707  ;;  %v753_v45 = vpack.i.b16 %v752_v18, %v751_v31 }
 0x2d8   :  { %v949_v9 = vrot.slane %v941_v1, %v4210_v47  ;;  %v956_v10 = vrot.slane %v942_v2, %v4210_v47  ;;  %v1259_v14 = vcombine.low %v933_v63, %v940_v0  ;;  %v3513_v26 = vcombine.high %v933_v63, %v940_v0 }
 0x2d9   :  { %v999_v19 = vrot.slane %v991_v4, %v4210_v47  ;;  %v1006_v20 = vrot.slane %v992_v5, %v4210_v47  ;;  %v1007_v23 = vcombine.low %v975_v8, %v990_v3  ;;  %v1008_v30 = vcombine.high %v975_v8, %v990_v3 }
 0x2da   :  { %v1275_v39 = vcombine.low %v949_v9, %v956_v10  ;;  %v3514_v42 = vcombine.high %v949_v9, %v956_v10  ;;  %v1266_v24 = vrot.slane %v1259_v14, %v4202_v41  ;;  %v1274_v17 = vrot.slane %v3513_v26, %v4202_v41 }
 0x2db   :  { %v4247_v32 = vpop.permute.xlu1 %713  ;;  %v4262_v48 = vrot.slane %v1007_v23, %v4210_v47  ;;  %v1309_v50 = vcombine.low %v999_v19, %v1006_v20  ;;  %v1027_v35 = vcombine.high %v749_v15, %v4193_v36  ;;  %v4267_v51 = vrot.slane %v1008_v30, %v4210_v47  ;;  %v4299_v30 = vpop.permute.xlu0 %408 }
 0x2dc   :  { %v759_v34 = vshrl.u32 %v4229_v6, 16  ;;  %v757_v52 = vpack.i.b16 %v4247_v32, %v4229_v6  ;;  %v760_v54 = vshrl.u32 %v4247_v32, 16  ;;  %v1282_v55 = vrot.slane %v1275_v39, %v4202_v41 }
 0x2dd   :  { %v1290_v57 = vrot.slane %v3514_v42, %v4202_v41  ;;  %v3515_v58 = vcombine.high %v999_v19, %v1006_v20  ;;  %v1034_v60 = vrot.slane %v749_v15, %v4202_v41  ;;  %v4283_v1 = vrot.slane %v1309_v50, %v4202_v41 }
 0x2de   :  { %v761_v62 = vpack.i.b16 %v760_v54, %v759_v34  ;;  %v1042_v63 = vcombine.high %v757_v52, %v4193_v36  ;;  %v1049_v0 = vrot.slane %v757_v52, %v4202_v41  ;;  %v1041_v2 = vrot.slane %v1027_v35, %v4202_v41 }
 0x2df   :  { %v4273_v56 = vpop.permute.xlu1 %703  ;;  %v1093_v3 = vcombine.high %v753_v45, %v4193_v36  ;;  %v1100_v10 = vrot.slane %v753_v45, %v4202_v41  ;;  %v4297_v26 = vrot.slane %v3515_v58, %v4202_v41  ;;  %v1291_v42 = vcombine.low %v1266_v24, %v1274_v17 }
 0x2e0   :  { %v725_v59 = vpack.i.b16 %v4241_v27, %v4273_v56  ;;  %v1056_v5 = vrot.slane %v1042_v63, %v4202_v41  ;;  %v1057_v7 = vcombine.low %v1034_v60, %v1049_v0  ;;  %v1058_v8 = vcombine.high %v1034_v60, %v1049_v0 }
 0x2e1   :  { %v1108_v13 = vcombine.high %v761_v62, %v4193_v36  ;;  %v1115_v14 = vrot.slane %v761_v62, %v4202_v41  ;;  %v727_v15 = vshrl.u32 %v4273_v56, 16  ;;  %v1325_v45 = vcombine.low %v4262_v48, %v4267_v51 }
 0x2e2   :  { %v778_v4 = vcombine.high %v725_v59, %v4193_v36  ;;  %v785_v9 = vrot.slane %v725_v59, %v4202_v41  ;;  %v1065_v18 = vrot.slane %v1057_v7, %v4210_v47  ;;  %v1072_v19 = vrot.slane %v1058_v8, %v4210_v47 }
 0x2e3   :  { %v1073_v20 = vcombine.low %v1041_v2, %v1056_v5  ;;  %v1074_v23 = vcombine.high %v1041_v2, %v1056_v5  ;;  %v1123_v31 = vcombine.low %v1100_v10, %v1115_v14  ;;  %v1124_v39 = vcombine.high %v1100_v10, %v1115_v14  ;;  %v407_v34 = vpop.permute.xlu1 %406 }
 0x2e4   :  { %v792_v50 = vrot.slane %v778_v4, %v4202_v41  ;;  %v793_v35 = vcombine.low %v4244_v28, %v785_v9  ;;  %v1299_v52 = vcombine.low %v1282_v55, %v1290_v57  ;;  %v1122_v58 = vrot.slane %v1108_v13, %v4202_v41 }
 0x2e5   :  { %v1081_v54 = vrot.slane %v1073_v20, %v4210_v47  ;;  %v1088_v59 = vrot.slane %v1074_v23, %v4210_v47  ;;  %v1359_v60 = vcombine.low %v1065_v18, %v1072_v19  ;;  %v3516_v62 = vcombine.high %v4262_v48, %v4267_v51 }
 0x2e6   :  { %v1107_v24 = vrot.slane %v1093_v3, %v4202_v41  ;;  %v424_v17 = vshrl.u32 %v4299_v30, 16  ;;  %v729_v63 = vpack.i.b16 %v728_v46, %v727_v15  ;;  %v4313_v0 = vrot.slane %v1123_v31, %v4210_v47 }
 0x2e7   :  { %v4316_v55 = vrot.slane %v1124_v39, %v4210_v47  ;;  %v794_v57 = vcombine.high %v4244_v28, %v785_v9  ;;  %v4320_v2 = vrot.slane %v1291_v42, %v4210_v47  ;;  %v3517_v4 = vcombine.high %v1065_v18, %v1072_v19  ;;  %v411_v18 = vpop.permute.xlu1 %410 }
 0x2e8   :  { %v801_v5 = vrot.slane %v793_v35, %v4210_v47  ;;  %v809_v7 = vcombine.low %v4251_v16, %v792_v50  ;;  %v4325_v3 = vrot.slane %v1299_v52, %v4210_v47  ;;  %v1139_v46 = vcombine.low %v1107_v24, %v1122_v58 }
 0x2e9   :  { %v1140_v8 = vcombine.high %v1107_v24, %v1122_v58  ;;  %v4328_v10 = vrot.slane %v1359_v60, %v4202_v41  ;;  %v1375_v13 = vcombine.low %v1081_v54, %v1088_v59  ;;  %v3518_v14 = vcombine.high %v1081_v54, %v1088_v59 }
 0x2ea   :  { %v810_v28 = vcombine.high %v4251_v16, %v792_v50  ;;  %v844_v9 = vcombine.high %v729_v63, %v4193_v36  ;;  %v851_v15 = vrot.slane %v729_v63, %v4202_v41  ;;  %v1409_v19 = vcombine.low %v4313_v0, %v4316_v55 }
 0x2eb   :  { %v808_v20 = vrot.slane %v794_v57, %v4210_v47  ;;  %v414_v23 = vpack.i.b16 %v407_v34, %v4166_v11  ;;  %v417_v31 = vshrl.u32 %v407_v34, 16  ;;  %v817_v39 = vrot.slane %v809_v7, %v4210_v47 }
 0x2ec   :  { %v824_v42 = vrot.slane %v810_v28, %v4210_v47  ;;  %v859_v35 = vcombine.low %v4254_v38, %v851_v15  ;;  %v860_v16 = vcombine.high %v4254_v38, %v851_v15  ;;  %v4342_v50 = vrot.slane %v1139_v46, %v4210_v47 }
 0x2ed   :  { %v4345_v52 = vrot.slane %v1140_v8, %v4210_v47  ;;  %v4348_v54 = vrot.slane %v3517_v4, %v4202_v41  ;;  %v422_v59 = vpack.i.b16 %v411_v18, %v4299_v30  ;;  %v4352_v34 = vrot.slane %v1375_v13, %v4202_v41 }
 0x2ee   :  { %v3519_v58 = vcombine.high %v4313_v0, %v4316_v55  ;;  %v858_v60 = vrot.slane %v844_v9, %v4202_v41  ;;  %v434_v38 = vcombine.high %v414_v23, %v4193_v36  ;;  %v4359_v24 = vrot.slane %v3518_v14, %v4202_v41 }
 0x2ef   :  { %v867_v63 = vrot.slane %v859_v35, %v4210_v47  ;;  %v874_v57 = vrot.slane %v860_v16, %v4210_v47  ;;  %v418_v30 = vpack.i.b16 %v417_v31, %v416_v33  ;;  %v4366_v4 = vrot.slane %v1409_v19, %v4202_v41 }
 0x2f0   :  { %v1159_v7 = vcombine.low %v801_v5, %v808_v20  ;;  %v1175_v46 = vcombine.low %v817_v39, %v824_v42  ;;  %v3510_v0 = vcombine.high %v817_v39, %v824_v42  ;;  %v3509_v55 = vcombine.high %v801_v5, %v808_v20 }
 0x2f1   :  { %v441_v8 = vrot.slane %v414_v23, %v4202_v41  ;;  %v425_v13 = vshrl.u32 %v411_v18, 16  ;;  %v449_v14 = vcombine.high %v422_v59, %v4193_v36  ;;  %v875_v28 = vcombine.low %v4257_v44, %v858_v60 }
 0x2f2   :  { %v876_v9 = vcombine.high %v4257_v44, %v858_v60  ;;  %v448_v15 = vrot.slane %v434_v38, %v4202_v41  ;;  %v456_v11 = vrot.slane %v422_v59, %v4202_v41  ;;  %v1209_v33 = vcombine.low %v867_v63, %v874_v57 }
 0x2f3   :  { %v500_v19 = vcombine.high %v418_v30, %v4193_v36  ;;  %v426_v31 = vpack.i.b16 %v425_v13, %v424_v17  ;;  %v463_v39 = vrot.slane %v449_v14, %v4202_v41  ;;  %v3511_v5 = vcombine.high %v867_v63, %v874_v57 }
 0x2f4   :  { %v507_v20 = vrot.slane %v418_v30, %v4202_v41  ;;  %v1182_v18 = vrot.slane %v1175_v46, %v4202_v41  ;;  %v1190_v23 = vrot.slane %v3510_v0, %v4202_v41  ;;  %v464_v59 = vcombine.low %v441_v8, %v456_v11 }
 0x2f5   :  { %v480_v42 = vcombine.low %v448_v15, %v463_v39  ;;  %v481_v35 = vcombine.high %v448_v15, %v463_v39  ;;  %v515_v44 = vcombine.high %v426_v31, %v4193_v36  ;;  %v522_v16 = vrot.slane %v426_v31, %v4202_v41 }
 0x2f6   :  { %v465_v60 = vcombine.high %v441_v8, %v456_v11  ;;  %v1166_v38 = vrot.slane %v1159_v7, %v4202_v41  ;;  %v1174_v17 = vrot.slane %v3509_v55, %v4202_v41  ;;  %v514_v63 = vrot.slane %v500_v19, %v4202_v41 }
 0x2f7   :  { %v488_v57 = vrot.slane %v480_v42, %v4210_v47  ;;  %v495_v30 = vrot.slane %v481_v35, %v4210_v47  ;;  %v529_v46 = vrot.slane %v515_v44, %v4202_v41  ;;  %v4388_v0 = vrot.slane %v3519_v58, %v4202_v41 }
 0x2f8   :  { %v530_v13 = vcombine.low %v507_v20, %v522_v16  ;;  %v531_v14 = vcombine.high %v507_v20, %v522_v16  ;;  %v1199_v15 = vcombine.low %v1182_v18, %v1190_v23  ;;  %v883_v8 = vrot.slane %v875_v28, %v4210_v47 }
 0x2f9   :  { %v890_v7 = vrot.slane %v876_v9, %v4210_v47  ;;  %v546_v11 = vcombine.low %v514_v63, %v529_v46  ;;  %v547_v55 = vcombine.high %v514_v63, %v529_v46  ;;  %v472_v19 = vrot.slane %v464_v59, %v4210_v47 }
 0x2fa   :  { %v479_v31 = vrot.slane %v465_v60, %v4210_v47  ;;  %v1191_v39 = vcombine.low %v1166_v38, %v1174_v17  ;;  %v1216_v42 = vrot.slane %v1209_v33, %v4202_v41  ;;  %v582_v44 = vcombine.low %v488_v57, %v495_v30 }
 0x2fb   :  { %v554_v35 = vrot.slane %v546_v11, %v4210_v47  ;;  %v561_v58 = vrot.slane %v547_v55, %v4210_v47  ;;  %v1224_v20 = vrot.slane %v3511_v5, %v4202_v41  ;;  %v538_v28 = vrot.slane %v530_v13, %v4210_v47 }
 0x2fc   :  { %v545_v9 = vrot.slane %v531_v14, %v4210_v47  ;;  %v3498_v18 = vcombine.high %v488_v57, %v495_v30  ;;  %v4401_v23 = vrot.slane %v1199_v15, %v4210_v47  ;;  %v1425_v16 = vcombine.low %v4342_v50, %v4345_v52 }
 0x2fd   :  { %v3520_v33 = vcombine.high %v4342_v50, %v4345_v52  ;;  %v1225_v59 = vcombine.low %v883_v8, %v890_v7  ;;  %v3512_v60 = vcombine.high %v883_v8, %v890_v7  ;;  %v566_v38 = vcombine.low %v472_v19, %v479_v31 }
 0x2fe   :  { %v632_v17 = vcombine.low %v554_v35, %v561_v58  ;;  %v3500_v63 = vcombine.high %v554_v35, %v561_v58  ;;  %v4408_v5 = vrot.slane %v1191_v39, %v4210_v47  ;;  %v3497_v46 = vcombine.high %v472_v19, %v479_v31 }
 0x2ff   :  { %v589_v57 = vrot.slane %v582_v44, %v4202_v41  ;;  %v1232_v30 = vrot.slane %v1225_v59, %v4202_v41  ;;  %v1240_v13 = vrot.slane %v3512_v60, %v4202_v41  ;;  %v597_v14 = vrot.slane %v3498_v18, %v4202_v41 }
 0x300   :  { %v616_v15 = vcombine.low %v538_v28, %v545_v9  ;;  %v4416_v50 = vcombine.low %v4408_v5, %v4401_v23  ;;  %v1241_v52 = vcombine.low %v1216_v42, %v1224_v20  ;;  %v3499_v8 = vcombine.high %v538_v28, %v545_v9 }
 0x301   :  { %v1249_v7 = vcombine.low %v1232_v30, %v1240_v13  ;;  %v1332_v11 = vrot.slane %v1325_v45, %v4202_v41  ;;  %v1340_v55 = vrot.slane %v3516_v62, %v4202_v41  ;;  %v639_v19 = vrot.slane %v632_v17, %v4202_v41 }
 0x302   :  { %v647_v31 = vrot.slane %v3500_v63, %v4202_v41  ;;  %v4429_v39 = vrot.slane %v1241_v52, %v4210_v47  ;;  %v1341_v42 = vcombine.low %v4283_v1, %v4297_v26  ;;  %v1399_v45 = vcombine.low %v4352_v34, %v4359_v24 }
 0x303   :  { %v4434_v35 = vrot.slane %v1249_v7, %v4210_v47  ;;  %v1349_v58 = vcombine.low %v1332_v11, %v1340_v55  ;;  %v1432_v48 = vrot.slane %v1425_v16, %v4202_v41  ;;  %v623_v51 = vrot.slane %v616_v15, %v4202_v41 }
 0x304   :  { %v1391_v62 = vcombine.low %v4328_v10, %v4348_v54  ;;  %v1440_v44 = vrot.slane %v3520_v33, %v4202_v41  ;;  %v1441_v20 = vcombine.low %v4366_v4, %v4388_v0  ;;  %v631_v1 = vrot.slane %v3499_v8, %v4202_v41 }
 0x305   :  { %v1257_v26 = vcombine.low %v4429_v39, %v4434_v35  ;;  %v4449_v28 = vrot.slane %v1341_v42, %v4210_v47  ;;  %v4452_v34 = vrot.slane %v1349_v58, %v4210_v47  ;;  %v573_v24 = vrot.slane %v566_v38, %v4202_v41 }
 0x306   :  { %v581_v10 = vrot.slane %v3497_v46, %v4202_v41  ;;  %v4457_v54 = vrot.slane %v1399_v45, %v4210_v47  ;;  %v1449_v9 = vcombine.low %v1432_v48, %v1440_v44  ;;  %v656_v4 = vcombine.low %v639_v19, %v647_v31 }
 0x307   :  { %v1461_v0 = vpack.i.b16 %v1257_v26, %v4416_v50  ;;  %v1307_v18 = vcombine.low %v4320_v2, %v4325_v3  ;;  %v1357_v16 = vcombine.low %v4449_v28, %v4452_v34  ;;  %v4465_v33 = vrot.slane %v1391_v62, %v4210_v47 }
 0x308   :  { %v1448_v59 = vrot.slane %v1441_v20, %v4210_v47  ;;  %v1456_v60 = vrot.slane %v1449_v9, %v4210_v47  ;;  %v606_v38 = vcombine.low %v589_v57, %v597_v14  ;;  %v648_v17 = vcombine.low %v623_v51, %v631_v1 }
 0x309   :  { %v2354_v63 = vsel %vm2349_vm2, %v1461_v0, 0  ;;  %v1473_v46 = vpack.i.b16 %v1357_v16, %v1307_v18  ;;  %v1407_v30 = vcombine.low %v4465_v33, %v4457_v54  ;;  %v598_v15 = vcombine.low %v573_v24, %v581_v10 }
 0x30a   :  { %3658 = vmatpush3.bf16.xpose.msra.mxu0 %v2354_v63  ;;  %v1457_v13 = vcombine.low %v1448_v59, %v1456_v60  ;;  %v4474_v52 = vrot.slane %v656_v4, %v4210_v47  ;;  %v4477_v7 = vrot.slane %v606_v38, %v4210_v47  ;;  %v4480_v57 = vrot.slane %v648_v17, %v4210_v47 }
 0x30b   :  { %3659 = vmatprep.subr.bf16.mxu0 %v3977_v43  ;;  %v3533_v14 = vcombine.low %v1473_v46, %v1473_v46  ;;  %v1498_v11 = vunpack.c.h.b16 %v1473_v46  ;;  %v4483_v19 = vrot.slane %v598_v15, %v4210_v47  ;;  %v1463_v48 = vshrl.u32 %v1257_v26, 16 }
 0x30c   :  { %v1485_v8 = vpack.i.b16 %v1457_v13, %v1407_v30  ;;  %v664_v31 = vcombine.low %v4480_v57, %v4474_v52  ;;  %v1487_v62 = vshrl.u32 %v1457_v13, 16  ;;  %v1462_v20 = vshrl.u32 %v4416_v50, 16 }
 0x30d   :  { %v2357_v58 = vsel %vm2349_vm2, %v3533_v14, 0  ;;  %v614_v45 = vcombine.low %v4483_v19, %v4477_v7  ;;  %v1475_v1 = vshrl.u32 %v1357_v16, 16  ;;  %v1486_v24 = vshrl.u32 %v1407_v30, 16 }
 0x30e   :  { %v1499_v55 = vunpack.c.l.b16 %v1485_v8  ;;  %v1464_v10 = vpack.i.b16 %v1463_v48, %v1462_v20  ;;  %v3535_v9 = vcombine.high %v1485_v8, %v1485_v8  ;;  %v1474_v4 = vshrl.u32 %v1307_v18, 16 }
 0x30f   :  { %v668_v44 = vpack.i.b16 %v664_v31, %v614_v45  ;;  %v1488_v0 = vpack.i.b16 %v1487_v62, %v1486_v24  ;;  %v670_v30 = vshrl.u32 %v664_v31, 16  ;;  %v669_v8 = vshrl.u32 %v614_v45, 16 }
 0x310   :  { %v2399_v42 = vpack.c.b16 %v1499_v55, %v1498_v11  ;;  %v1476_v26 = vpack.i.b16 %v1475_v1, %v1474_v4  ;;  %v2456_v17 = vsel %vm2349_vm2, %v1464_v10, 0  ;;  %v2408_v63 = vsel %vm2349_vm2, %v3535_v9, 0 }
 0x311   :  { %v3501_v38 = vcombine.low %v668_v44, %v668_v44  ;;  %v1505_v46 = vunpack.c.l.b16 %v1488_v0  ;;  %v3502_v13 = vcombine.high %v668_v44, %v668_v44  ;;  %v1258_v14 = vcombine.high %v4429_v39, %v4434_v35 }
 0x312   :  { %v2405_v51 = vsel %vm2349_vm2, %v2399_v42, 0  ;;  %3660 = vmatpush3.bf16.xpose.msra.mxu0 %v2357_v58  ;;  %v1504_v50 = vunpack.c.h.b16 %v1476_v26  ;;  %v3537_v18 = vcombine.low %v1476_v26, %v1476_v26  ;;  %v1458_v55 = vcombine.high %v1448_v59, %v1456_v60 }
 0x313   :  { %3666 = vmatpush3.bf16.xpose.msra.mxu1 %v2405_v51  ;;  %3673 = vmatprep.subr.bf16.mxu0 %v3977_v43  ;;  %v671_v42 = vpack.i.b16 %v670_v30, %v669_v8  ;;  %v1208_v31 = vcombine.high %v4408_v5, %v4401_v23  ;;  %v1358_v39 = vcombine.high %v4449_v28, %v4452_v34  ;;  %v1469_v20 = vshrl.u32 %v1258_v14, 16 }
 0x314   :  { %3667 = vmatprep.subr.bf16.mxu1 %v3977_v43  ;;  %v2501_v16 = vpack.c.b16 %v1505_v46, %v1504_v50  ;;  %v2459_v15 = vsel %vm2349_vm2, %v3537_v18, 0  ;;  %v1408_v35 = vcombine.high %v4465_v33, %v4457_v54  ;;  %v3539_v59 = vcombine.high %v1488_v0, %v1488_v0 }
 0x315   :  { %v1467_v58 = vpack.i.b16 %v1258_v14, %v1208_v31  ;;  %v1308_v60 = vcombine.high %v4320_v2, %v4325_v3  ;;  %v3503_v48 = vcombine.low %v671_v42, %v671_v42  ;;  %v665_v34 = vcombine.high %v4480_v57, %v4474_v52 }
 0x316   :  { %v2507_v11 = vsel %vm2349_vm2, %v2501_v16, 0  ;;  %v1491_v45 = vpack.i.b16 %v1458_v55, %v1408_v35  ;;  %v2510_v5 = vsel %vm2349_vm2, %v3539_v59, 0  ;;  %v3504_v54 = vcombine.high %v671_v42, %v671_v42 }
 0x317   :  { %v1479_v51 = vpack.i.b16 %v1358_v39, %v1308_v60  ;;  %v2558_v23 = vsel %vm2349_vm2, %v1467_v58, 0  ;;  %v615_v44 = vcombine.high %v4483_v19, %v4477_v7  ;;  %v1493_v24 = vshrl.u32 %v1458_v55, 16 }
 0x318   :  { %v1511_v62 = vunpack.c.l.b16 %v1491_v45  ;;  %v1468_v9 = vshrl.u32 %v1208_v31, 16  ;;  %v1481_v52 = vshrl.u32 %v1358_v39, 16  ;;  %v1492_v57 = vshrl.u32 %v1408_v35, 16 }
 0x319   :  { %3662 = vmatmul.mubr.msk.bf16.vlgmr.msra.gmra.mrb[4].mxu0 %vm2349_vm2, %v3501_v38  ;;  %v1510_v2 = vunpack.c.h.b16 %v1479_v51  ;;  %v3541_v3 = vcombine.low %v1479_v51, %v1479_v51  ;;  %v674_v10 = vpack.i.b16 %v665_v34, %v615_v44  ;;  %v3543_v19 = vcombine.high %v1491_v45, %v1491_v45 }
 0x31a   :  { %3674 = vmatpush3.bf16.xpose.msra.mxu0 %v2456_v17  ;;  %3677 = vmatprep.mubr.msk.bf16.mxu0 %vm3978_vm1, %v3977_v43  ;;  %v1470_v7 = vpack.i.b16 %v1469_v20, %v1468_v9  ;;  %v1480_v4 = vshrl.u32 %v1308_v60, 16  ;;  %v1494_v0 = vpack.i.b16 %v1493_v24, %v1492_v57  ;;  %v676_v30 = vshrl.u32 %v665_v34, 16 }
 0x31b   :  { %3668 = vmatpush3.bf16.xpose.msra.mxu1 %v2408_v63  ;;  %3675 = vmatprep.subr.bf16.mxu0 %v3977_v43  ;;  %v2603_v28 = vpack.c.b16 %v1511_v62, %v1510_v2  ;;  %v2561_v33 = vsel %vm2349_vm2, %v3541_v3, 0  ;;  %v3505_v38 = vcombine.low %v674_v10, %v674_v10  ;;  %v2612_v63 = vsel %vm2349_vm2, %v3543_v19, 0 }
 0x31c   :  { %3681 = vmatprep.subr.bf16.mxu1 %v3977_v43  ;;  %v1482_v26 = vpack.i.b16 %v1481_v52, %v1480_v4  ;;  %v2660_v17 = vsel %vm2349_vm2, %v1470_v7, 0  ;;  %v1517_v46 = vunpack.c.l.b16 %v1494_v0  ;;  %v675_v8 = vshrl.u32 %v615_v44, 16 }
 0x31d   :  { %v2609_v1 = vsel %vm2349_vm2, %v2603_v28, 0  ;;  %v3547_v55 = vcombine.high %v1494_v0, %v1494_v0 }
 0x31e   :  { %v1516_v50 = vunpack.c.h.b16 %v1482_v26  ;;  %v3545_v18 = vcombine.low %v1482_v26, %v1482_v26 }
 0x31f   :  { %v2714_v31 = vsel %vm2349_vm2, %v3547_v55, 0 }
 0x320   :  { %v2705_v16 = vpack.c.b16 %v1517_v46, %v1516_v50 }
 0x322   :  { %3670 = vmatmul.mubr.msk.bf16.vlgmr.msra.gmra.mrb[12].mxu1 %vm2349_vm2, %v3502_v13  ;;  %3676 = vmatpush3.bf16.xpose.msra.mxu0 %v2459_v15  ;;  %v3506_v13 = vcombine.high %v674_v10, %v674_v10  ;;  %v2663_v15 = vsel %vm2349_vm2, %v3545_v18, 0  ;;  %v2711_v14 = vsel %vm2349_vm2, %v2705_v16, 0 }
 0x323   :  { %3682 = vmatpush3.bf16.xpose.msra.mxu1 %v2507_v11  ;;  %3685 = vmatprep.mubr.msk.bf16.mxu1 %vm3978_vm1, %v3977_v43  ;;  %v677_v11 = vpack.i.b16 %v676_v30, %v675_v8 }
 0x324   :  { %3683 = vmatprep.subr.bf16.mxu1 %v3977_v43  ;;  %3689 = vmatprep.subr.bf16.mxu0 %v3977_v43 }
 0x325   :  { %v3507_v42 = vcombine.low %v677_v11, %v677_v11  ;;  %v3508_v39 = vcombine.high %v677_v11, %v677_v11 }
 0x329   :  { %3678 = vmatmul.mubr.msk.bf16.vlgmr.msra.gmra.mrb[8].mxu0 %vm2349_vm2, %v3503_v48 }
 0x32a   :  { %3690 = vmatpush3.bf16.xpose.msra.mxu0 %v2558_v23  ;;  %3693 = vmatprep.mubr.msk.bf16.mxu0 %vm3978_vm1, %v3977_v43 }
 0x32b   :  { %3684 = vmatpush3.bf16.xpose.msra.mxu1 %v2510_v5  ;;  %3691 = vmatprep.subr.bf16.mxu0 %v3977_v43 }
 0x32c   :  { %3697 = vmatprep.subr.bf16.mxu1 %v3977_v43 }
 0x332   :  { %3686 = vmatmul.mubr.msk.bf16.vlgmr.msra.gmra.mrb[16].mxu1 %vm2349_vm2, %v3504_v54  ;;  %3692 = vmatpush3.bf16.xpose.msra.mxu0 %v2561_v33 }
 0x333   :  { %3698 = vmatpush3.bf16.xpose.msra.mxu1 %v2609_v1  ;;  %3701 = vmatprep.mubr.msk.bf16.mxu1 %vm3978_vm1, %v3977_v43 }
 0x334   :  { %3699 = vmatprep.subr.bf16.mxu1 %v3977_v43  ;;  %3705 = vmatprep.subr.bf16.mxu0 %v3977_v43 }
 0x339   :  { %3694 = vmatmul.mubr.msk.bf16.vlgmr.msra.gmra.mrb[12].mxu0 %vm2349_vm2, %v3505_v38 }
 0x33a   :  { %3706 = vmatpush3.bf16.xpose.msra.mxu0 %v2660_v17  ;;  %3709 = vmatprep.mubr.msk.bf16.mxu0 %vm3978_vm1, %v3977_v43 }
 0x33b   :  { %3700 = vmatpush3.bf16.xpose.msra.mxu1 %v2612_v63  ;;  %3707 = vmatprep.subr.bf16.mxu0 %v3977_v43 }
 0x33c   :  { %3713 = vmatprep.subr.bf16.mxu1 %v3977_v43 }
 0x342   :  { %3702 = vmatmul.mubr.msk.bf16.vlgmr.msra.gmra.mrb[20].mxu1 %vm2349_vm2, %v3506_v13  ;;  %3708 = vmatpush3.bf16.xpose.msra.mxu0 %v2663_v15 }
 0x343   :  { %3714 = vmatpush3.bf16.xpose.msra.mxu1 %v2711_v14  ;;  %3717 = vmatprep.mubr.msk.bf16.mxu1 %vm3978_vm1, %v3977_v43 }
 0x344   :  { %3715 = vmatprep.subr.bf16.mxu1 %v3977_v43  ;;  %3721 = vmatprep.subr.bf16.mxu0 %v3977_v43 }
 0x349   :  { %3710 = vmatmul.mubr.msk.bf16.vlgmr.msra.gmra.mrb[16].mxu0 %vm2349_vm2, %v3507_v42 }
 0x34a   :  { %3725 = vmatprep.mubr.msk.bf16.mxu0 %vm3978_vm1, %v3977_v43 }
 0x34b   :  { %3716 = vmatpush3.bf16.xpose.msra.mxu1 %v2714_v31 }
 0x34c   :  { %3737 = vmatprep.subr.bf16.mxu1 %v3977_v43 }
 0x352   :  { %3718 = vmatmul.mubr.msk.bf16.vlgmr.msra.gmra.mrb[24].mxu1 %vm2349_vm2, %v3508_v39 }
 0x353   :  { %3741 = vmatprep.mubr.msk.bf16.mxu1 %vm3978_vm1, %v3977_v43 }
 0x3ec   :  { %v2393_v35 = vpop.f32.mrb[4].mxu0 }
 0x3ed   :  { %v3663_v58 = vpop.f32.mrb[5].mxu0  ;;  %v2757_v59 = vsel %vm2756_vm3, %v2393_v35, -inf }
 0x3ee   :  { %2758 = vmax.xlane.f32.xlu0 %v2757_v59  ;;  %v2396_v60 = vpop.f32.mrb[6].mxu0 }
 0x3ef   :  { %v3664_v45 = vpop.f32.mrb[7].mxu0 }
 0x3f5   :  { %v4559_v48 = vpop.f32.mrb[12].mxu1 }
 0x3f6   :  { %v3671_v51 = vpop.f32.mrb[13].mxu1  ;;  %v2760_v23 = vsel %vm2756_vm3, %v4559_v48, -inf }
 0x3f7   :  { %2761 = vmax.xlane.f32.xlu1 %v2760_v23  ;;  %v2447_v5 = vpop.f32.mrb[14].mxu1 }
 0x3f8   :  { %v3672_v62 = vpop.f32.mrb[15].mxu1 }
 0x3fc   :  { %v2495_v2 = vpop.f32.mrb[8].mxu0 }
 0x3fd   :  { %v3679_v3 = vpop.f32.mrb[9].mxu0  ;;  %v2763_v28 = vsel %vm2756_vm3, %v2495_v2, -inf }
 0x3fe   :  { %2764 = vmax.xlane.f32.xlu0 %v2763_v28  ;;  %v2498_v34 = vpop.f32.mrb[10].mxu0 }
 0x3ff   :  { %v3680_v54 = vpop.f32.mrb[11].mxu0 }
 0x405   :  { %v4564_v33 = vpop.f32.mrb[16].mxu1 }
 0x406   :  { %v3687_v44 = vpop.f32.mrb[17].mxu1  ;;  %v2766_v7 = vsel %vm2756_vm3, %v4564_v33, -inf }
 0x407   :  { %v2549_v20 = vpop.f32.mrb[18].mxu1 }
 0x408   :  { %1525 = vrot.lane.b32.xlu1 %v4186_v22, %s3986_s24  ;;  %v3688_v1 = vpop.f32.mrb[19].mxu1 }
 0x40c   :  { %1531 = vrot.lane.b32.xlu1 %v4273_v56, %s3986_s24  ;;  %v4570_v24 = vpop.f32.mrb[12].mxu0 }
 0x40d   :  { %v3695_v10 = vpop.f32.mrb[13].mxu0  ;;  %v2769_v9 = vsel %vm2756_vm3, %v4570_v24, -inf }
 0x40e   :  { %2770 = vmax.xlane.f32.xlu0 %v2769_v9  ;;  %v2600_v52 = vpop.f32.mrb[14].mxu0 }
 0x40f   :  { %v3696_v57 = vpop.f32.mrb[15].mxu0 }
 0x410   :  { %1537 = vrot.lane.b32.xlu1 %v4241_v27, %s3986_s24 }
 0x412   :  { %2767 = vmax.xlane.f32.xlu0 %v2766_v7 }
 0x414   :  { %1527 = vrot.lane.b32.xlu1 %v4188_v29, %s3986_s24 }
 0x415   :  { %v4580_v22 = vpop.f32.mrb[20].mxu1 }
 0x416   :  { %v3703_v56 = vpop.f32.mrb[21].mxu1  ;;  %v2772_v29 = vsel %vm2756_vm3, %v4580_v22, -inf }
 0x417   :  { %v2651_v19 = vpop.f32.mrb[22].mxu1 }
 0x418   :  { %v3704_v4 = vpop.f32.mrb[23].mxu1 }
 0x41c   :  { %v4582_v0 = vpop.f32.mrb[16].mxu0 }
 0x41d   :  { %v3711_v38 = vpop.f32.mrb[17].mxu0  ;;  %v2775_v18 = vsel %vm2756_vm3, %v4582_v0, -inf }
 0x41e   :  { %v2702_v26 = vpop.f32.mrb[18].mxu0 }
 0x41f   :  { %v3712_v17 = vpop.f32.mrb[19].mxu0 }
 0x425   :  { %v4584_v63 = vpop.f32.mrb[24].mxu1 }
 0x426   :  { %v3719_v27 = vpop.f32.mrb[25].mxu1 }
 0x427   :  { %v2753_v46 = vpop.f32.mrb[26].mxu1 }
 0x428   :  { %v3720_v50 = vpop.f32.mrb[27].mxu1  ;;  %1519 = vrot.lane.b32.xlu0 %v4159_v61, %s3986_s24  ;;  %v2778_v61 = vsel %vm2756_vm3, %v4584_v63, -inf }
 0x438   :  { %2773 = vmax.xlane.f32.xlu1 %v2772_v29 }
 0x447   :  { %2776 = vmax.xlane.f32.xlu0 %v2775_v18 }
 0x449   :  { %1539 = vrot.lane.b32.xlu1 %v4199_v40, %s3986_s24 }
 0x45d   :  { %1521 = vrot.lane.b32.xlu0 %v4168_v12, %s3986_s24 }
 0x461   :  { %1533 = vrot.lane.b32.xlu0 %v4195_v37, %s3986_s24 }
 0x46d   :  { %2779 = vmax.xlane.f32.xlu1 %v2778_v61 }
 0x47b   :  { %v2759_v16 = vpop.xlane.xlu0 %2758 }
 0x47c   :  { %v2781_v30 = vsub.f32 %v2393_v35, %v2759_v16 }
 0x47e   :  { %1523 = vrot.lane.b32.xlu1 %v4174_v21, %s3986_s24  ;;  %v2789_v13 = vmul.f32 1.442695, %v2781_v30 }
 0x480   :  { %3843 = vpow2.f32 %v2789_v13 }
 0x482   :  { %1529 = vrot.lane.b32.xlu1 %v4219_v53, %s3986_s24 }
 0x484   :  { %v2762_v37 = vpop.xlane.xlu1 %2761 }
 0x485   :  { %v2782_v53 = vsub.f32 %v4559_v48, %v2762_v37 }
 0x486   :  { %1535 = vrot.lane.b32.xlu1 %v4229_v6, %s3986_s24 }
 0x487   :  { %v2791_v55 = vmul.f32 1.442695, %v2782_v53 }
 0x488   :  { %v1526_v14 = vpop.permute.xlu1 %1525 }
 0x48a   :  { %v4606_v12 = vpop.eup %3843  ;;  %1541 = vrot.lane.b32.xlu1 %v4247_v32, %s3986_s24 }
 0x48b   :  { %v2765_v40 = vpop.xlane.xlu0 %2764  ;;  %v2805_v15 = vsel %vm2756_vm3, %v4606_v12, 0.0 }
 0x48c   :  { %v2783_v8 = vsub.f32 %v2495_v2, %v2765_v40  ;;  %2806 = vadd.xlane.f32.xlu0 %v2805_v15  ;;  %v1532_v11 = vpop.permute.xlu1 %1531  ;;  %v1548_v2 = vshrl.u32 %v1526_v14, 16 }
 0x48d   :  { %v1555_v45 = vshrl.u32 %v1532_v11, 16 }
 0x48e   :  { %v2793_v21 = vmul.f32 1.442695, %v2783_v8 }
 0x490   :  { %3845 = vpow2.f32 %v2793_v21  ;;  %v1538_v32 = vpop.permute.xlu1 %1537 }
 0x491   :  { %3847 = vpow2.f32 %v2791_v55  ;;  %v1553_v39 = vpack.i.b16 %v1538_v32, %v1532_v11  ;;  %v1556_v35 = vshrl.u32 %v1538_v32, 16 }
 0x493   :  { %v1557_v51 = vpack.i.b16 %v1556_v35, %v1555_v45  ;;  %v1606_v23 = vcombine.high %v1553_v39, %v4193_v36  ;;  %v1613_v54 = vrot.slane %v1553_v39, %v4202_v41 }
 0x495   :  { %v1620_v1 = vrot.slane %v1606_v23, %v4202_v41  ;;  %v1679_v7 = vrot.slane %v1557_v51, %v4202_v41 }
 0x49a   :  { %v4613_v6 = vpop.eup %3845 }
 0x49b   :  { %v2771_v42 = vpop.xlane.xlu0 %2770  ;;  %v2811_v31 = vsel %vm2756_vm3, %v4613_v6, 0.0  ;;  %v4620_v34 = vpop.eup %3847 }
 0x49c   :  { %2812 = vadd.xlane.f32.xlu0 %v2811_v31  ;;  %v2785_v58 = vsub.f32 %v4570_v24, %v2771_v42  ;;  %v1672_v24 = vcombine.high %v1557_v51, %v4193_v36  ;;  %v2808_v19 = vsel %vm2756_vm3, %v4620_v34, 0.0 }
 0x49e   :  { %v2797_v5 = vmul.f32 1.442695, %v2785_v58  ;;  %v1686_v27 = vrot.slane %v1672_v24, %v4202_v41 }
 0x49f   :  { %v2768_v59 = vpop.xlane.xlu0 %2767 }
 0x4a0   :  { %v2784_v60 = vsub.f32 %v4564_v33, %v2768_v59 }
 0x4a2   :  { %v2795_v48 = vmul.f32 1.442695, %v2784_v60 }
 0x4a3   :  { %v1520_v62 = vpop.permute.xlu0 %1519 }
 0x4a4   :  { %3849 = vpow2.f32 %v2795_v48  ;;  %v1545_v3 = vpack.i.b16 %v1526_v14, %v1520_v62  ;;  %v1547_v28 = vshrl.u32 %v1520_v62, 16 }
 0x4a5   :  { %3851 = vpow2.f32 %v2797_v5 }
 0x4a6   :  { %v1549_v44 = vpack.i.b16 %v1548_v2, %v1547_v28  ;;  %v1591_v20 = vcombine.high %v1545_v3, %v4193_v36  ;;  %v1598_v33 = vrot.slane %v1545_v3, %v4202_v41 }
 0x4a8   :  { %v1605_v10 = vrot.slane %v1591_v20, %v4202_v41  ;;  %v1621_v9 = vcombine.low %v1598_v33, %v1613_v54  ;;  %v1622_v52 = vcombine.high %v1598_v33, %v1613_v54  ;;  %v1657_v57 = vcombine.high %v1549_v44, %v4193_v36 }
 0x4a9   :  { %v1664_v56 = vrot.slane %v1549_v44, %v4202_v41 }
 0x4aa   :  { %v1629_v4 = vrot.slane %v1621_v9, %v4210_v47  ;;  %v1636_v38 = vrot.slane %v1622_v52, %v4210_v47  ;;  %v1637_v26 = vcombine.low %v1605_v10, %v1620_v1  ;;  %v1638_v17 = vcombine.high %v1605_v10, %v1620_v1 }
 0x4ab   :  { %v1671_v46 = vrot.slane %v1657_v57, %v4202_v41  ;;  %v1687_v50 = vcombine.low %v1664_v56, %v1679_v7  ;;  %v1688_v29 = vcombine.high %v1664_v56, %v1679_v7 }
 0x4ac   :  { %v1645_v18 = vrot.slane %v1637_v26, %v4210_v47  ;;  %v1652_v61 = vrot.slane %v1638_v17, %v4210_v47  ;;  %v1987_v16 = vcombine.low %v1629_v4, %v1636_v38  ;;  %v3521_v30 = vcombine.high %v1629_v4, %v1636_v38 }
 0x4ad   :  { %v1695_v13 = vrot.slane %v1687_v50, %v4210_v47  ;;  %v1702_v37 = vrot.slane %v1688_v29, %v4210_v47  ;;  %v1703_v40 = vcombine.low %v1671_v46, %v1686_v27  ;;  %v1704_v15 = vcombine.high %v1671_v46, %v1686_v27  ;;  %v1528_v27 = vpop.permute.xlu1 %1527 }
 0x4ae   :  { %v4641_v8 = vpop.eup %3849  ;;  %v1994_v21 = vrot.slane %v1987_v16, %v4202_v41  ;;  %v2002_v14 = vrot.slane %v3521_v30, %v4202_v41  ;;  %v2003_v53 = vcombine.low %v1645_v18, %v1652_v61  ;;  %v3522_v11 = vcombine.high %v1645_v18, %v1652_v61  ;;  %2809 = vadd.xlane.f32.xlu1 %v2808_v19 }
 0x4af   :  { %v1711_v55 = vrot.slane %v1703_v40, %v4210_v47  ;;  %v1718_v42 = vrot.slane %v1704_v15, %v4210_v47  ;;  %v2037_v31 = vcombine.low %v1695_v13, %v1702_v37  ;;  %v3523_v32 = vcombine.high %v1695_v13, %v1702_v37  ;;  %v4651_v60 = vpop.eup %3851 }
 0x4b0   :  { %v2010_v39 = vrot.slane %v2003_v53, %v4202_v41  ;;  %v2018_v35 = vrot.slane %v3522_v11, %v4202_v41  ;;  %v2814_v58 = vsel %vm2756_vm3, %v4641_v8, 0.0  ;;  %v2019_v59 = vcombine.low %v1994_v21, %v2002_v14 }
 0x4b1   :  { %v2044_v45 = vrot.slane %v2037_v31, %v4202_v41  ;;  %v2052_v48 = vrot.slane %v3523_v32, %v4202_v41  ;;  %v2053_v51 = vcombine.low %v1711_v55, %v1718_v42  ;;  %v3524_v23 = vcombine.high %v1711_v55, %v1718_v42  ;;  %2815 = vadd.xlane.f32.xlu0 %v2814_v58 }
 0x4b2   :  { %v2027_v5 = vcombine.low %v2010_v39, %v2018_v35  ;;  %v2817_v28 = vsel %vm2756_vm3, %v4651_v60, 0.0  ;;  %v2026_v54 = vrot.slane %v2019_v59, %v4210_v47  ;;  %v1564_v40 = vshrl.u32 %v1528_v27, 16 }
 0x4b3   :  { %v2060_v62 = vrot.slane %v2053_v51, %v4202_v41  ;;  %v2068_v2 = vrot.slane %v3524_v23, %v4202_v41  ;;  %v2069_v3 = vcombine.low %v2044_v45, %v2052_v48 }
 0x4b4   :  { %v2034_v44 = vrot.slane %v2027_v5, %v4210_v47 }
 0x4b5   :  { %2818 = vadd.xlane.f32.xlu0 %v2817_v28  ;;  %v2077_v20 = vcombine.low %v2060_v62, %v2068_v2  ;;  %v2076_v24 = vrot.slane %v2069_v3, %v4210_v47 }
 0x4b6   :  { %v2035_v33 = vcombine.low %v2026_v54, %v2034_v44  ;;  %v4661_v1 = vcombine.high %v2026_v54, %v2034_v44 }
 0x4b7   :  { %v2084_v10 = vrot.slane %v2077_v20, %v4210_v47 }
 0x4b8   :  { %v2290_v57 = vshrl.u32 %v2035_v33, 16  ;;  %v2296_v7 = vshrl.u32 %v4661_v1, 16 }
 0x4b9   :  { %v2085_v9 = vcombine.low %v2076_v24, %v2084_v10  ;;  %v4665_v52 = vcombine.high %v2076_v24, %v2084_v10 }
 0x4bb   :  { %v2289_v56 = vpack.i.b16 %v2085_v9, %v2035_v33  ;;  %v2291_v19 = vshrl.u32 %v2085_v9, 16  ;;  %v2295_v4 = vpack.i.b16 %v4665_v52, %v4661_v1  ;;  %v2297_v38 = vshrl.u32 %v4665_v52, 16 }
 0x4bd   :  { %3722 = vmatpush3.bf16.msra.mxu0 %v2289_v56  ;;  %v2292_v26 = vpack.i.b16 %v2291_v19, %v2290_v57  ;;  %v4671_v17 = vpack.i.b16 %v2297_v38, %v2296_v7 }
 0x4be   :  { %3723 = vmatprep.subr.bf16.mxu0 %v3977_v43 }
 0x4bf   :  { %3738 = vmatpush3.bf16.msra.mxu1 %v2292_v26 }
 0x4c0   :  { %3739 = vmatprep.subr.bf16.mxu1 %v3977_v43 }
 0x4c5   :  { %v2774_v46 = vpop.xlane.xlu1 %2773 }
 0x4c6   :  { %v2786_v50 = vsub.f32 %v4580_v22, %v2774_v46 }
 0x4c8   :  { %v2799_v29 = vmul.f32 1.442695, %v2786_v50 }
 0x4c9   :  { %v1540_v14 = vpop.permute.xlu1 %1539 }
 0x4ca   :  { %3853 = vpow2.f32 %v2799_v29  ;;  %v1572_v42 = vshrl.u32 %v1540_v14, 16 }
 0x4d4   :  { %v4676_v18 = vpop.eup %3853  ;;  %v2777_v61 = vpop.xlane.xlu0 %2776 }
 0x4d5   :  { %v2820_v16 = vsel %vm2756_vm3, %v4676_v18, 0.0  ;;  %v2787_v30 = vsub.f32 %v4582_v0, %v2777_v61 }
 0x4d6   :  { %2821 = vadd.xlane.f32.xlu0 %v2820_v16 }
 0x4d7   :  { %v2801_v13 = vmul.f32 1.442695, %v2787_v30 }
 0x4d8   :  { %v1522_v37 = vpop.permute.xlu0 %1521 }
 0x4d9   :  { %3855 = vpow2.f32 %v2801_v13  ;;  %v1561_v15 = vpack.i.b16 %v1528_v27, %v1522_v37  ;;  %v1563_v21 = vshrl.u32 %v1522_v37, 16 }
 0x4db   :  { %v1565_v53 = vpack.i.b16 %v1564_v40, %v1563_v21  ;;  %v1723_v11 = vcombine.high %v1561_v15, %v4193_v36  ;;  %v1730_v39 = vrot.slane %v1561_v15, %v4202_v41 }
 0x4dc   :  { %v1534_v22 = vpop.permute.xlu0 %1533 }
 0x4dd   :  { %v1569_v55 = vpack.i.b16 %v1540_v14, %v1534_v22  ;;  %v1789_v31 = vcombine.high %v1565_v53, %v4193_v36  ;;  %v1571_v32 = vshrl.u32 %v1534_v22, 16  ;;  %v1737_v59 = vrot.slane %v1723_v11, %v4202_v41 }
 0x4de   :  { %v1796_v23 = vrot.slane %v1565_v53, %v4202_v41 }
 0x4df   :  { %v1738_v0 = vcombine.high %v1569_v55, %v4193_v36  ;;  %v1745_v35 = vrot.slane %v1569_v55, %v4202_v41  ;;  %v1573_v58 = vpack.i.b16 %v1572_v42, %v1571_v32  ;;  %v1803_v5 = vrot.slane %v1789_v31, %v4202_v41 }
 0x4e1   :  { %v1752_v45 = vrot.slane %v1738_v0, %v4202_v41  ;;  %v1753_v48 = vcombine.low %v1730_v39, %v1745_v35  ;;  %v1754_v51 = vcombine.high %v1730_v39, %v1745_v35  ;;  %v1804_v62 = vcombine.high %v1573_v58, %v4193_v36 }
 0x4e2   :  { %v1811_v2 = vrot.slane %v1573_v58, %v4202_v41 }
 0x4e3   :  { %v4692_v3 = vpop.eup %3855  ;;  %v1761_v28 = vrot.slane %v1753_v48, %v4210_v47  ;;  %v1768_v54 = vrot.slane %v1754_v51, %v4210_v47  ;;  %v1769_v44 = vcombine.low %v1737_v59, %v1752_v45  ;;  %v1770_v20 = vcombine.high %v1737_v59, %v1752_v45 }
 0x4e4   :  { %v1818_v33 = vrot.slane %v1804_v62, %v4202_v41  ;;  %v1819_v24 = vcombine.low %v1796_v23, %v1811_v2  ;;  %v1820_v10 = vcombine.high %v1796_v23, %v1811_v2  ;;  %v2823_v9 = vsel %vm2756_vm3, %v4692_v3, 0.0 }
 0x4e5   :  { %v1777_v57 = vrot.slane %v1769_v44, %v4210_v47  ;;  %v1784_v7 = vrot.slane %v1770_v20, %v4210_v47  ;;  %v2087_v56 = vcombine.low %v1761_v28, %v1768_v54  ;;  %v3525_v19 = vcombine.high %v1761_v28, %v1768_v54  ;;  %2824 = vadd.xlane.f32.xlu0 %v2823_v9 }
 0x4e6   :  { %v1827_v38 = vrot.slane %v1819_v24, %v4210_v47  ;;  %v1834_v26 = vrot.slane %v1820_v10, %v4210_v47  ;;  %v1835_v27 = vcombine.low %v1803_v5, %v1818_v33  ;;  %v1836_v46 = vcombine.high %v1803_v5, %v1818_v33 }
 0x4e7   :  { %v2094_v50 = vrot.slane %v2087_v56, %v4202_v41  ;;  %v2102_v29 = vrot.slane %v3525_v19, %v4202_v41  ;;  %v2103_v61 = vcombine.low %v1777_v57, %v1784_v7  ;;  %v3526_v16 = vcombine.high %v1777_v57, %v1784_v7 }
 0x4e8   :  { %v1843_v30 = vrot.slane %v1835_v27, %v4210_v47  ;;  %v1850_v13 = vrot.slane %v1836_v46, %v4210_v47  ;;  %v2137_v37 = vcombine.low %v1827_v38, %v1834_v26  ;;  %v3527_v40 = vcombine.high %v1827_v38, %v1834_v26 }
 0x4e9   :  { %v2110_v15 = vrot.slane %v2103_v61, %v4202_v41  ;;  %v2118_v21 = vrot.slane %v3526_v16, %v4202_v41  ;;  %v2119_v14 = vcombine.low %v2094_v50, %v2102_v29 }
 0x4ea   :  { %v2144_v53 = vrot.slane %v2137_v37, %v4202_v41  ;;  %v2152_v22 = vrot.slane %v3527_v40, %v4202_v41  ;;  %v2153_v11 = vcombine.low %v1843_v30, %v1850_v13  ;;  %v3528_v55 = vcombine.high %v1843_v30, %v1850_v13 }
 0x4eb   :  { %v2127_v42 = vcombine.low %v2110_v15, %v2118_v21  ;;  %v2126_v0 = vrot.slane %v2119_v14, %v4210_v47 }
 0x4ec   :  { %v2160_v31 = vrot.slane %v2153_v11, %v4202_v41  ;;  %v2168_v32 = vrot.slane %v3528_v55, %v4202_v41  ;;  %v2169_v39 = vcombine.low %v2144_v53, %v2152_v22 }
 0x4ed   :  { %v2134_v35 = vrot.slane %v2127_v42, %v4210_v47 }
 0x4ee   :  { %v2177_v58 = vcombine.low %v2160_v31, %v2168_v32  ;;  %v2176_v48 = vrot.slane %v2169_v39, %v4210_v47 }
 0x4ef   :  { %v2135_v59 = vcombine.low %v2126_v0, %v2134_v35  ;;  %v2136_v45 = vcombine.high %v2126_v0, %v2134_v35 }
 0x4f0   :  { %v2184_v51 = vrot.slane %v2177_v58, %v4210_v47 }
 0x4f1   :  { %v2302_v62 = vshrl.u32 %v2135_v59, 16  ;;  %v2308_v20 = vshrl.u32 %v2136_v45, 16 }
 0x4f2   :  { %v2185_v23 = vcombine.low %v2176_v48, %v2184_v51  ;;  %v2186_v5 = vcombine.high %v2176_v48, %v2184_v51 }
 0x4f4   :  { %v4717_v2 = vpack.i.b16 %v2185_v23, %v2135_v59  ;;  %v2303_v28 = vshrl.u32 %v2185_v23, 16  ;;  %v4719_v54 = vpack.i.b16 %v2186_v5, %v2136_v45  ;;  %v2309_v44 = vshrl.u32 %v2186_v5, 16 }
 0x4f6   :  { %v3549_v33 = vcombine.low %v4717_v2, %v4717_v2  ;;  %v4723_v24 = vpack.i.b16 %v2303_v28, %v2302_v62  ;;  %v4725_v10 = vpack.i.b16 %v2309_v44, %v2308_v20 }
 0x4f8   :  { %v2861_v9 = vsel %vm2859_vm4, %v3549_v33, 0  ;;  %v3553_v57 = vcombine.low %v4723_v24, %v4723_v24 }
 0x4f9   :  { %3724 = vmatpush3.bf16.msra.mxu0 %v2861_v9 }
 0x4fa   :  { %v2780_v7 = vpop.xlane.xlu1 %2779  ;;  %v2959_v56 = vsel %vm2859_vm4, %v3553_v57, 0  ;;  %3729 = vmatprep.subr.bf16.mxu0 %v3977_v43 }
 0x4fb   :  { %v2788_v19 = vsub.f32 %v4584_v63, %v2780_v7  ;;  %3740 = vmatpush3.bf16.msra.mxu1 %v2959_v56 }
 0x4fc   :  { %3753 = vmatprep.subr.bf16.mxu1 %v3977_v43 }
 0x4fd   :  { %v2803_v38 = vmul.f32 1.442695, %v2788_v19 }
 0x4fe   :  { %v1524_v26 = vpop.permute.xlu1 %1523 }
 0x4ff   :  { %3857 = vpow2.f32 %v2803_v38  ;;  %v1579_v61 = vshrl.u32 %v1524_v26, 16 }
 0x502   :  { %v1530_v27 = vpop.permute.xlu1 %1529 }
 0x503   :  { %v1577_v46 = vpack.i.b16 %v1530_v27, %v1524_v26  ;;  %v1580_v50 = vshrl.u32 %v1530_v27, 16 }
 0x505   :  { %v1581_v30 = vpack.i.b16 %v1580_v50, %v1579_v61  ;;  %v1855_v13 = vcombine.high %v1577_v46, %v4193_v36  ;;  %v1862_v14 = vrot.slane %v1577_v46, %v4202_v41 }
 0x506   :  { %v1536_v29 = vpop.permute.xlu1 %1535 }
 0x507   :  { %v1587_v40 = vshrl.u32 %v1536_v29, 16  ;;  %v1869_v55 = vrot.slane %v1855_v13, %v4202_v41  ;;  %v1921_v42 = vcombine.high %v1581_v30, %v4193_v36  ;;  %v1928_v35 = vrot.slane %v1581_v30, %v4202_v41 }
 0x509   :  { %v4734_v16 = vpop.eup %3857  ;;  %v1935_v23 = vrot.slane %v1921_v42, %v4202_v41 }
 0x50a   :  { %v1542_v37 = vpop.permute.xlu1 %1541  ;;  %v2826_v63 = vsel %vm2756_vm3, %v4734_v16, 0.0 }
 0x50b   :  { %v1585_v15 = vpack.i.b16 %v1542_v37, %v1536_v29  ;;  %v1588_v21 = vshrl.u32 %v1542_v37, 16  ;;  %2827 = vadd.xlane.f32.xlu0 %v2826_v63 }
 0x50d   :  { %v1589_v53 = vpack.i.b16 %v1588_v21, %v1587_v40  ;;  %v1870_v22 = vcombine.high %v1585_v15, %v4193_v36  ;;  %v1877_v11 = vrot.slane %v1585_v15, %v4202_v41 }
 0x50f   :  { %v1884_v31 = vrot.slane %v1870_v22, %v4202_v41  ;;  %v1885_v32 = vcombine.low %v1862_v14, %v1877_v11  ;;  %v1886_v39 = vcombine.high %v1862_v14, %v1877_v11  ;;  %v1936_v0 = vcombine.high %v1589_v53, %v4193_v36 }
 0x510   :  { %v1943_v58 = vrot.slane %v1589_v53, %v4202_v41 }
 0x511   :  { %v1893_v59 = vrot.slane %v1885_v32, %v4210_v47  ;;  %v1900_v45 = vrot.slane %v1886_v39, %v4210_v47  ;;  %v1901_v48 = vcombine.low %v1869_v55, %v1884_v31  ;;  %v1902_v51 = vcombine.high %v1869_v55, %v1884_v31 }
 0x512   :  { %v1950_v5 = vrot.slane %v1936_v0, %v4202_v41  ;;  %v1951_v62 = vcombine.low %v1928_v35, %v1943_v58  ;;  %v1952_v28 = vcombine.high %v1928_v35, %v1943_v58 }
 0x513   :  { %v1909_v44 = vrot.slane %v1901_v48, %v4210_v47  ;;  %v1916_v36 = vrot.slane %v1902_v51, %v4210_v47  ;;  %v2187_v20 = vcombine.low %v1893_v59, %v1900_v45  ;;  %v3529_v33 = vcombine.high %v1893_v59, %v1900_v45  ;;  %v3875_v59 = vld [vmem:[%s4882_s5] ss:$0 sm:$0xff]  ;;  %s3987_s5 = smov [#allocation8]  }
 0x514   :  { %v1959_v9 = vrot.slane %v1951_v62, %v4210_v47  ;;  %v1966_v57 = vrot.slane %v1952_v28, %v4210_v47  ;;  %v1967_v7 = vcombine.low %v1935_v23, %v1950_v5  ;;  %v1968_v56 = vcombine.high %v1935_v23, %v1950_v5  ;;  %s3471_s27 = sshll.u32 %s3987_s5, 4  ;;  %s3472_s27 = int_to_ptr.vmem [resolvable:$true] %s3471_s27 }
 0x515   :  { %v2194_v19 = vrot.slane %v2187_v20, %v4202_v41  ;;  %v2202_v38 = vrot.slane %v3529_v33, %v4202_v41  ;;  %v2203_v26 = vcombine.low %v1909_v44, %v1916_v36  ;;  %v3530_v27 = vcombine.high %v1909_v44, %v1916_v36  ;;  %s3942_s28 = scalar_lea.vmem %s3472_s27, 256  ;;  %p3947_p11 = scmp.lt.s32.totalorder %s3472_s27, %s3472_s27 }
 0x516   :  { %v1975_v46 = vrot.slane %v1967_v7, %v4210_v47  ;;  %v1982_v50 = vrot.slane %v1968_v56, %v4210_v47  ;;  %v2237_v29 = vcombine.low %v1959_v9, %v1966_v57  ;;  %v3531_v61 = vcombine.high %v1959_v9, %v1966_v57  ;;  %p3943_p10 = scmp.ne.s32.totalorder %s3472_s27, %s3942_s28  ;;  %p3948_p12 = scmp.lt.s32.totalorder %s3942_s28, %s3942_s28 }
 0x517   :  { %v2210_v30 = vrot.slane %v2203_v26, %v4202_v41  ;;  %v2218_v13 = vrot.slane %v3530_v27, %v4202_v41  ;;  %v2219_v21 = vcombine.low %v2194_v19, %v2202_v38  ;;  %v2326_v23 = vunpack.c.h.b16 %v4717_v2 }
 0x518   :  { %v2244_v37 = vrot.slane %v2237_v29, %v4202_v41  ;;  %v2252_v63 = vrot.slane %v3531_v61, %v4202_v41  ;;  %v2253_v40 = vcombine.low %v1975_v46, %v1982_v50  ;;  %v3532_v15 = vcombine.high %v1975_v46, %v1982_v50  ;;  %p3949_p13 = por %p3948_p12, %p3947_p11 }
 0x519   :  { %v2227_v14 = vcombine.low %v2210_v30, %v2218_v13  ;;  %v2807_v53 = vpop.xlane.xlu0 %2806  ;;  %v2226_v32 = vrot.slane %v2219_v21, %v4210_v47  ;;  %v3557_v20 = vcombine.low %v4719_v54, %v4719_v54  ;;  %v2332_v26 = vunpack.c.h.b16 %v4723_v24 }
 0x51a   :  { %v2260_v22 = vrot.slane %v2253_v40, %v4202_v41  ;;  %v2268_v11 = vrot.slane %v3532_v15, %v4202_v41  ;;  %v2269_v55 = vcombine.low %v2244_v37, %v2252_v63  ;;  %3859 = vrcp.f32 %v2807_v53  ;;  %p3950_p0 = pnand %p3949_p13, %p3943_p10 }
 0x51b   :  { %v2234_v42 = vrot.slane %v2227_v14, %v4210_v47  ;;  %v3057_v9 = vsel %vm2859_vm4, %v3557_v20, 0  ;;  %v2338_v15 = vunpack.c.h.b16 %v4719_v54  ;;  %v3561_v14 = vcombine.low %v4725_v10, %v4725_v10 }
 0x51c   :  { %v2277_v31 = vcombine.low %v2260_v22, %v2268_v11  ;;  %v2276_v39 = vrot.slane %v2269_v55, %v4210_v47 }
 0x51d   :  { %v2235_v35 = vcombine.low %v2226_v32, %v2234_v42  ;;  %v2236_v27 = vcombine.high %v2226_v32, %v2234_v42 }
 0x51e   :  { %v2284_v0 = vrot.slane %v2277_v31, %v4210_v47 }
 0x51f   :  { %v2314_v7 = vshrl.u32 %v2235_v35, 16  ;;  %v2320_v11 = vshrl.u32 %v2236_v27, 16 }
 0x520   :  { %v2285_v58 = vcombine.low %v2276_v39, %v2284_v0 }
 0x521   :  { %3457 = vrot.lane.b32.xlu0 %v3875_v59, %s3986_s24 }
 0x522   :  { %v2313_v41 = vpack.i.b16 %v2285_v58, %v2235_v35  ;;  %v2315_v57 = vshrl.u32 %v2285_v58, 16 }
 0x524   :  { %v3860_v45 = vpop.eup %3859  ;;  %v2327_v48 = vunpack.c.l.b16 %v2313_v41  ;;  %v3551_v28 = vcombine.high %v2313_v41, %v2313_v41  ;;  %v2316_v19 = vpack.i.b16 %v2315_v57, %v2314_v7 }
 0x525   :  { %v2837_v51 = vmul.f32 %v3860_v45, %v4606_v12 }
 0x526   :  { %v2903_v62 = vpack.c.b16 %v2327_v48, %v2326_v23  ;;  %v2910_v44 = vsel %vm2859_vm4, %v3551_v28, 0  ;;  %v2333_v52 = vunpack.c.l.b16 %v2316_v19  ;;  %v3555_v13 = vcombine.high %v2316_v19, %v2316_v19  ;;  %v3251_v28 = vld [vmem:[#allocation7 + $0x4] sm:$0xf] }
 0x527   :  { %v2845_v5 = vpack.c.bf16 %v2837_v51, %v2837_v51  ;;  %v3250_v51 = vld [vmem:[#allocation7] sm:$0xf] }
 0x528   :  { %v3001_v29 = vpack.c.b16 %v2333_v52, %v2332_v26  ;;  %v3008_v63 = vsel %vm2859_vm4, %v3555_v13, 0  ;;  %v3258_v23 = vsel %vm2859_vm4, %v3250_v51, 0 }
 0x529   :  { %3726 = vmatmul.mubr.msk.bf16.vlgmr.msra.gmra.mrb[20].mxu0 %vm2756_vm3, %v2845_v5  ;;  %v2813_v47 = vpop.xlane.xlu0 %2812 }
 0x52a   :  { %3730 = vmatpush3.bf16.msra.mxu0 %v2903_v62  ;;  %3861 = vrcp.f32 %v2813_v47  ;;  %3733 = vmatprep.mubr.msk.bf16.mxu0 %vm3978_vm1, %v3977_v43 }
 0x52b   :  { %3731 = vmatprep.subr.bf16.mxu0 %v3977_v43 }
 0x52e   :  { %3732 = vmatpush3.bf16.msra.mxu0 %v2910_v44 }
 0x52f   :  { %3745 = vmatprep.subr.bf16.mxu0 %v3977_v43 }
 0x534   :  { %v3862_v12 = vpop.eup %3861 }
 0x535   :  { %v2839_v2 = vmul.f32 %v3862_v12, %v4613_v6 }
 0x537   :  { %v2847_v36 = vpack.c.bf16 %v2839_v2, %v2839_v2 }
 0x539   :  { %3742 = vmatmul.mubr.msk.bf16.vlgmr.msra.gmra.mrb[28].mxu1 %vm2756_vm3, %v2847_v36 }
 0x53a   :  { %3754 = vmatpush3.bf16.msra.mxu1 %v2295_v4  ;;  %3757 = vmatprep.mubr.msk.bf16.mxu1 %vm3978_vm1, %v3977_v43  ;;  %v2286_v4 = vcombine.high %v2276_v39, %v2284_v0  ;;  %v2344_v39 = vunpack.c.h.b16 %v4725_v10 }
 0x53b   :  { %v2810_v33 = vpop.xlane.xlu1 %2809  ;;  %3755 = vmatprep.subr.bf16.mxu1 %v3977_v43 }
 0x53c   :  { %3863 = vrcp.f32 %v2810_v33  ;;  %v2319_v61 = vpack.i.b16 %v2286_v4, %v2236_v27  ;;  %v2321_v22 = vshrl.u32 %v2286_v4, 16  ;;  %v3253_v4 = vld [vmem:[#allocation7 + $0xc] sm:$0xf] }
 0x53e   :  { %3756 = vmatpush3.bf16.msra.mxu1 %v3057_v9  ;;  %v2816_v6 = vpop.xlane.xlu0 %2815  ;;  %v2339_v24 = vunpack.c.l.b16 %v2319_v61  ;;  %v3559_v53 = vcombine.high %v2319_v61, %v2319_v61  ;;  %v2322_v55 = vpack.i.b16 %v2321_v22, %v2320_v11  ;;  %v3399_v61 = vsel %vm2859_vm4, %v3253_v4, 0 }
 0x53f   :  { %3865 = vrcp.f32 %v2816_v6  ;;  %3769 = vmatprep.subr.bf16.mxu1 %v3977_v43  ;;  %v3252_v6 = vld [vmem:[#allocation7 + $0x8] sm:$0xf] }
 0x540   :  { %v3099_v21 = vpack.c.b16 %v2339_v24, %v2338_v15  ;;  %v3106_v54 = vsel %vm2859_vm4, %v3559_v53, 0  ;;  %v2345_v31 = vunpack.c.l.b16 %v2322_v55  ;;  %v3563_v59 = vcombine.high %v2322_v55, %v2322_v55 }
 0x541   :  { %v3352_v19 = vsel %vm2859_vm4, %v3252_v6, 0 }
 0x542   :  { %v2819_v56 = vpop.xlane.xlu0 %2818  ;;  %v3197_v35 = vpack.c.b16 %v2345_v31, %v2344_v39  ;;  %v3204_v41 = vsel %vm2859_vm4, %v3563_v59, 0 }
 0x543   :  { %3867 = vrcp.f32 %v2819_v56 }
 0x546   :  { %v3864_v1 = vpop.eup %3863 }
 0x547   :  { %v2838_v38 = vmul.f32 %v3864_v1, %v4620_v34 }
 0x549   :  { %v3866_v46 = vpop.eup %3865  ;;  %v2846_v50 = vpack.c.bf16 %v2838_v38, %v2838_v38 }
 0x54a   :  { %v2840_v30 = vmul.f32 %v3866_v46, %v4641_v8 }
 0x54b   :  { %3734 = vmatmul.mubr.msk.bf16.vlgmr.msra.gmra.mrb[24].mxu0 %vm2756_vm3, %v2846_v50 }
 0x54c   :  { %3746 = vmatpush3.bf16.msra.mxu0 %v3001_v29  ;;  %3749 = vmatprep.mubr.msk.bf16.mxu0 %vm3978_vm1, %v3977_v43  ;;  %v2848_v40 = vpack.c.bf16 %v2840_v30, %v2840_v30 }
 0x54d   :  { %v3868_v37 = vpop.eup %3867  ;;  %3747 = vmatprep.subr.bf16.mxu0 %v3977_v43 }
 0x54e   :  { %v2841_v34 = vmul.f32 %v3868_v37, %v4651_v60  ;;  %v3155_v60 = vsel %vm2859_vm4, %v3561_v14, 0 }
 0x550   :  { %3748 = vmatpush3.bf16.msra.mxu0 %v3008_v63  ;;  %v2849_v8 = vpack.c.bf16 %v2841_v34, %v2841_v34 }
 0x551   :  { %3761 = vmatprep.subr.bf16.mxu0 %v3977_v43 }
 0x552   :  { %3758 = vmatmul.mubr.msk.bf16.vlgmr.msra.gmra.mrb[32].mxu1 %vm2756_vm3, %v2849_v8 }
 0x553   :  { %3750 = vmatmul.mubr.msk.bf16.vlgmr.msra.gmra.mrb[28].mxu0 %vm2756_vm3, %v2848_v40  ;;  %3770 = vmatpush3.bf16.msra.mxu1 %v4671_v17 }
 0x554   :  { %3762 = vmatpush3.bf16.msra.mxu0 %v3099_v21  ;;  %3771 = vmatprep.subr.bf16.mxu1 %v3977_v43 }
 0x555   :  { %3763 = vmatprep.subr.bf16.mxu0 %v3977_v43  ;;  %3765 = vmatprep.mubr.msk.bf16.mxu0 %vm3978_vm1, %v3977_v43 }
 0x556   :  { %3773 = vmatprep.mubr.msk.bf16.mxu1 %vm3978_vm1, %v3977_v43 }
 0x557   :  { %3772 = vmatpush3.bf16.msra.mxu1 %v3155_v60 }
 0x558   :  { %3764 = vmatpush3.bf16.msra.mxu0 %v3106_v54  ;;  %3785 = vmatprep.subr.bf16.mxu1 %v3977_v43 }
 0x559   :  { %3777 = vmatprep.subr.bf16.mxu0 %v3977_v43 }
 0x563   :  { %v2822_v17 = vpop.xlane.xlu0 %2821 }
 0x564   :  { %3869 = vrcp.f32 %v2822_v17 }
 0x56e   :  { %v3870_v42 = vpop.eup %3869 }
 0x56f   :  { %v2842_v32 = vmul.f32 %v3870_v42, %v4676_v18 }
 0x571   :  { %v2850_v0 = vpack.c.bf16 %v2842_v32, %v2842_v32 }
 0x572   :  { %v2825_v58 = vpop.xlane.xlu0 %2824 }
 0x573   :  { %3766 = vmatmul.mubr.msk.bf16.vlgmr.msra.gmra.mrb[32].mxu0 %vm2756_vm3, %v2850_v0  ;;  %3871 = vrcp.f32 %v2825_v58 }
 0x574   :  { %3778 = vmatpush3.bf16.msra.mxu0 %v3197_v35  ;;  %3781 = vmatprep.mubr.msk.bf16.mxu0 %vm3978_vm1, %v3977_v43 }
 0x575   :  { %3779 = vmatprep.subr.bf16.mxu0 %v3977_v43 }
 0x578   :  { %3780 = vmatpush3.bf16.msra.mxu0 %v3204_v41 }
 0x579   :  { %3791 = vmatprep.subr.bf16.mxu0 %v3977_v43 }
 0x57d   :  { %v3872_v18 = vpop.eup %3871 }
 0x57e   :  { %v2843_v10 = vmul.f32 %v3872_v18, %v4692_v3  ;;  %v3305_v3 = vsel %vm2859_vm4, %v3251_v28, 0 }
 0x580   :  { %v2851_v45 = vpack.c.bf16 %v2843_v10, %v2843_v10 }
 0x582   :  { %3774 = vmatmul.mubr.msk.bf16.vlgmr.msra.gmra.mrb[36].mxu1 %vm2756_vm3, %v2851_v45 }
 0x583   :  { %3787 = vmatprep.mubr.msk.bf16.mxu1 %vm3978_vm1, %v3977_v43  ;;  %3786 = vmatpush3.bf16.msra.mxu1 %v3258_v23 }
 0x584   :  { %3797 = vmatprep.subr.bf16.mxu1 %v3977_v43 }
 0x598   :  { %v2828_v48 = vpop.xlane.xlu0 %2827 }
 0x599   :  { %3873 = vrcp.f32 %v2828_v48 }
 0x5a3   :  { %v3874_v5 = vpop.eup %3873 }
 0x5a4   :  { %v2844_v62 = vmul.f32 %v3874_v5, %v4734_v16 }
 0x5a6   :  { %v2852_v47 = vpack.c.bf16 %v2844_v62, %v2844_v62 }
 0x5a8   :  { %3782 = vmatmul.mubr.msk.bf16.vlgmr.msra.gmra.mrb[36].mxu0 %vm2756_vm3, %v2852_v47 }
 0x5a9   :  { %3792 = vmatpush3.bf16.msra.mxu0 %v3305_v3  ;;  %3793 = vmatprep.mubr.msk.bf16.mxu0 %vm3978_vm1, %v3977_v43 }
 0x5aa   :  { %3803 = vmatprep.subr.bf16.mxu0 %v3977_v43 }
 0x5fc   :  { %v2897_v44 = vpop.f32.mrb[20].mxu0 }
 0x5fd   :  { %v3727_v12 = vpop.f32.mrb[21].mxu0 }
 0x5fe   :  { %v2900_v2 = vpop.f32.mrb[22].mxu0 }
 0x5ff   :  { %v3728_v36 = vpop.f32.mrb[23].mxu0 }
 0x600   :  { %v3458_v36 = vpop.permute.xlu0 %3457 }
 0x60c   :  { %v2995_v20 = vpop.f32.mrb[28].mxu1 }
 0x60d   :  { %v3743_v33 = vpop.f32.mrb[29].mxu1 }
 0x60e   :  { %v2998_v9 = vpop.f32.mrb[30].mxu1 }
 0x60f   :  { %v3744_v16 = vpop.f32.mrb[31].mxu1 }
 0x61e   :  { %v2946_v57 = vpop.f32.mrb[24].mxu0 }
 0x61f   :  { %v3246_v7 = vpack.c.bf16 %v2946_v57, %v2897_v44  ;;  %v3735_v56 = vpop.f32.mrb[25].mxu0 }
 0x620   :  { %v2949_v1 = vpop.f32.mrb[26].mxu0 }
 0x621   :  { %v3736_v52 = vpop.f32.mrb[27].mxu0  ;;  %3788 = vmatmul.mubr.msk.bf16.vlgmr.msra.gmra.mrb[40].mxu1 %vm2349_vm2, %v3246_v7 }
 0x622   :  { %3798 = vmatpush3.bf16.msra.mxu1 %v3352_v19  ;;  %3799 = vmatprep.mubr.msk.bf16.mxu1 %vm3978_vm1, %v3977_v43 }
 0x625   :  { %v3093_v38 = vpop.f32.mrb[32].mxu1 }
 0x626   :  { %v3044_v26 = vpop.f32.mrb[28].mxu0  ;;  %v3759_v27 = vpop.f32.mrb[33].mxu1 }
 0x627   :  { %v3247_v46 = vpack.c.bf16 %v3044_v26, %v2995_v20  ;;  %v3751_v50 = vpop.f32.mrb[29].mxu0  ;;  %v3096_v29 = vpop.f32.mrb[34].mxu1 }
 0x628   :  { %v3047_v30 = vpop.f32.mrb[30].mxu0  ;;  %v3760_v13 = vpop.f32.mrb[35].mxu1 }
 0x629   :  { %v3752_v37 = vpop.f32.mrb[31].mxu0  ;;  %3794 = vmatmul.mubr.msk.bf16.vlgmr.msra.gmra.mrb[40].mxu0 %vm2349_vm2, %v3247_v46 }
 0x62a   :  { %3804 = vmatpush3.bf16.msra.mxu0 %v3399_v61  ;;  %3805 = vmatprep.mubr.msk.bf16.mxu0 %vm3978_vm1, %v3977_v43 }
 0x646   :  { %v3142_v34 = vpop.f32.mrb[32].mxu0 }
 0x647   :  { %v3248_v24 = vpack.c.bf16 %v3142_v34, %v3093_v38  ;;  %v3767_v63 = vpop.f32.mrb[33].mxu0 }
 0x648   :  { %v3145_v40 = vpop.f32.mrb[34].mxu0 }
 0x649   :  { %v3768_v15 = vpop.f32.mrb[35].mxu0  ;;  %3800 = vmatmul.mubr.msk.bf16.vlgmr.msra.gmra.mrb[44].mxu1 %vm2349_vm2, %v3248_v24 }
 0x655   :  { %v3191_v8 = vpop.f32.mrb[36].mxu1 }
 0x656   :  { %v3775_v21 = vpop.f32.mrb[37].mxu1 }
 0x657   :  { %v3194_v14 = vpop.f32.mrb[38].mxu1 }
 0x658   :  { %v3776_v53 = vpop.f32.mrb[39].mxu1 }
 0x67b   :  { %v3240_v60 = vpop.f32.mrb[36].mxu0 }
 0x67c   :  { %v3249_v54 = vpack.c.bf16 %v3240_v60, %v3191_v8  ;;  %v3783_v17 = vpop.f32.mrb[37].mxu0 }
 0x67d   :  { %v3243_v22 = vpop.f32.mrb[38].mxu0 }
 0x67e   :  { %v3784_v11 = vpop.f32.mrb[39].mxu0  ;;  %3806 = vmatmul.mubr.msk.bf16.vlgmr.msra.gmra.mrb[44].mxu0 %vm2349_vm2, %v3249_v54 }
 0x6f4   :  { %v3294_v55 = vpop.f32.mrb[40].mxu1 }
 0x6f5   :  { %v3789_v43 = vpop.f32.mrb[41].mxu1  ;;  %v3442_v39 = vsel %vm123_vm0, %v3294_v55, 0.0 }
 0x6f6   :  { %v3297_v42 = vpop.f32.mrb[42].mxu1 }
 0x6f7   :  { %v3790_v31 = vpop.f32.mrb[43].mxu1  ;;  %v3449_v41 = vsel %vm123_vm0, %v3297_v42, 0.0 }
 0x6fc   :  { %v3341_v32 = vpop.f32.mrb[40].mxu0 }
 0x6fd   :  { %v3443_v0 = vsel %vm123_vm0, %v3341_v32, 0.0  ;;  %v3795_v35 = vpop.f32.mrb[41].mxu0 }
 0x6fe   :  { %v3444_v58 = vadd.f32 %v3443_v0, %v3442_v39  ;;  %v3344_v59 = vpop.f32.mrb[42].mxu0 }
 0x6ff   :  { %v3450_v18 = vsel %vm123_vm0, %v3344_v59, 0.0  ;;  %v3796_v10 = vpop.f32.mrb[43].mxu0 }
 0x700   :  { %v3451_v45 = vadd.f32 %v3450_v18, %v3449_v41 }
 0x71c   :  { %v3388_v48 = vpop.f32.mrb[44].mxu1 }
 0x71d   :  { %v3445_v51 = vsel %vm123_vm0, %v3388_v48, 0.0  ;;  %v3801_v23 = vpop.f32.mrb[45].mxu1 }
 0x71e   :  { %v3446_v5 = vadd.f32 %v3445_v51, %v3444_v58  ;;  %v3391_v62 = vpop.f32.mrb[46].mxu1 }
 0x71f   :  { %v3452_v47 = vsel %vm123_vm0, %v3391_v62, 0.0  ;;  %v3802_v28 = vpop.f32.mrb[47].mxu1 }
 0x720   :  { %v3453_v3 = vadd.f32 %v3452_v47, %v3451_v45 }
 0x751   :  { %v3435_v44 = vpop.f32.mrb[44].mxu0 }
 0x752   :  { %v3447_v12 = vsel %vm123_vm0, %v3435_v44, 0.0  ;;  %v3807_v2 = vpop.f32.mrb[45].mxu0 }
 0x753   :  { %v3448_v20 = vadd.f32 %v3447_v12, %v3446_v5  ;;  %v3438_v33 = vpop.f32.mrb[46].mxu0 }
 0x754   :  { %v3454_v9 = vsel %vm123_vm0, %v3438_v33, 0.0  ;;  %v3808_v16 = vpop.f32.mrb[47].mxu0 }
 0x755   :  { %v3455_v6 = vadd.f32 %v3454_v9, %v3453_v3  ;;  %v3460_v57 = vadd.f32 %v3458_v36, %v3448_v20 }
 0x757   :  { %v3461_v7 = vadd.f32 %v3458_v36, %v3455_v6  ;;  %v3462_v56 = vadd.f32 %v3460_v57, %v4139_v25 }
 0x759   :  { %v3463_v19 = vadd.f32 %v3461_v7, %v4141_v49  ;;  %3464 = vst.msk [vmem:[#allocation8] sm:$0xff] %vm123_vm0, %v3462_v56 }
 0x75b   :  { %3465 = vst.msk [vmem:[#allocation8 + $0x8] sm:$0xff] %vm123_vm0, %v3463_v19 }
 0x75c   :  { %3953 = shalt.err (!%p3950_p0)
}
 0x75d   :  { %s3954_s9 = scalar_lea.hbm %s4883_s6, 256 }
 0x75e   :  { %p3955_p1 = scmp.ne.s32.totalorder %s4883_s6, %s3954_s9  ;;  %p3958_p2 = scmp.lt.u32.totalorder %s3954_s9, %s4883_s6 }
 0x760   :  { %p3960_p3 = pnand %p3958_p2, %p3955_p1 }
 0x762   :  { %3963 = shalt.err (!%p3960_p3)
}
 0x763   :  { %3477 = dma.vmem_to_hbm [thread:$0]  %s3472_s27, 256, %s4883_s6, [#allocation4], %s3974_s3, %s3974_s3, %s3975_s21  }
 0x764   :  { %3968 = dma.done.wait [#allocation4], 256  }
 0x765   :  { %3969 = vsyncadd [#allocation4], 4294967040 }
 0x766   :  { %3481 = vsyncpa [#allocation3], 1 }
 0x767   :  { %3482 = vsyncpa [#allocation6], 1 }
 0x768   :  { %3483 = vsyncpa [#allocation4], 1 }

// kernel: tpu_custom_call.1
= control target key start
LH: loop header
LB: loop body
LE: loop exit
PB: predicated region body
PF: predicated region fallthrough
CT: control target
= control target key end

     0   :  { %11 = vsyncpa [#allocation3], 0  ;;  %s4877_s0 = inlined_call_operand.hbm [shape: f32[2,3,8,32], index: 0, kind: input, shape index: {}]   ;;  %s4878_s1 = inlined_call_operand.vmem [shape: f32[2,3,32], index: 1, kind: input, shape index: {}]   ;;  %s4879_s2 = inlined_call_operand.vmem [shape: bf16[32,32], index: 2, kind: input, shape index: {}]   ;;  %s4880_s3 = inlined_call_operand.hbm [shape: bf16[32,64], index: 3, kind: input, shape index: {}]   ;;  %s4881_s4 = inlined_call_operand.hbm [shape: bf16[4,8,32], index: 4, kind: input, shape index: {}]   ;;  %s4882_s5 = inlined_call_operand.vmem [shape: f32[2,64], index: 5, kind: input, shape index: {}]   ;;  %s4883_s6 = inlined_call_operand.hbm [shape: f32[2,8,32], index: 6, kind: output, shape index: {}]  }
   0x1   :  { %12 = vsyncpa [#allocation6], 0 }
   0x2   :  { %13 = vsyncpa [#allocation4], 0  ;;  %s3970_s21 = smov [#allocation5]   ;;  %s3876_s25 = scalar_lea.hbm %s4880_s3, 256 }
   0x3   :  { %s35_s22 = sshll.u32 %s3970_s21, 4  ;;  %p3877_p0 = scmp.ne.s32.totalorder %s4880_s3, %s3876_s25  ;;  %s36_s22 = int_to_ptr.vmem [resolvable:$true] %s35_s22 }
   0x4   :  { %p3880_p1 = scmp.lt.u32.totalorder %s3876_s25, %s4880_s3 }
   0x6   :  { %p3882_p2 = pnand %p3880_p1, %p3877_p0 }
   0x8   :  { %3885 = shalt.err (!%p3882_p2)
}
   0x9   :  { %s3886_s30 = scalar_lea.vmem %s36_s22, 256  ;;  %p3891_p4 = scmp.lt.s32.totalorder %s36_s22, %s36_s22 }
   0xa   :  { %p3887_p3 = scmp.ne.s32.totalorder %s36_s22, %s3886_s30  ;;  %p3892_p5 = scmp.lt.s32.totalorder %s3886_s30, %s3886_s30 }
   0xc   :  { %p3893_p6 = por %p3892_p5, %p3891_p4 }
   0xe   :  { %p3894_p7 = pnand %p3893_p6, %p3887_p3 }
  0x10   :  { %3897 = shalt.err (!%p3894_p7)
}
  0x11   :  { %s3971_s7 = smov 64   ;;  %s3972_s8 = smov 4  }
  0x12   :  { %41 = dma.hbm_to_vmem [thread:$0]  %s4880_s3, 256, %s36_s22, [#allocation6], %s3971_s7, %s3971_s7, %s3972_s8  }
  0x13   :  { %s3973_s11 = smov [#allocation2]   ;;  %s3898_s15 = scalar_lea.hbm %s4877_s0, 768 }
  0x14   :  { %s19_s12 = sshll.u32 %s3973_s11, 4  ;;  %p3899_p8 = scmp.ne.s32.totalorder %s4877_s0, %s3898_s15  ;;  %s20_s12 = int_to_ptr.vmem [resolvable:$true] %s19_s12 }
  0x15   :  { %p3902_p9 = scmp.lt.u32.totalorder %s3898_s15, %s4877_s0 }
  0x17   :  { %p3904_p10 = pnand %p3902_p9, %p3899_p8 }
  0x19   :  { %3907 = shalt.err (!%p3904_p10)
}
  0x1a   :  { %s3908_s20 = scalar_lea.vmem %s20_s12, 768  ;;  %p3913_p12 = scmp.lt.s32.totalorder %s20_s12, %s20_s12 }
  0x1b   :  { %p3909_p11 = scmp.ne.s32.totalorder %s20_s12, %s3908_s20  ;;  %p3914_p13 = scmp.lt.s32.totalorder %s3908_s20, %s3908_s20 }
  0x1d   :  { %p3915_p0 = por %p3914_p13, %p3913_p12 }
  0x1f   :  { %p3916_p1 = pnand %p3915_p0, %p3909_p11 }
  0x21   :  { %3919 = shalt.err (!%p3916_p1)
}
  0x22   :  { %s3974_s3 = smov 128   ;;  %s3975_s21 = smov 8  }
  0x23   :  { %25 = dma.hbm_to_vmem [thread:$0]  %s4877_s0, 768, %s20_s12, [#allocation3], %s3974_s3, %s3974_s3, %s3975_s21  }
  0x24   :  { %s3976_s24 = smov [#allocation7]   ;;  %s3920_s28 = scalar_lea.hbm %s4881_s4, 256 }
  0x25   :  { %s47_s25 = sshll.u32 %s3976_s24, 4  ;;  %p3921_p2 = scmp.ne.s32.totalorder %s4881_s4, %s3920_s28  ;;  %s48_s25 = int_to_ptr.vmem [resolvable:$true] %s47_s25 }
  0x26   :  { %p3924_p3 = scmp.lt.u32.totalorder %s3920_s28, %s4881_s4 }
  0x28   :  { %p3926_p4 = pnand %p3924_p3, %p3921_p2 }
  0x2a   :  { %3929 = shalt.err (!%p3926_p4)
}
  0x2b   :  { %s3930_s11 = scalar_lea.vmem %s48_s25, 256  ;;  %p3935_p6 = scmp.lt.s32.totalorder %s48_s25, %s48_s25 }
  0x2c   :  { %p3931_p5 = scmp.ne.s32.totalorder %s48_s25, %s3930_s11  ;;  %p3936_p7 = scmp.lt.s32.totalorder %s3930_s11, %s3930_s11 }
  0x2e   :  { %p3937_p8 = por %p3936_p7, %p3935_p6 }
  0x30   :  { %p3938_p9 = pnand %p3937_p8, %p3931_p5 }
  0x32   :  { %3941 = shalt.err (!%p3938_p9)
}
  0x33   :  { %53 = dma.hbm_to_vmem [thread:$0]  %s4881_s4, 256, %s48_s25, [#allocation6], %s3971_s7, %s3971_s7, %s3972_s8  }
  0x34   :  { %3964 = dma.done.wait [#allocation3], 768  }
  0x35   :  { %3965 = vsyncadd [#allocation3], 4294966528 }
  0x36   :  { %3966 = dma.done.wait [#allocation6], 512  }
  0x37   :  { %3967 = vsyncadd [#allocation6], 4294966784  ;;  %vm123_vm0 = vcmask 261120   ;;  %v66_v0 = vld [vmem:[#allocation2] sm:$0xff]  ;;  %v68_v1 = vld [vmem:[#allocation2 + $0x10] sm:$0xff]  ;;  %v3977_v43 = vmov 0.0   ;;  %v85_v50 = vlaneseq }
  0x38   :  { %v67_v2 = vld [vmem:[#allocation2 + $0x8] sm:$0xff]  ;;  %v124_v3 = vsel %vm123_vm0, %v66_v0, 0.0  ;;  %v130_v4 = vsel %vm123_vm0, %v68_v1, 0.0  ;;  %v69_v5 = vld [vmem:[#allocation2 + $0x18] sm:$0xff]  ;;  %v70_v8 = vld [vmem:[#allocation2 + $0x20] sm:$0xff]  ;;  %3641 = vmatprep.subr.bf16.mxu1 %v3977_v43  ;;  %3633 = vmatprep.subr.bf16.mxu0 %v3977_v43  ;;  %vm3978_vm1 = vmmov 0  }
  0x39   :  { %125 = vadd.xlane.f32.xlu0 %v124_v3  ;;  %131 = vadd.xlane.f32.xlu1 %v130_v4  ;;  %v127_v6 = vsel %vm123_vm0, %v67_v2, 0.0  ;;  %v133_v7 = vsel %vm123_vm0, %v69_v5, 0.0  ;;  %v71_v9 = vld [vmem:[#allocation2 + $0x28] sm:$0xff]  ;;  %v136_v10 = vsel %vm123_vm0, %v70_v8, 0.0  ;;  %v3827_v42 = vld [vmem:[#allocation5] sm:$0xff]   ;;  %v3828_v44 = vld [vmem:[#allocation5 + $0x8] sm:$0xff]  }
  0x3a   :  { %v139_v11 = vsel %vm123_vm0, %v71_v9, 0.0  ;;  %3642 = vmatpush3.bf16.msra.mxu1 %v3827_v42  ;;  %3645 = vmatprep.mubr.msk.bf16.mxu1 %vm3978_vm1, %v3977_v43  ;;  %v3829_v45 = vld [vmem:[%s4879_s2] sm:$0xff]   ;;  %v3830_v46 = vld [vmem:[%s4879_s2 + $0x8] sm:$0xff]   ;;  %v3979_v48 = vmov 1966171168   ;;  %v4120_v56 = vshrl.u32 %v85_v50, 7 }
  0x3b   :  { %3643 = vmatprep.subr.bf16.mxu1 %v3977_v43  ;;  %3637 = vmatprep.mubr.msk.bf16.mxu0 %vm3978_vm1, %v3977_v43  ;;  %v83_v49 = vunpack.c.l.s4 %v3979_v48  ;;  %v3486_v3 = vld.sshfl [vmem:[%s4878_s1 + $0x4] sm:$0x13 pattern:$0x75316420]  ;;  %s3980_s18 = smov 120   ;;  %s3981_s22 = smov 112  }
  0x3c   :  { %3634 = vmatpush3.bf16.msra.mxu0 %v3829_v45  ;;  %s3982_s23 = smov 104   ;;  %vm2349_vm2 = vcmask 64512   ;;  %vm2756_vm3 = vcmask 195584   ;;  %s3986_s24 = smov 96   ;;  %vm2859_vm4 = vcmask 1043456  }
  0x3d   :  { %128 = vadd.xlane.f32.xlu0 %v127_v6  ;;  %134 = vadd.xlane.f32.xlu1 %v133_v7  ;;  %v84_v55 = vunpack.c.0.s8 %v83_v49 }
  0x3e   :  { %3644 = vmatpush3.bf16.msra.mxu1 %v3828_v44  ;;  %3635 = vmatprep.subr.bf16.mxu0 %v3977_v43 }
  0x3f   :  { %3665 = vmatprep.subr.bf16.mxu1 %v3977_v43  ;;  %v87_v63 = vsub.s32 %v84_v55, %v4120_v56 }
  0x40   :  { %3636 = vmatpush3.bf16.msra.mxu0 %v3830_v46 }
  0x41   :  { %137 = vadd.xlane.f32.xlu0 %v136_v10  ;;  %140 = vadd.xlane.f32.xlu1 %v139_v11 }
  0x42   :  { %3657 = vmatprep.subr.bf16.mxu0 %v3977_v43 }
  0xc6   :  { %v126_v12 = vpop.xlane.xlu0 %125  ;;  %v132_v13 = vpop.xlane.xlu1 %131 }
  0xc7   :  { %v143_v14 = vmul.f32 0.03125, %v126_v12  ;;  %v145_v15 = vmul.f32 0.03125, %v132_v13 }
  0xc9   :  { %v4074_v16 = vsub.f32 %v66_v0, %v143_v14  ;;  %v4076_v17 = vsub.f32 %v68_v1, %v145_v15  ;;  %v3484_v1 = vld.sshfl [vmem:[%s4878_s1] sm:$0x13 pattern:$0x75316420] }
  0xca   :  { %v129_v18 = vpop.xlane.xlu0 %128  ;;  %v135_v19 = vpop.xlane.xlu1 %134  ;;  %v88_v7 = vrot.slane %v3484_v1, %v87_v63 }
  0xcb   :  { %v144_v20 = vmul.f32 0.03125, %v129_v18  ;;  %v146_v21 = vmul.f32 0.03125, %v135_v19  ;;  %v155_v22 = vmul.f32 %v4074_v16, %v4074_v16  ;;  %v157_v23 = vmul.f32 %v4076_v17, %v4076_v17 }
  0xcc   :  { %v114_v18 = vrot.slane %v3486_v3, %v87_v63 }
  0xcd   :  { %v4082_v24 = vsub.f32 %v67_v2, %v144_v20  ;;  %v4084_v25 = vsub.f32 %v69_v5, %v146_v21  ;;  %v161_v26 = vsel %vm123_vm0, %v155_v22, 0.0  ;;  %v167_v29 = vsel %vm123_vm0, %v157_v23, 0.0 }
  0xce   :  { %162 = vadd.xlane.f32.xlu0 %v161_v26  ;;  %v138_v27 = vpop.xlane.xlu0 %137  ;;  %v141_v28 = vpop.xlane.xlu1 %140  ;;  %v81_v2 = vcombine.high %v3484_v1, %v3484_v1  ;;  %v96_v23 = vcombine.high %v88_v7, %v88_v7 }
  0xcf   :  { %v147_v30 = vmul.f32 0.03125, %v138_v27  ;;  %v148_v31 = vmul.f32 0.03125, %v141_v28  ;;  %v156_v32 = vmul.f32 %v4082_v24, %v4082_v24  ;;  %v158_v33 = vmul.f32 %v4084_v25, %v4084_v25 }
  0xd0   :  { %v95_v11 = vrot.slane %v81_v2, %v87_v63 }
  0xd1   :  { %v4092_v34 = vsub.f32 %v70_v8, %v147_v30  ;;  %v4094_v35 = vsub.f32 %v71_v9, %v148_v31  ;;  %v164_v36 = vsel %vm123_vm0, %v156_v32, 0.0  ;;  %v170_v37 = vsel %vm123_vm0, %v158_v33, 0.0 }
  0xd2   :  { %168 = vadd.xlane.f32.xlu0 %v167_v29  ;;  %165 = vadd.xlane.f32.xlu1 %v164_v36  ;;  %v107_v8 = vcombine.high %v3486_v3, %v3486_v3  ;;  %v205_v9 = vsub.s32 0, %v4120_v56  ;;  %v122_v33 = vcombine.high %v114_v18, %v114_v18 }
  0xd3   :  { %v159_v38 = vmul.f32 %v4092_v34, %v4092_v34  ;;  %v160_v39 = vmul.f32 %v4094_v35, %v4094_v35 }
  0xd4   :  { %v121_v19 = vrot.slane %v107_v8, %v87_v63  ;;  %v206_v20 = vrot.slane %v88_v7, %v205_v9  ;;  %v210_v21 = vrot.slane %v95_v11, %v205_v9  ;;  %v227_v28 = vrot.slane %v114_v18, %v205_v9 }
  0xd5   :  { %v173_v40 = vsel %vm123_vm0, %v159_v38, 0.0  ;;  %v176_v41 = vsel %vm123_vm0, %v160_v39, 0.0  ;;  %v214_v36 = vrot.slane %v96_v23, %v205_v9  ;;  %v235_v45 = vrot.slane %v122_v33, %v205_v9 }
  0xd6   :  { %171 = vadd.xlane.f32.xlu1 %v170_v37  ;;  %174 = vadd.xlane.f32.xlu0 %v173_v40  ;;  %v231_v29 = vrot.slane %v121_v19, %v205_v9  ;;  %v3983_v23 = vmov 1983009808   ;;  %v3985_v33 = vmov 0  }
  0xda   :  { %177 = vadd.xlane.f32.xlu1 %v176_v41 }
 0x15b   :  { %v163_v47 = vpop.xlane.xlu0 %162 }
 0x15c   :  { %v179_v51 = vmul.f32 0.03125, %v163_v47 }
 0x15e   :  { %v185_v52 = vadd.f32 1e-05, %v179_v51 }
 0x15f   :  { %v166_v53 = vpop.xlane.xlu1 %165  ;;  %v169_v54 = vpop.xlane.xlu0 %168 }
 0x160   :  { %3831 = vrsqrt.f32 %v185_v52  ;;  %v180_v57 = vmul.f32 0.03125, %v166_v53  ;;  %v181_v58 = vmul.f32 0.03125, %v169_v54  ;;  %v3491_v53 = vld [vmem:[%s4882_s5 + $0x1] ss:$0 sm:$0xff] }
 0x162   :  { %v186_v59 = vadd.f32 1e-05, %v180_v57  ;;  %v187_v60 = vadd.f32 1e-05, %v181_v58 }
 0x163   :  { %v172_v61 = vpop.xlane.xlu1 %171  ;;  %v175_v62 = vpop.xlane.xlu0 %174 }
 0x164   :  { %3833 = vrsqrt.f32 %v186_v59  ;;  %v182_v0 = vmul.f32 0.03125, %v172_v61  ;;  %v183_v5 = vmul.f32 0.03125, %v175_v62  ;;  %v3487_v62 = vld [vmem:[%s4882_s5] ss:$0 sm:$0xff] }
 0x165   :  { %3835 = vrsqrt.f32 %v187_v60 }
 0x166   :  { %v188_v4 = vadd.f32 1e-05, %v182_v0  ;;  %v189_v13 = vadd.f32 1e-05, %v183_v5 }
 0x167   :  { %v178_v6 = vpop.xlane.xlu1 %177 }
 0x168   :  { %3837 = vrsqrt.f32 %v188_v4  ;;  %v184_v10 = vmul.f32 0.03125, %v178_v6 }
 0x16a   :  { %v3832_v12 = vpop.eup %3831  ;;  %v190_v14 = vadd.f32 1e-05, %v184_v10 }
 0x16b   :  { %v197_v15 = vmul.f32 %v3832_v12, %v4074_v16 }
 0x16c   :  { %3839 = vrsqrt.f32 %v190_v14 }
 0x16d   :  { %3841 = vrsqrt.f32 %v189_v13  ;;  %v218_v27 = vmul.f32 %v206_v20, %v197_v15 }
 0x16e   :  { %v3834_v22 = vpop.eup %3833 }
 0x16f   :  { %v198_v26 = vmul.f32 %v3834_v22, %v4082_v24  ;;  %v3836_v30 = vpop.eup %3835  ;;  %v239_v38 = vadd.f32 %v227_v28, %v218_v27  ;;  %v3984_v27 = vmov 1934713408  }
 0x170   :  { %v199_v16 = vmul.f32 %v3836_v30, %v4076_v17 }
 0x171   :  { %v219_v31 = vmul.f32 %v210_v21, %v198_v26  ;;  %v436_v26 = vunpack.c.l.s4 %v3983_v23 }
 0x172   :  { %v3838_v32 = vpop.eup %3837  ;;  %v220_v24 = vmul.f32 %v214_v36, %v199_v16 }
 0x173   :  { %v200_v37 = vmul.f32 %v3838_v32, %v4084_v25  ;;  %v240_v39 = vadd.f32 %v231_v29, %v219_v31  ;;  %v437_v30 = vunpack.c.0.s8 %v436_v26 }
 0x174   :  { %v4139_v25 = vadd.f32 %v235_v45, %v220_v24 }
 0x175   :  { %v312_v40 = vpack.c.bf16 %v240_v39, %v239_v38  ;;  %v221_v41 = vmul.f32 %v206_v20, %v200_v37 }
 0x176   :  { %v3840_v42 = vpop.eup %3839 }
 0x177   :  { %v202_v44 = vmul.f32 %v3840_v42, %v4094_v35  ;;  %3646 = vmatmul.mubr.msk.bf16.vlgmr.msra.gmra.mrb[0].mxu1 %vm123_vm0, %v312_v40  ;;  %v3842_v46 = vpop.eup %3841  ;;  %v242_v48 = vadd.f32 %v227_v28, %v221_v41  ;;  %v467_v28 = vunpack.c.l.s4 %v3984_v27  ;;  %v4202_v41 = vsub.s32 %v437_v30, %v4120_v56 }
 0x178   :  { %3649 = vmatprep.mubr.msk.bf16.mxu1 %vm3978_vm1, %v3977_v43  ;;  %v201_v17 = vmul.f32 %v3842_v46, %v4092_v34 }
 0x179   :  { %v223_v47 = vmul.f32 %v214_v36, %v202_v44  ;;  %v313_v35 = vpack.c.bf16 %v242_v48, %v4139_v25  ;;  %v4193_v36 = vpack.i.b16 %v3985_v33, %v3985_v33  ;;  %v468_v16 = vunpack.c.0.s8 %v467_v28 }
 0x17a   :  { %v222_v51 = vmul.f32 %v210_v21, %v201_v17 }
 0x17b   :  { %v4141_v49 = vadd.f32 %v235_v45, %v223_v47  ;;  %v4210_v47 = vsub.s32 %v468_v16, %v4120_v56 }
 0x17c   :  { %v243_v34 = vadd.f32 %v231_v29, %v222_v51 }
 0x17d   :  { %v247_v50 = vpack.c.bf16 %v4141_v49, %v4139_v25 }
 0x17e   :  { %v314_v52 = vpack.c.bf16 %v4141_v49, %v243_v34 }
 0x17f   :  { %3638 = vmatmul.mubr.msk.bf16.vlgmr.msra.gmra.mrb[0].mxu0 %vm123_vm0, %v247_v50  ;;  %3650 = vmatmul.mubr.msk.bf16.gmra.mrb[4].mxu1 %vm123_vm0, %v313_v35 }
 0x180   :  { %3653 = vmatprep.mubr.msk.bf16.mxu1 %vm3978_vm1, %v3977_v43  ;;  %3661 = vmatprep.mubr.msk.bf16.mxu0 %vm3978_vm1, %v3977_v43 }
 0x187   :  { %3654 = vmatmul.mubr.msk.bf16.gmra.mrb[8].mxu1 %vm123_vm0, %v314_v52 }
 0x188   :  { %3669 = vmatprep.mubr.msk.bf16.mxu1 %vm3978_vm1, %v3977_v43 }
 0x24a   :  { %v378_v54 = vpop.f32.mrb[0].mxu1 }
 0x24b   :  { %v3647_v55 = vpop.f32.mrb[1].mxu1  ;;  %v379_v58 = vadd.f32 %v3491_v53, %v378_v54 }
 0x24c   :  { %v381_v57 = vpop.f32.mrb[2].mxu1 }
 0x24d   :  { %v382_v59 = vadd.f32 %v3491_v53, %v381_v57  ;;  %v3648_v60 = vpop.f32.mrb[3].mxu1 }
 0x24f   :  { %v4159_v61 = vpack.c.bf16 %v382_v59, %v379_v58 }
 0x251   :  { %697 = vrot.lane.b32.xlu0 %v4159_v61, %s3980_s18  ;;  %v719_v35 = vshrl.u32 %v4159_v61, 16 }
 0x252   :  { %v305_v63 = vpop.f32.mrb[0].mxu0  ;;  %v386_v0 = vpop.f32.mrb[4].mxu1 }
 0x253   :  { %v3639_v1 = vpop.f32.mrb[1].mxu0  ;;  %v3651_v2 = vpop.f32.mrb[5].mxu1  ;;  %v306_v5 = vadd.f32 %v3487_v62, %v305_v63  ;;  %v387_v6 = vadd.f32 %v3491_v53, %v386_v0 }
 0x254   :  { %v308_v3 = vpop.f32.mrb[2].mxu0  ;;  %v389_v4 = vpop.f32.mrb[6].mxu1 }
 0x255   :  { %v309_v7 = vadd.f32 %v3487_v62, %v308_v3  ;;  %v390_v8 = vadd.f32 %v3491_v53, %v389_v4  ;;  %v3640_v9 = vpop.f32.mrb[3].mxu0  ;;  %v3652_v10 = vpop.f32.mrb[7].mxu1 }
 0x257   :  { %v4166_v11 = vpack.c.bf16 %v309_v7, %v306_v5  ;;  %v4168_v12 = vpack.c.bf16 %v390_v8, %v387_v6 }
 0x259   :  { %705 = vrot.lane.b32.xlu1 %v4168_v12, %s3981_s22  ;;  %699 = vrot.lane.b32.xlu0 %v4168_v12, %s3980_s18  ;;  %v735_v38 = vshrl.u32 %v4168_v12, 16  ;;  %v416_v33 = vshrl.u32 %v4166_v11, 16 }
 0x25a   :  { %v394_v13 = vpop.f32.mrb[8].mxu1 }
 0x25b   :  { %v3655_v14 = vpop.f32.mrb[9].mxu1  ;;  %v395_v18 = vadd.f32 %v3491_v53, %v394_v13 }
 0x25c   :  { %v397_v15 = vpop.f32.mrb[10].mxu1 }
 0x25d   :  { %v398_v19 = vadd.f32 %v3491_v53, %v397_v15  ;;  %711 = vrot.lane.b32.xlu0 %v4168_v12, %s3982_s23  ;;  %v3656_v20 = vpop.f32.mrb[11].mxu1 }
 0x25f   :  { %v4174_v21 = vpack.c.bf16 %v398_v19, %v395_v18 }
 0x261   :  { %709 = vrot.lane.b32.xlu0 %v4159_v61, %s3982_s23  ;;  %701 = vrot.lane.b32.xlu1 %v4174_v21, %s3980_s18 }
 0x265   :  { %408 = vrot.lane.b32.xlu0 %v4166_v11, %s3981_s22  ;;  %707 = vrot.lane.b32.xlu1 %v4174_v21, %s3981_s22 }
 0x269   :  { %713 = vrot.lane.b32.xlu1 %v4174_v21, %s3982_s23 }
 0x26d   :  { %703 = vrot.lane.b32.xlu1 %v4159_v61, %s3981_s22 }
 0x271   :  { %406 = vrot.lane.b32.xlu1 %v4166_v11, %s3980_s18 }
 0x275   :  { %410 = vrot.lane.b32.xlu1 %v4166_v11, %s3982_s23 }
 0x2c3   :  { %v4186_v22 = vpop.permute.xlu0 %697 }
 0x2c4   :  { %v720_v24 = vshrl.u32 %v4186_v22, 16  ;;  %v717_v51 = vpack.i.b16 %v4186_v22, %v4159_v61 }
 0x2c6   :  { %v721_v58 = vpack.i.b16 %v720_v24, %v719_v35  ;;  %v763_v7 = vcombine.high %v717_v51, %v4193_v36  ;;  %v4244_v28 = vrot.slane %v717_v51, %v4202_v41 }
 0x2c8   :  { %v829_v13 = vcombine.high %v721_v58, %v4193_v36  ;;  %v4251_v16 = vrot.slane %v763_v7, %v4202_v41 }
 0x2cb   :  { %v4188_v29 = vpop.permute.xlu0 %699  ;;  %v4195_v37 = vpop.permute.xlu1 %705 }
 0x2cc   :  { %v733_v31 = vpack.i.b16 %v4188_v29, %v4168_v12  ;;  %v736_v32 = vshrl.u32 %v4188_v29, 16  ;;  %v743_v45 = vshrl.u32 %v4195_v37, 16 }
 0x2ce   :  { %v895_v39 = vcombine.high %v733_v31, %v4193_v36  ;;  %v737_v42 = vpack.i.b16 %v736_v32, %v735_v38  ;;  %v902_v48 = vrot.slane %v733_v31, %v4202_v41  ;;  %v751_v31 = vshrl.u32 %v4174_v21, 16 }
 0x2cf   :  { %v4199_v40 = vpop.permute.xlu0 %711  ;;  %v4254_v38 = vrot.slane %v721_v58, %v4202_v41 }
 0x2d0   :  { %v741_v44 = vpack.i.b16 %v4199_v40, %v4195_v37  ;;  %v744_v46 = vshrl.u32 %v4199_v40, 16  ;;  %v909_v34 = vrot.slane %v895_v39, %v4202_v41  ;;  %v961_v54 = vcombine.high %v737_v42, %v4193_v36 }
 0x2d1   :  { %v968_v59 = vrot.slane %v737_v42, %v4202_v41 }
 0x2d2   :  { %v910_v17 = vcombine.high %v741_v44, %v4193_v36  ;;  %v917_v50 = vrot.slane %v741_v44, %v4202_v41  ;;  %v745_v52 = vpack.i.b16 %v744_v46, %v743_v45  ;;  %v975_v8 = vrot.slane %v961_v54, %v4202_v41 }
 0x2d3   :  { %v4219_v53 = vpop.permute.xlu1 %701  ;;  %v4241_v27 = vpop.permute.xlu0 %709  ;;  %v4257_v44 = vrot.slane %v829_v13, %v4202_v41 }
 0x2d4   :  { %v924_v56 = vrot.slane %v910_v17, %v4202_v41  ;;  %v925_v55 = vcombine.low %v902_v48, %v917_v50  ;;  %v926_v57 = vcombine.high %v902_v48, %v917_v50  ;;  %v976_v60 = vcombine.high %v745_v52, %v4193_v36 }
 0x2d5   :  { %v983_v62 = vrot.slane %v745_v52, %v4202_v41  ;;  %v749_v15 = vpack.i.b16 %v4219_v53, %v4174_v21  ;;  %v752_v18 = vshrl.u32 %v4219_v53, 16  ;;  %v728_v46 = vshrl.u32 %v4241_v27, 16 }
 0x2d6   :  { %v933_v63 = vrot.slane %v925_v55, %v4210_v47  ;;  %v940_v0 = vrot.slane %v926_v57, %v4210_v47  ;;  %v941_v1 = vcombine.low %v909_v34, %v924_v56  ;;  %v942_v2 = vcombine.high %v909_v34, %v924_v56 }
 0x2d7   :  { %v990_v3 = vrot.slane %v976_v60, %v4202_v41  ;;  %v991_v4 = vcombine.low %v968_v59, %v983_v62  ;;  %v992_v5 = vcombine.high %v968_v59, %v983_v62  ;;  %v4229_v6 = vpop.permute.xlu1 %707  ;;  %v753_v45 = vpack.i.b16 %v752_v18, %v751_v31 }
 0x2d8   :  { %v949_v9 = vrot.slane %v941_v1, %v4210_v47  ;;  %v956_v10 = vrot.slane %v942_v2, %v4210_v47  ;;  %v1259_v14 = vcombine.low %v933_v63, %v940_v0  ;;  %v3513_v26 = vcombine.high %v933_v63, %v940_v0 }
 0x2d9   :  { %v999_v19 = vrot.slane %v991_v4, %v4210_v47  ;;  %v1006_v20 = vrot.slane %v992_v5, %v4210_v47  ;;  %v1007_v23 = vcombine.low %v975_v8, %v990_v3  ;;  %v1008_v30 = vcombine.high %v975_v8, %v990_v3 }
 0x2da   :  { %v1275_v39 = vcombine.low %v949_v9, %v956_v10  ;;  %v3514_v42 = vcombine.high %v949_v9, %v956_v10  ;;  %v1266_v24 = vrot.slane %v1259_v14, %v4202_v41  ;;  %v1274_v17 = vrot.slane %v3513_v26, %v4202_v41 }
 0x2db   :  { %v4247_v32 = vpop.permute.xlu1 %713  ;;  %v4262_v48 = vrot.slane %v1007_v23, %v4210_v47  ;;  %v1309_v50 = vcombine.low %v999_v19, %v1006_v20  ;;  %v1027_v35 = vcombine.high %v749_v15, %v4193_v36  ;;  %v4267_v51 = vrot.slane %v1008_v30, %v4210_v47  ;;  %v4299_v30 = vpop.permute.xlu0 %408 }
 0x2dc   :  { %v759_v34 = vshrl.u32 %v4229_v6, 16  ;;  %v757_v52 = vpack.i.b16 %v4247_v32, %v4229_v6  ;;  %v760_v54 = vshrl.u32 %v4247_v32, 16  ;;  %v1282_v55 = vrot.slane %v1275_v39, %v4202_v41 }
 0x2dd   :  { %v1290_v57 = vrot.slane %v3514_v42, %v4202_v41  ;;  %v3515_v58 = vcombine.high %v999_v19, %v1006_v20  ;;  %v1034_v60 = vrot.slane %v749_v15, %v4202_v41  ;;  %v4283_v1 = vrot.slane %v1309_v50, %v4202_v41 }
 0x2de   :  { %v761_v62 = vpack.i.b16 %v760_v54, %v759_v34  ;;  %v1042_v63 = vcombine.high %v757_v52, %v4193_v36  ;;  %v1049_v0 = vrot.slane %v757_v52, %v4202_v41  ;;  %v1041_v2 = vrot.slane %v1027_v35, %v4202_v41 }
 0x2df   :  { %v4273_v56 = vpop.permute.xlu1 %703  ;;  %v1093_v3 = vcombine.high %v753_v45, %v4193_v36  ;;  %v1100_v10 = vrot.slane %v753_v45, %v4202_v41  ;;  %v4297_v26 = vrot.slane %v3515_v58, %v4202_v41  ;;  %v1291_v42 = vcombine.low %v1266_v24, %v1274_v17 }
 0x2e0   :  { %v725_v59 = vpack.i.b16 %v4241_v27, %v4273_v56  ;;  %v1056_v5 = vrot.slane %v1042_v63, %v4202_v41  ;;  %v1057_v7 = vcombine.low %v1034_v60, %v1049_v0  ;;  %v1058_v8 = vcombine.high %v1034_v60, %v1049_v0 }
 0x2e1   :  { %v1108_v13 = vcombine.high %v761_v62, %v4193_v36  ;;  %v1115_v14 = vrot.slane %v761_v62, %v4202_v41  ;;  %v727_v15 = vshrl.u32 %v4273_v56, 16  ;;  %v1325_v45 = vcombine.low %v4262_v48, %v4267_v51 }
 0x2e2   :  { %v778_v4 = vcombine.high %v725_v59, %v4193_v36  ;;  %v785_v9 = vrot.slane %v725_v59, %v4202_v41  ;;  %v1065_v18 = vrot.slane %v1057_v7, %v4210_v47  ;;  %v1072_v19 = vrot.slane %v1058_v8, %v4210_v47 }
 0x2e3   :  { %v1073_v20 = vcombine.low %v1041_v2, %v1056_v5  ;;  %v1074_v23 = vcombine.high %v1041_v2, %v1056_v5  ;;  %v1123_v31 = vcombine.low %v1100_v10, %v1115_v14  ;;  %v1124_v39 = vcombine.high %v1100_v10, %v1115_v14  ;;  %v407_v34 = vpop.permute.xlu1 %406 }
 0x2e4   :  { %v792_v50 = vrot.slane %v778_v4, %v4202_v41  ;;  %v793_v35 = vcombine.low %v4244_v28, %v785_v9  ;;  %v1299_v52 = vcombine.low %v1282_v55, %v1290_v57  ;;  %v1122_v58 = vrot.slane %v1108_v13, %v4202_v41 }
 0x2e5   :  { %v1081_v54 = vrot.slane %v1073_v20, %v4210_v47  ;;  %v1088_v59 = vrot.slane %v1074_v23, %v4210_v47  ;;  %v1359_v60 = vcombine.low %v1065_v18, %v1072_v19  ;;  %v3516_v62 = vcombine.high %v4262_v48, %v4267_v51 }
 0x2e6   :  { %v1107_v24 = vrot.slane %v1093_v3, %v4202_v41  ;;  %v424_v17 = vshrl.u32 %v4299_v30, 16  ;;  %v729_v63 = vpack.i.b16 %v728_v46, %v727_v15  ;;  %v4313_v0 = vrot.slane %v1123_v31, %v4210_v47 }
 0x2e7   :  { %v4316_v55 = vrot.slane %v1124_v39, %v4210_v47  ;;  %v794_v57 = vcombine.high %v4244_v28, %v785_v9  ;;  %v4320_v2 = vrot.slane %v1291_v42, %v4210_v47  ;;  %v3517_v4 = vcombine.high %v1065_v18, %v1072_v19  ;;  %v411_v18 = vpop.permute.xlu1 %410 }
 0x2e8   :  { %v801_v5 = vrot.slane %v793_v35, %v4210_v47  ;;  %v809_v7 = vcombine.low %v4251_v16, %v792_v50  ;;  %v4325_v3 = vrot.slane %v1299_v52, %v4210_v47  ;;  %v1139_v46 = vcombine.low %v1107_v24, %v1122_v58 }
 0x2e9   :  { %v1140_v8 = vcombine.high %v1107_v24, %v1122_v58  ;;  %v4328_v10 = vrot.slane %v1359_v60, %v4202_v41  ;;  %v1375_v13 = vcombine.low %v1081_v54, %v1088_v59  ;;  %v3518_v14 = vcombine.high %v1081_v54, %v1088_v59 }
 0x2ea   :  { %v810_v28 = vcombine.high %v4251_v16, %v792_v50  ;;  %v844_v9 = vcombine.high %v729_v63, %v4193_v36  ;;  %v851_v15 = vrot.slane %v729_v63, %v4202_v41  ;;  %v1409_v19 = vcombine.low %v4313_v0, %v4316_v55 }
 0x2eb   :  { %v808_v20 = vrot.slane %v794_v57, %v4210_v47  ;;  %v414_v23 = vpack.i.b16 %v407_v34, %v4166_v11  ;;  %v417_v31 = vshrl.u32 %v407_v34, 16  ;;  %v817_v39 = vrot.slane %v809_v7, %v4210_v47 }
 0x2ec   :  { %v824_v42 = vrot.slane %v810_v28, %v4210_v47  ;;  %v859_v35 = vcombine.low %v4254_v38, %v851_v15  ;;  %v860_v16 = vcombine.high %v4254_v38, %v851_v15  ;;  %v4342_v50 = vrot.slane %v1139_v46, %v4210_v47 }
 0x2ed   :  { %v4345_v52 = vrot.slane %v1140_v8, %v4210_v47  ;;  %v4348_v54 = vrot.slane %v3517_v4, %v4202_v41  ;;  %v422_v59 = vpack.i.b16 %v411_v18, %v4299_v30  ;;  %v4352_v34 = vrot.slane %v1375_v13, %v4202_v41 }
 0x2ee   :  { %v3519_v58 = vcombine.high %v4313_v0, %v4316_v55  ;;  %v858_v60 = vrot.slane %v844_v9, %v4202_v41  ;;  %v434_v38 = vcombine.high %v414_v23, %v4193_v36  ;;  %v4359_v24 = vrot.slane %v3518_v14, %v4202_v41 }
 0x2ef   :  { %v867_v63 = vrot.slane %v859_v35, %v4210_v47  ;;  %v874_v57 = vrot.slane %v860_v16, %v4210_v47  ;;  %v418_v30 = vpack.i.b16 %v417_v31, %v416_v33  ;;  %v4366_v4 = vrot.slane %v1409_v19, %v4202_v41 }
 0x2f0   :  { %v1159_v7 = vcombine.low %v801_v5, %v808_v20  ;;  %v1175_v46 = vcombine.low %v817_v39, %v824_v42  ;;  %v3510_v0 = vcombine.high %v817_v39, %v824_v42  ;;  %v3509_v55 = vcombine.high %v801_v5, %v808_v20 }
 0x2f1   :  { %v441_v8 = vrot.slane %v414_v23, %v4202_v41  ;;  %v425_v13 = vshrl.u32 %v411_v18, 16  ;;  %v449_v14 = vcombine.high %v422_v59, %v4193_v36  ;;  %v875_v28 = vcombine.low %v4257_v44, %v858_v60 }
 0x2f2   :  { %v876_v9 = vcombine.high %v4257_v44, %v858_v60  ;;  %v448_v15 = vrot.slane %v434_v38, %v4202_v41  ;;  %v456_v11 = vrot.slane %v422_v59, %v4202_v41  ;;  %v1209_v33 = vcombine.low %v867_v63, %v874_v57 }
 0x2f3   :  { %v500_v19 = vcombine.high %v418_v30, %v4193_v36  ;;  %v426_v31 = vpack.i.b16 %v425_v13, %v424_v17  ;;  %v463_v39 = vrot.slane %v449_v14, %v4202_v41  ;;  %v3511_v5 = vcombine.high %v867_v63, %v874_v57 }
 0x2f4   :  { %v507_v20 = vrot.slane %v418_v30, %v4202_v41  ;;  %v1182_v18 = vrot.slane %v1175_v46, %v4202_v41  ;;  %v1190_v23 = vrot.slane %v3510_v0, %v4202_v41  ;;  %v464_v59 = vcombine.low %v441_v8, %v456_v11 }
 0x2f5   :  { %v480_v42 = vcombine.low %v448_v15, %v463_v39  ;;  %v481_v35 = vcombine.high %v448_v15, %v463_v39  ;;  %v515_v44 = vcombine.high %v426_v31, %v4193_v36  ;;  %v522_v16 = vrot.slane %v426_v31, %v4202_v41 }
 0x2f6   :  { %v465_v60 = vcombine.high %v441_v8, %v456_v11  ;;  %v1166_v38 = vrot.slane %v1159_v7, %v4202_v41  ;;  %v1174_v17 = vrot.slane %v3509_v55, %v4202_v41  ;;  %v514_v63 = vrot.slane %v500_v19, %v4202_v41 }
 0x2f7   :  { %v488_v57 = vrot.slane %v480_v42, %v4210_v47  ;;  %v495_v30 = vrot.slane %v481_v35, %v4210_v47  ;;  %v529_v46 = vrot.slane %v515_v44, %v4202_v41  ;;  %v4388_v0 = vrot.slane %v3519_v58, %v4202_v41 }
 0x2f8   :  { %v530_v13 = vcombine.low %v507_v20, %v522_v16  ;;  %v531_v14 = vcombine.high %v507_v20, %v522_v16  ;;  %v1199_v15 = vcombine.low %v1182_v18, %v1190_v23  ;;  %v883_v8 = vrot.slane %v875_v28, %v4210_v47 }
 0x2f9   :  { %v890_v7 = vrot.slane %v876_v9, %v4210_v47  ;;  %v546_v11 = vcombine.low %v514_v63, %v529_v46  ;;  %v547_v55 = vcombine.high %v514_v63, %v529_v46  ;;  %v472_v19 = vrot.slane %v464_v59, %v4210_v47 }
 0x2fa   :  { %v479_v31 = vrot.slane %v465_v60, %v4210_v47  ;;  %v1191_v39 = vcombine.low %v1166_v38, %v1174_v17  ;;  %v1216_v42 = vrot.slane %v1209_v33, %v4202_v41  ;;  %v582_v44 = vcombine.low %v488_v57, %v495_v30 }
 0x2fb   :  { %v554_v35 = vrot.slane %v546_v11, %v4210_v47  ;;  %v561_v58 = vrot.slane %v547_v55, %v4210_v47  ;;  %v1224_v20 = vrot.slane %v3511_v5, %v4202_v41  ;;  %v538_v28 = vrot.slane %v530_v13, %v4210_v47 }
 0x2fc   :  { %v545_v9 = vrot.slane %v531_v14, %v4210_v47  ;;  %v3498_v18 = vcombine.high %v488_v57, %v495_v30  ;;  %v4401_v23 = vrot.slane %v1199_v15, %v4210_v47  ;;  %v1425_v16 = vcombine.low %v4342_v50, %v4345_v52 }
 0x2fd   :  { %v3520_v33 = vcombine.high %v4342_v50, %v4345_v52  ;;  %v1225_v59 = vcombine.low %v883_v8, %v890_v7  ;;  %v3512_v60 = vcombine.high %v883_v8, %v890_v7  ;;  %v566_v38 = vcombine.low %v472_v19, %v479_v31 }
 0x2fe   :  { %v632_v17 = vcombine.low %v554_v35, %v561_v58  ;;  %v3500_v63 = vcombine.high %v554_v35, %v561_v58  ;;  %v4408_v5 = vrot.slane %v1191_v39, %v4210_v47  ;;  %v3497_v46 = vcombine.high %v472_v19, %v479_v31 }
 0x2ff   :  { %v589_v57 = vrot.slane %v582_v44, %v4202_v41  ;;  %v1232_v30 = vrot.slane %v1225_v59, %v4202_v41  ;;  %v1240_v13 = vrot.slane %v3512_v60, %v4202_v41  ;;  %v597_v14 = vrot.slane %v3498_v18, %v4202_v41 }
 0x300   :  { %v616_v15 = vcombine.low %v538_v28, %v545_v9  ;;  %v4416_v50 = vcombine.low %v4408_v5, %v4401_v23  ;;  %v1241_v52 = vcombine.low %v1216_v42, %v1224_v20  ;;  %v3499_v8 = vcombine.high %v538_v28, %v545_v9 }
 0x301   :  { %v1249_v7 = vcombine.low %v1232_v30, %v1240_v13  ;;  %v1332_v11 = vrot.slane %v1325_v45, %v4202_v41  ;;  %v1340_v55 = vrot.slane %v3516_v62, %v4202_v41  ;;  %v639_v19 = vrot.slane %v632_v17, %v4202_v41 }
 0x302   :  { %v647_v31 = vrot.slane %v3500_v63, %v4202_v41  ;;  %v4429_v39 = vrot.slane %v1241_v52, %v4210_v47  ;;  %v1341_v42 = vcombine.low %v4283_v1, %v4297_v26  ;;  %v1399_v45 = vcombine.low %v4352_v34, %v4359_v24 }
 0x303   :  { %v4434_v35 = vrot.slane %v1249_v7, %v4210_v47  ;;  %v1349_v58 = vcombine.low %v1332_v11, %v1340_v55  ;;  %v1432_v48 = vrot.slane %v1425_v16, %v4202_v41  ;;  %v623_v51 = vrot.slane %v616_v15, %v4202_v41 }
 0x304   :  { %v1391_v62 = vcombine.low %v4328_v10, %v4348_v54  ;;  %v1440_v44 = vrot.slane %v3520_v33, %v4202_v41  ;;  %v1441_v20 = vcombine.low %v4366_v4, %v4388_v0  ;;  %v631_v1 = vrot.slane %v3499_v8, %v4202_v41 }
 0x305   :  { %v1257_v26 = vcombine.low %v4429_v39, %v4434_v35  ;;  %v4449_v28 = vrot.slane %v1341_v42, %v4210_v47  ;;  %v4452_v34 = vrot.slane %v1349_v58, %v4210_v47  ;;  %v573_v24 = vrot.slane %v566_v38, %v4202_v41 }
 0x306   :  { %v581_v10 = vrot.slane %v3497_v46, %v4202_v41  ;;  %v4457_v54 = vrot.slane %v1399_v45, %v4210_v47  ;;  %v1449_v9 = vcombine.low %v1432_v48, %v1440_v44  ;;  %v656_v4 = vcombine.low %v639_v19, %v647_v31 }
 0x307   :  { %v1461_v0 = vpack.i.b16 %v1257_v26, %v4416_v50  ;;  %v1307_v18 = vcombine.low %v4320_v2, %v4325_v3  ;;  %v1357_v16 = vcombine.low %v4449_v28, %v4452_v34  ;;  %v4465_v33 = vrot.slane %v1391_v62, %v4210_v47 }
 0x308   :  { %v1448_v59 = vrot.slane %v1441_v20, %v4210_v47  ;;  %v1456_v60 = vrot.slane %v1449_v9, %v4210_v47  ;;  %v606_v38 = vcombine.low %v589_v57, %v597_v14  ;;  %v648_v17 = vcombine.low %v623_v51, %v631_v1 }
 0x309   :  { %v2354_v63 = vsel %vm2349_vm2, %v1461_v0, 0  ;;  %v1473_v46 = vpack.i.b16 %v1357_v16, %v1307_v18  ;;  %v1407_v30 = vcombine.low %v4465_v33, %v4457_v54  ;;  %v598_v15 = vcombine.low %v573_v24, %v581_v10 }
 0x30a   :  { %3658 = vmatpush3.bf16.xpose.msra.mxu0 %v2354_v63  ;;  %v1457_v13 = vcombine.low %v1448_v59, %v1456_v60  ;;  %v4474_v52 = vrot.slane %v656_v4, %v4210_v47  ;;  %v4477_v7 = vrot.slane %v606_v38, %v4210_v47  ;;  %v4480_v57 = vrot.slane %v648_v17, %v4210_v47 }
 0x30b   :  { %3659 = vmatprep.subr.bf16.mxu0 %v3977_v43  ;;  %v3533_v14 = vcombine.low %v1473_v46, %v1473_v46  ;;  %v1498_v11 = vunpack.c.h.b16 %v1473_v46  ;;  %v4483_v19 = vrot.slane %v598_v15, %v4210_v47  ;;  %v1463_v48 = vshrl.u32 %v1257_v26, 16 }
 0x30c   :  { %v1485_v8 = vpack.i.b16 %v1457_v13, %v1407_v30  ;;  %v664_v31 = vcombine.low %v4480_v57, %v4474_v52  ;;  %v1487_v62 = vshrl.u32 %v1457_v13, 16  ;;  %v1462_v20 = vshrl.u32 %v4416_v50, 16 }
 0x30d   :  { %v2357_v58 = vsel %vm2349_vm2, %v3533_v14, 0  ;;  %v614_v45 = vcombine.low %v4483_v19, %v4477_v7  ;;  %v1475_v1 = vshrl.u32 %v1357_v16, 16  ;;  %v1486_v24 = vshrl.u32 %v1407_v30, 16 }
 0x30e   :  { %v1499_v55 = vunpack.c.l.b16 %v1485_v8  ;;  %v1464_v10 = vpack.i.b16 %v1463_v48, %v1462_v20  ;;  %v3535_v9 = vcombine.high %v1485_v8, %v1485_v8  ;;  %v1474_v4 = vshrl.u32 %v1307_v18, 16 }
 0x30f   :  { %v668_v44 = vpack.i.b16 %v664_v31, %v614_v45  ;;  %v1488_v0 = vpack.i.b16 %v1487_v62, %v1486_v24  ;;  %v670_v30 = vshrl.u32 %v664_v31, 16  ;;  %v669_v8 = vshrl.u32 %v614_v45, 16 }
 0x310   :  { %v2399_v42 = vpack.c.b16 %v1499_v55, %v1498_v11  ;;  %v1476_v26 = vpack.i.b16 %v1475_v1, %v1474_v4  ;;  %v2456_v17 = vsel %vm2349_vm2, %v1464_v10, 0  ;;  %v2408_v63 = vsel %vm2349_vm2, %v3535_v9, 0 }
 0x311   :  { %v3501_v38 = vcombine.low %v668_v44, %v668_v44  ;;  %v1505_v46 = vunpack.c.l.b16 %v1488_v0  ;;  %v3502_v13 = vcombine.high %v668_v44, %v668_v44  ;;  %v1258_v14 = vcombine.high %v4429_v39, %v4434_v35 }
 0x312   :  { %v2405_v51 = vsel %vm2349_vm2, %v2399_v42, 0  ;;  %3660 = vmatpush3.bf16.xpose.msra.mxu0 %v2357_v58  ;;  %v1504_v50 = vunpack.c.h.b16 %v1476_v26  ;;  %v3537_v18 = vcombine.low %v1476_v26, %v1476_v26  ;;  %v1458_v55 = vcombine.high %v1448_v59, %v1456_v60 }
 0x313   :  { %3666 = vmatpush3.bf16.xpose.msra.mxu1 %v2405_v51  ;;  %3673 = vmatprep.subr.bf16.mxu0 %v3977_v43  ;;  %v671_v42 = vpack.i.b16 %v670_v30, %v669_v8  ;;  %v1208_v31 = vcombine.high %v4408_v5, %v4401_v23  ;;  %v1358_v39 = vcombine.high %v4449_v28, %v4452_v34  ;;  %v1469_v20 = vshrl.u32 %v1258_v14, 16 }
 0x314   :  { %3667 = vmatprep.subr.bf16.mxu1 %v3977_v43  ;;  %v2501_v16 = vpack.c.b16 %v1505_v46, %v1504_v50  ;;  %v2459_v15 = vsel %vm2349_vm2, %v3537_v18, 0  ;;  %v1408_v35 = vcombine.high %v4465_v33, %v4457_v54  ;;  %v3539_v59 = vcombine.high %v1488_v0, %v1488_v0 }
 0x315   :  { %v1467_v58 = vpack.i.b16 %v1258_v14, %v1208_v31  ;;  %v1308_v60 = vcombine.high %v4320_v2, %v4325_v3  ;;  %v3503_v48 = vcombine.low %v671_v42, %v671_v42  ;;  %v665_v34 = vcombine.high %v4480_v57, %v4474_v52 }
 0x316   :  { %v2507_v11 = vsel %vm2349_vm2, %v2501_v16, 0  ;;  %v1491_v45 = vpack.i.b16 %v1458_v55, %v1408_v35  ;;  %v2510_v5 = vsel %vm2349_vm2, %v3539_v59, 0  ;;  %v3504_v54 = vcombine.high %v671_v42, %v671_v42 }
 0x317   :  { %v1479_v51 = vpack.i.b16 %v1358_v39, %v1308_v60  ;;  %v2558_v23 = vsel %vm2349_vm2, %v1467_v58, 0  ;;  %v615_v44 = vcombine.high %v4483_v19, %v4477_v7  ;;  %v1493_v24 = vshrl.u32 %v1458_v55, 16 }
 0x318   :  { %v1511_v62 = vunpack.c.l.b16 %v1491_v45  ;;  %v1468_v9 = vshrl.u32 %v1208_v31, 16  ;;  %v1481_v52 = vshrl.u32 %v1358_v39, 16  ;;  %v1492_v57 = vshrl.u32 %v1408_v35, 16 }
 0x319   :  { %3662 = vmatmul.mubr.msk.bf16.vlgmr.msra.gmra.mrb[4].mxu0 %vm2349_vm2, %v3501_v38  ;;  %v1510_v2 = vunpack.c.h.b16 %v1479_v51  ;;  %v3541_v3 = vcombine.low %v1479_v51, %v1479_v51  ;;  %v674_v10 = vpack.i.b16 %v665_v34, %v615_v44  ;;  %v3543_v19 = vcombine.high %v1491_v45, %v1491_v45 }
 0x31a   :  { %3674 = vmatpush3.bf16.xpose.msra.mxu0 %v2456_v17  ;;  %3677 = vmatprep.mubr.msk.bf16.mxu0 %vm3978_vm1, %v3977_v43  ;;  %v1470_v7 = vpack.i.b16 %v1469_v20, %v1468_v9  ;;  %v1480_v4 = vshrl.u32 %v1308_v60, 16  ;;  %v1494_v0 = vpack.i.b16 %v1493_v24, %v1492_v57  ;;  %v676_v30 = vshrl.u32 %v665_v34, 16 }
 0x31b   :  { %3668 = vmatpush3.bf16.xpose.msra.mxu1 %v2408_v63  ;;  %3675 = vmatprep.subr.bf16.mxu0 %v3977_v43  ;;  %v2603_v28 = vpack.c.b16 %v1511_v62, %v1510_v2  ;;  %v2561_v33 = vsel %vm2349_vm2, %v3541_v3, 0  ;;  %v3505_v38 = vcombine.low %v674_v10, %v674_v10  ;;  %v2612_v63 = vsel %vm2349_vm2, %v3543_v19, 0 }
 0x31c   :  { %3681 = vmatprep.subr.bf16.mxu1 %v3977_v43  ;;  %v1482_v26 = vpack.i.b16 %v1481_v52, %v1480_v4  ;;  %v2660_v17 = vsel %vm2349_vm2, %v1470_v7, 0  ;;  %v1517_v46 = vunpack.c.l.b16 %v1494_v0  ;;  %v675_v8 = vshrl.u32 %v615_v44, 16 }
 0x31d   :  { %v2609_v1 = vsel %vm2349_vm2, %v2603_v28, 0  ;;  %v3547_v55 = vcombine.high %v1494_v0, %v1494_v0 }
 0x31e   :  { %v1516_v50 = vunpack.c.h.b16 %v1482_v26  ;;  %v3545_v18 = vcombine.low %v1482_v26, %v1482_v26 }
 0x31f   :  { %v2714_v31 = vsel %vm2349_vm2, %v3547_v55, 0 }
 0x320   :  { %v2705_v16 = vpack.c.b16 %v1517_v46, %v1516_v50 }
 0x322   :  { %3670 = vmatmul.mubr.msk.bf16.vlgmr.msra.gmra.mrb[12].mxu1 %vm2349_vm2, %v3502_v13  ;;  %3676 = vmatpush3.bf16.xpose.msra.mxu0 %v2459_v15  ;;  %v3506_v13 = vcombine.high %v674_v10, %v674_v10  ;;  %v2663_v15 = vsel %vm2349_vm2, %v3545_v18, 0  ;;  %v2711_v14 = vsel %vm2349_vm2, %v2705_v16, 0 }
 0x323   :  { %3682 = vmatpush3.bf16.xpose.msra.mxu1 %v2507_v11  ;;  %3685 = vmatprep.mubr.msk.bf16.mxu1 %vm3978_vm1, %v3977_v43  ;;  %v677_v11 = vpack.i.b16 %v676_v30, %v675_v8 }
 0x324   :  { %3683 = vmatprep.subr.bf16.mxu1 %v3977_v43  ;;  %3689 = vmatprep.subr.bf16.mxu0 %v3977_v43 }
 0x325   :  { %v3507_v42 = vcombine.low %v677_v11, %v677_v11  ;;  %v3508_v39 = vcombine.high %v677_v11, %v677_v11 }
 0x329   :  { %3678 = vmatmul.mubr.msk.bf16.vlgmr.msra.gmra.mrb[8].mxu0 %vm2349_vm2, %v3503_v48 }
 0x32a   :  { %3690 = vmatpush3.bf16.xpose.msra.mxu0 %v2558_v23  ;;  %3693 = vmatprep.mubr.msk.bf16.mxu0 %vm3978_vm1, %v3977_v43 }
 0x32b   :  { %3684 = vmatpush3.bf16.xpose.msra.mxu1 %v2510_v5  ;;  %3691 = vmatprep.subr.bf16.mxu0 %v3977_v43 }
 0x32c   :  { %3697 = vmatprep.subr.bf16.mxu1 %v3977_v43 }
 0x332   :  { %3686 = vmatmul.mubr.msk.bf16.vlgmr.msra.gmra.mrb[16].mxu1 %vm2349_vm2, %v3504_v54  ;;  %3692 = vmatpush3.bf16.xpose.msra.mxu0 %v2561_v33 }
 0x333   :  { %3698 = vmatpush3.bf16.xpose.msra.mxu1 %v2609_v1  ;;  %3701 = vmatprep.mubr.msk.bf16.mxu1 %vm3978_vm1, %v3977_v43 }
 0x334   :  { %3699 = vmatprep.subr.bf16.mxu1 %v3977_v43  ;;  %3705 = vmatprep.subr.bf16.mxu0 %v3977_v43 }
 0x339   :  { %3694 = vmatmul.mubr.msk.bf16.vlgmr.msra.gmra.mrb[12].mxu0 %vm2349_vm2, %v3505_v38 }
 0x33a   :  { %3706 = vmatpush3.bf16.xpose.msra.mxu0 %v2660_v17  ;;  %3709 = vmatprep.mubr.msk.bf16.mxu0 %vm3978_vm1, %v3977_v43 }
 0x33b   :  { %3700 = vmatpush3.bf16.xpose.msra.mxu1 %v2612_v63  ;;  %3707 = vmatprep.subr.bf16.mxu0 %v3977_v43 }
 0x33c   :  { %3713 = vmatprep.subr.bf16.mxu1 %v3977_v43 }
 0x342   :  { %3702 = vmatmul.mubr.msk.bf16.vlgmr.msra.gmra.mrb[20].mxu1 %vm2349_vm2, %v3506_v13  ;;  %3708 = vmatpush3.bf16.xpose.msra.mxu0 %v2663_v15 }
 0x343   :  { %3714 = vmatpush3.bf16.xpose.msra.mxu1 %v2711_v14  ;;  %3717 = vmatprep.mubr.msk.bf16.mxu1 %vm3978_vm1, %v3977_v43 }
 0x344   :  { %3715 = vmatprep.subr.bf16.mxu1 %v3977_v43  ;;  %3721 = vmatprep.subr.bf16.mxu0 %v3977_v43 }
 0x349   :  { %3710 = vmatmul.mubr.msk.bf16.vlgmr.msra.gmra.mrb[16].mxu0 %vm2349_vm2, %v3507_v42 }
 0x34a   :  { %3725 = vmatprep.mubr.msk.bf16.mxu0 %vm3978_vm1, %v3977_v43 }
 0x34b   :  { %3716 = vmatpush3.bf16.xpose.msra.mxu1 %v2714_v31 }
 0x34c   :  { %3737 = vmatprep.subr.bf16.mxu1 %v3977_v43 }
 0x352   :  { %3718 = vmatmul.mubr.msk.bf16.vlgmr.msra.gmra.mrb[24].mxu1 %vm2349_vm2, %v3508_v39 }
 0x353   :  { %3741 = vmatprep.mubr.msk.bf16.mxu1 %vm3978_vm1, %v3977_v43 }
 0x3ec   :  { %v2393_v35 = vpop.f32.mrb[4].mxu0 }
 0x3ed   :  { %v3663_v58 = vpop.f32.mrb[5].mxu0  ;;  %v2757_v59 = vsel %vm2756_vm3, %v2393_v35, -inf }
 0x3ee   :  { %2758 = vmax.xlane.f32.xlu0 %v2757_v59  ;;  %v2396_v60 = vpop.f32.mrb[6].mxu0 }
 0x3ef   :  { %v3664_v45 = vpop.f32.mrb[7].mxu0 }
 0x3f5   :  { %v4559_v48 = vpop.f32.mrb[12].mxu1 }
 0x3f6   :  { %v3671_v51 = vpop.f32.mrb[13].mxu1  ;;  %v2760_v23 = vsel %vm2756_vm3, %v4559_v48, -inf }
 0x3f7   :  { %2761 = vmax.xlane.f32.xlu1 %v2760_v23  ;;  %v2447_v5 = vpop.f32.mrb[14].mxu1 }
 0x3f8   :  { %v3672_v62 = vpop.f32.mrb[15].mxu1 }
 0x3fc   :  { %v2495_v2 = vpop.f32.mrb[8].mxu0 }
 0x3fd   :  { %v3679_v3 = vpop.f32.mrb[9].mxu0  ;;  %v2763_v28 = vsel %vm2756_vm3, %v2495_v2, -inf }
 0x3fe   :  { %2764 = vmax.xlane.f32.xlu0 %v2763_v28  ;;  %v2498_v34 = vpop.f32.mrb[10].mxu0 }
 0x3ff   :  { %v3680_v54 = vpop.f32.mrb[11].mxu0 }
 0x405   :  { %v4564_v33 = vpop.f32.mrb[16].mxu1 }
 0x406   :  { %v3687_v44 = vpop.f32.mrb[17].mxu1  ;;  %v2766_v7 = vsel %vm2756_vm3, %v4564_v33, -inf }
 0x407   :  { %v2549_v20 = vpop.f32.mrb[18].mxu1 }
 0x408   :  { %1525 = vrot.lane.b32.xlu1 %v4186_v22, %s3986_s24  ;;  %v3688_v1 = vpop.f32.mrb[19].mxu1 }
 0x40c   :  { %1531 = vrot.lane.b32.xlu1 %v4273_v56, %s3986_s24  ;;  %v4570_v24 = vpop.f32.mrb[12].mxu0 }
 0x40d   :  { %v3695_v10 = vpop.f32.mrb[13].mxu0  ;;  %v2769_v9 = vsel %vm2756_vm3, %v4570_v24, -inf }
 0x40e   :  { %2770 = vmax.xlane.f32.xlu0 %v2769_v9  ;;  %v2600_v52 = vpop.f32.mrb[14].mxu0 }
 0x40f   :  { %v3696_v57 = vpop.f32.mrb[15].mxu0 }
 0x410   :  { %1537 = vrot.lane.b32.xlu1 %v4241_v27, %s3986_s24 }
 0x412   :  { %2767 = vmax.xlane.f32.xlu0 %v2766_v7 }
 0x414   :  { %1527 = vrot.lane.b32.xlu1 %v4188_v29, %s3986_s24 }
 0x415   :  { %v4580_v22 = vpop.f32.mrb[20].mxu1 }
 0x416   :  { %v3703_v56 = vpop.f32.mrb[21].mxu1  ;;  %v2772_v29 = vsel %vm2756_vm3, %v4580_v22, -inf }
 0x417   :  { %v2651_v19 = vpop.f32.mrb[22].mxu1 }
 0x418   :  { %v3704_v4 = vpop.f32.mrb[23].mxu1 }
 0x41c   :  { %v4582_v0 = vpop.f32.mrb[16].mxu0 }
 0x41d   :  { %v3711_v38 = vpop.f32.mrb[17].mxu0  ;;  %v2775_v18 = vsel %vm2756_vm3, %v4582_v0, -inf }
 0x41e   :  { %v2702_v26 = vpop.f32.mrb[18].mxu0 }
 0x41f   :  { %v3712_v17 = vpop.f32.mrb[19].mxu0 }
 0x425   :  { %v4584_v63 = vpop.f32.mrb[24].mxu1 }
 0x426   :  { %v3719_v27 = vpop.f32.mrb[25].mxu1 }
 0x427   :  { %v2753_v46 = vpop.f32.mrb[26].mxu1 }
 0x428   :  { %v3720_v50 = vpop.f32.mrb[27].mxu1  ;;  %1519 = vrot.lane.b32.xlu0 %v4159_v61, %s3986_s24  ;;  %v2778_v61 = vsel %vm2756_vm3, %v4584_v63, -inf }
 0x438   :  { %2773 = vmax.xlane.f32.xlu1 %v2772_v29 }
 0x447   :  { %2776 = vmax.xlane.f32.xlu0 %v2775_v18 }
 0x449   :  { %1539 = vrot.lane.b32.xlu1 %v4199_v40, %s3986_s24 }
 0x45d   :  { %1521 = vrot.lane.b32.xlu0 %v4168_v12, %s3986_s24 }
 0x461   :  { %1533 = vrot.lane.b32.xlu0 %v4195_v37, %s3986_s24 }
 0x46d   :  { %2779 = vmax.xlane.f32.xlu1 %v2778_v61 }
 0x47b   :  { %v2759_v16 = vpop.xlane.xlu0 %2758 }
 0x47c   :  { %v2781_v30 = vsub.f32 %v2393_v35, %v2759_v16 }
 0x47e   :  { %1523 = vrot.lane.b32.xlu1 %v4174_v21, %s3986_s24  ;;  %v2789_v13 = vmul.f32 1.442695, %v2781_v30 }
 0x480   :  { %3843 = vpow2.f32 %v2789_v13 }
 0x482   :  { %1529 = vrot.lane.b32.xlu1 %v4219_v53, %s3986_s24 }
 0x484   :  { %v2762_v37 = vpop.xlane.xlu1 %2761 }
 0x485   :  { %v2782_v53 = vsub.f32 %v4559_v48, %v2762_v37 }
 0x486   :  { %1535 = vrot.lane.b32.xlu1 %v4229_v6, %s3986_s24 }
 0x487   :  { %v2791_v55 = vmul.f32 1.442695, %v2782_v53 }
 0x488   :  { %v1526_v14 = vpop.permute.xlu1 %1525 }
 0x48a   :  { %v4606_v12 = vpop.eup %3843  ;;  %1541 = vrot.lane.b32.xlu1 %v4247_v32, %s3986_s24 }
 0x48b   :  { %v2765_v40 = vpop.xlane.xlu0 %2764  ;;  %v2805_v15 = vsel %vm2756_vm3, %v4606_v12, 0.0 }
 0x48c   :  { %v2783_v8 = vsub.f32 %v2495_v2, %v2765_v40  ;;  %2806 = vadd.xlane.f32.xlu0 %v2805_v15  ;;  %v1532_v11 = vpop.permute.xlu1 %1531  ;;  %v1548_v2 = vshrl.u32 %v1526_v14, 16 }
 0x48d   :  { %v1555_v45 = vshrl.u32 %v1532_v11, 16 }
 0x48e   :  { %v2793_v21 = vmul.f32 1.442695, %v2783_v8 }
 0x490   :  { %3845 = vpow2.f32 %v2793_v21  ;;  %v1538_v32 = vpop.permute.xlu1 %1537 }
 0x491   :  { %3847 = vpow2.f32 %v2791_v55  ;;  %v1553_v39 = vpack.i.b16 %v1538_v32, %v1532_v11  ;;  %v1556_v35 = vshrl.u32 %v1538_v32, 16 }
 0x493   :  { %v1557_v51 = vpack.i.b16 %v1556_v35, %v1555_v45  ;;  %v1606_v23 = vcombine.high %v1553_v39, %v4193_v36  ;;  %v1613_v54 = vrot.slane %v1553_v39, %v4202_v41 }
 0x495   :  { %v1620_v1 = vrot.slane %v1606_v23, %v4202_v41  ;;  %v1679_v7 = vrot.slane %v1557_v51, %v4202_v41 }
 0x49a   :  { %v4613_v6 = vpop.eup %3845 }
 0x49b   :  { %v2771_v42 = vpop.xlane.xlu0 %2770  ;;  %v2811_v31 = vsel %vm2756_vm3, %v4613_v6, 0.0  ;;  %v4620_v34 = vpop.eup %3847 }
 0x49c   :  { %2812 = vadd.xlane.f32.xlu0 %v2811_v31  ;;  %v2785_v58 = vsub.f32 %v4570_v24, %v2771_v42  ;;  %v1672_v24 = vcombine.high %v1557_v51, %v4193_v36  ;;  %v2808_v19 = vsel %vm2756_vm3, %v4620_v34, 0.0 }
 0x49e   :  { %v2797_v5 = vmul.f32 1.442695, %v2785_v58  ;;  %v1686_v27 = vrot.slane %v1672_v24, %v4202_v41 }
 0x49f   :  { %v2768_v59 = vpop.xlane.xlu0 %2767 }
 0x4a0   :  { %v2784_v60 = vsub.f32 %v4564_v33, %v2768_v59 }
 0x4a2   :  { %v2795_v48 = vmul.f32 1.442695, %v2784_v60 }
 0x4a3   :  { %v1520_v62 = vpop.permute.xlu0 %1519 }
 0x4a4   :  { %3849 = vpow2.f32 %v2795_v48  ;;  %v1545_v3 = vpack.i.b16 %v1526_v14, %v1520_v62  ;;  %v1547_v28 = vshrl.u32 %v1520_v62, 16 }
 0x4a5   :  { %3851 = vpow2.f32 %v2797_v5 }
 0x4a6   :  { %v1549_v44 = vpack.i.b16 %v1548_v2, %v1547_v28  ;;  %v1591_v20 = vcombine.high %v1545_v3, %v4193_v36  ;;  %v1598_v33 = vrot.slane %v1545_v3, %v4202_v41 }
 0x4a8   :  { %v1605_v10 = vrot.slane %v1591_v20, %v4202_v41  ;;  %v1621_v9 = vcombine.low %v1598_v33, %v1613_v54  ;;  %v1622_v52 = vcombine.high %v1598_v33, %v1613_v54  ;;  %v1657_v57 = vcombine.high %v1549_v44, %v4193_v36 }
 0x4a9   :  { %v1664_v56 = vrot.slane %v1549_v44, %v4202_v41 }
 0x4aa   :  { %v1629_v4 = vrot.slane %v1621_v9, %v4210_v47  ;;  %v1636_v38 = vrot.slane %v1622_v52, %v4210_v47  ;;  %v1637_v26 = vcombine.low %v1605_v10, %v1620_v1  ;;  %v1638_v17 = vcombine.high %v1605_v10, %v1620_v1 }
 0x4ab   :  { %v1671_v46 = vrot.slane %v1657_v57, %v4202_v41  ;;  %v1687_v50 = vcombine.low %v1664_v56, %v1679_v7  ;;  %v1688_v29 = vcombine.high %v1664_v56, %v1679_v7 }
 0x4ac   :  { %v1645_v18 = vrot.slane %v1637_v26, %v4210_v47  ;;  %v1652_v61 = vrot.slane %v1638_v17, %v4210_v47  ;;  %v1987_v16 = vcombine.low %v1629_v4, %v1636_v38  ;;  %v3521_v30 = vcombine.high %v1629_v4, %v1636_v38 }
 0x4ad   :  { %v1695_v13 = vrot.slane %v1687_v50, %v4210_v47  ;;  %v1702_v37 = vrot.slane %v1688_v29, %v4210_v47  ;;  %v1703_v40 = vcombine.low %v1671_v46, %v1686_v27  ;;  %v1704_v15 = vcombine.high %v1671_v46, %v1686_v27  ;;  %v1528_v27 = vpop.permute.xlu1 %1527 }
 0x4ae   :  { %v4641_v8 = vpop.eup %3849  ;;  %v1994_v21 = vrot.slane %v1987_v16, %v4202_v41  ;;  %v2002_v14 = vrot.slane %v3521_v30, %v4202_v41  ;;  %v2003_v53 = vcombine.low %v1645_v18, %v1652_v61  ;;  %v3522_v11 = vcombine.high %v1645_v18, %v1652_v61  ;;  %2809 = vadd.xlane.f32.xlu1 %v2808_v19 }
 0x4af   :  { %v1711_v55 = vrot.slane %v1703_v40, %v4210_v47  ;;  %v1718_v42 = vrot.slane %v1704_v15, %v4210_v47  ;;  %v2037_v31 = vcombine.low %v1695_v13, %v1702_v37  ;;  %v3523_v32 = vcombine.high %v1695_v13, %v1702_v37  ;;  %v4651_v60 = vpop.eup %3851 }
 0x4b0   :  { %v2010_v39 = vrot.slane %v2003_v53, %v4202_v41  ;;  %v2018_v35 = vrot.slane %v3522_v11, %v4202_v41  ;;  %v2814_v58 = vsel %vm2756_vm3, %v4641_v8, 0.0  ;;  %v2019_v59 = vcombine.low %v1994_v21, %v2002_v14 }
 0x4b1   :  { %v2044_v45 = vrot.slane %v2037_v31, %v4202_v41  ;;  %v2052_v48 = vrot.slane %v3523_v32, %v4202_v41  ;;  %v2053_v51 = vcombine.low %v1711_v55, %v1718_v42  ;;  %v3524_v23 = vcombine.high %v1711_v55, %v1718_v42  ;;  %2815 = vadd.xlane.f32.xlu0 %v2814_v58 }
 0x4b2   :  { %v2027_v5 = vcombine.low %v2010_v39, %v2018_v35  ;;  %v2817_v28 = vsel %vm2756_vm3, %v4651_v60, 0.0  ;;  %v2026_v54 = vrot.slane %v2019_v59, %v4210_v47  ;;  %v1564_v40 = vshrl.u32 %v1528_v27, 16 }
 0x4b3   :  { %v2060_v62 = vrot.slane %v2053_v51, %v4202_v41  ;;  %v2068_v2 = vrot.slane %v3524_v23, %v4202_v41  ;;  %v2069_v3 = vcombine.low %v2044_v45, %v2052_v48 }
 0x4b4   :  { %v2034_v44 = vrot.slane %v2027_v5, %v4210_v47 }
 0x4b5   :  { %2818 = vadd.xlane.f32.xlu0 %v2817_v28  ;;  %v2077_v20 = vcombine.low %v2060_v62, %v2068_v2  ;;  %v2076_v24 = vrot.slane %v2069_v3, %v4210_v47 }
 0x4b6   :  { %v2035_v33 = vcombine.low %v2026_v54, %v2034_v44  ;;  %v4661_v1 = vcombine.high %v2026_v54, %v2034_v44 }
 0x4b7   :  { %v2084_v10 = vrot.slane %v2077_v20, %v4210_v47 }
 0x4b8   :  { %v2290_v57 = vshrl.u32 %v2035_v33, 16  ;;  %v2296_v7 = vshrl.u32 %v4661_v1, 16 }
 0x4b9   :  { %v2085_v9 = vcombine.low %v2076_v24, %v2084_v10  ;;  %v4665_v52 = vcombine.high %v2076_v24, %v2084_v10 }
 0x4bb   :  { %v2289_v56 = vpack.i.b16 %v2085_v9, %v2035_v33  ;;  %v2291_v19 = vshrl.u32 %v2085_v9, 16  ;;  %v2295_v4 = vpack.i.b16 %v4665_v52, %v4661_v1  ;;  %v2297_v38 = vshrl.u32 %v4665_v52, 16 }
 0x4bd   :  { %3722 = vmatpush3.bf16.msra.mxu0 %v2289_v56  ;;  %v2292_v26 = vpack.i.b16 %v2291_v19, %v2290_v57  ;;  %v4671_v17 = vpack.i.b16 %v2297_v38, %v2296_v7 }
 0x4be   :  { %3723 = vmatprep.subr.bf16.mxu0 %v3977_v43 }
 0x4bf   :  { %3738 = vmatpush3.bf16.msra.mxu1 %v2292_v26 }
 0x4c0   :  { %3739 = vmatprep.subr.bf16.mxu1 %v3977_v43 }
 0x4c5   :  { %v2774_v46 = vpop.xlane.xlu1 %2773 }
 0x4c6   :  { %v2786_v50 = vsub.f32 %v4580_v22, %v2774_v46 }
 0x4c8   :  { %v2799_v29 = vmul.f32 1.442695, %v2786_v50 }
 0x4c9   :  { %v1540_v14 = vpop.permute.xlu1 %1539 }
 0x4ca   :  { %3853 = vpow2.f32 %v2799_v29  ;;  %v1572_v42 = vshrl.u32 %v1540_v14, 16 }
 0x4d4   :  { %v4676_v18 = vpop.eup %3853  ;;  %v2777_v61 = vpop.xlane.xlu0 %2776 }
 0x4d5   :  { %v2820_v16 = vsel %vm2756_vm3, %v4676_v18, 0.0  ;;  %v2787_v30 = vsub.f32 %v4582_v0, %v2777_v61 }
 0x4d6   :  { %2821 = vadd.xlane.f32.xlu0 %v2820_v16 }
 0x4d7   :  { %v2801_v13 = vmul.f32 1.442695, %v2787_v30 }
 0x4d8   :  { %v1522_v37 = vpop.permute.xlu0 %1521 }
 0x4d9   :  { %3855 = vpow2.f32 %v2801_v13  ;;  %v1561_v15 = vpack.i.b16 %v1528_v27, %v1522_v37  ;;  %v1563_v21 = vshrl.u32 %v1522_v37, 16 }
 0x4db   :  { %v1565_v53 = vpack.i.b16 %v1564_v40, %v1563_v21  ;;  %v1723_v11 = vcombine.high %v1561_v15, %v4193_v36  ;;  %v1730_v39 = vrot.slane %v1561_v15, %v4202_v41 }
 0x4dc   :  { %v1534_v22 = vpop.permute.xlu0 %1533 }
 0x4dd   :  { %v1569_v55 = vpack.i.b16 %v1540_v14, %v1534_v22  ;;  %v1789_v31 = vcombine.high %v1565_v53, %v4193_v36  ;;  %v1571_v32 = vshrl.u32 %v1534_v22, 16  ;;  %v1737_v59 = vrot.slane %v1723_v11, %v4202_v41 }
 0x4de   :  { %v1796_v23 = vrot.slane %v1565_v53, %v4202_v41 }
 0x4df   :  { %v1738_v0 = vcombine.high %v1569_v55, %v4193_v36  ;;  %v1745_v35 = vrot.slane %v1569_v55, %v4202_v41  ;;  %v1573_v58 = vpack.i.b16 %v1572_v42, %v1571_v32  ;;  %v1803_v5 = vrot.slane %v1789_v31, %v4202_v41 }
 0x4e1   :  { %v1752_v45 = vrot.slane %v1738_v0, %v4202_v41  ;;  %v1753_v48 = vcombine.low %v1730_v39, %v1745_v35  ;;  %v1754_v51 = vcombine.high %v1730_v39, %v1745_v35  ;;  %v1804_v62 = vcombine.high %v1573_v58, %v4193_v36 }
 0x4e2   :  { %v1811_v2 = vrot.slane %v1573_v58, %v4202_v41 }
 0x4e3   :  { %v4692_v3 = vpop.eup %3855  ;;  %v1761_v28 = vrot.slane %v1753_v48, %v4210_v47  ;;  %v1768_v54 = vrot.slane %v1754_v51, %v4210_v47  ;;  %v1769_v44 = vcombine.low %v1737_v59, %v1752_v45  ;;  %v1770_v20 = vcombine.high %v1737_v59, %v1752_v45 }
 0x4e4   :  { %v1818_v33 = vrot.slane %v1804_v62, %v4202_v41  ;;  %v1819_v24 = vcombine.low %v1796_v23, %v1811_v2  ;;  %v1820_v10 = vcombine.high %v1796_v23, %v1811_v2  ;;  %v2823_v9 = vsel %vm2756_vm3, %v4692_v3, 0.0 }
 0x4e5   :  { %v1777_v57 = vrot.slane %v1769_v44, %v4210_v47  ;;  %v1784_v7 = vrot.slane %v1770_v20, %v4210_v47  ;;  %v2087_v56 = vcombine.low %v1761_v28, %v1768_v54  ;;  %v3525_v19 = vcombine.high %v1761_v28, %v1768_v54  ;;  %2824 = vadd.xlane.f32.xlu0 %v2823_v9 }
 0x4e6   :  { %v1827_v38 = vrot.slane %v1819_v24, %v4210_v47  ;;  %v1834_v26 = vrot.slane %v1820_v10, %v4210_v47  ;;  %v1835_v27 = vcombine.low %v1803_v5, %v1818_v33  ;;  %v1836_v46 = vcombine.high %v1803_v5, %v1818_v33 }
 0x4e7   :  { %v2094_v50 = vrot.slane %v2087_v56, %v4202_v41  ;;  %v2102_v29 = vrot.slane %v3525_v19, %v4202_v41  ;;  %v2103_v61 = vcombine.low %v1777_v57, %v1784_v7  ;;  %v3526_v16 = vcombine.high %v1777_v57, %v1784_v7 }
 0x4e8   :  { %v1843_v30 = vrot.slane %v1835_v27, %v4210_v47  ;;  %v1850_v13 = vrot.slane %v1836_v46, %v4210_v47  ;;  %v2137_v37 = vcombine.low %v1827_v38, %v1834_v26  ;;  %v3527_v40 = vcombine.high %v1827_v38, %v1834_v26 }
 0x4e9   :  { %v2110_v15 = vrot.slane %v2103_v61, %v4202_v41  ;;  %v2118_v21 = vrot.slane %v3526_v16, %v4202_v41  ;;  %v2119_v14 = vcombine.low %v2094_v50, %v2102_v29 }
 0x4ea   :  { %v2144_v53 = vrot.slane %v2137_v37, %v4202_v41  ;;  %v2152_v22 = vrot.slane %v3527_v40, %v4202_v41  ;;  %v2153_v11 = vcombine.low %v1843_v30, %v1850_v13  ;;  %v3528_v55 = vcombine.high %v1843_v30, %v1850_v13 }
 0x4eb   :  { %v2127_v42 = vcombine.low %v2110_v15, %v2118_v21  ;;  %v2126_v0 = vrot.slane %v2119_v14, %v4210_v47 }
 0x4ec   :  { %v2160_v31 = vrot.slane %v2153_v11, %v4202_v41  ;;  %v2168_v32 = vrot.slane %v3528_v55, %v4202_v41  ;;  %v2169_v39 = vcombine.low %v2144_v53, %v2152_v22 }
 0x4ed   :  { %v2134_v35 = vrot.slane %v2127_v42, %v4210_v47 }
 0x4ee   :  { %v2177_v58 = vcombine.low %v2160_v31, %v2168_v32  ;;  %v2176_v48 = vrot.slane %v2169_v39, %v4210_v47 }
 0x4ef   :  { %v2135_v59 = vcombine.low %v2126_v0, %v2134_v35  ;;  %v2136_v45 = vcombine.high %v2126_v0, %v2134_v35 }
 0x4f0   :  { %v2184_v51 = vrot.slane %v2177_v58, %v4210_v47 }
 0x4f1   :  { %v2302_v62 = vshrl.u32 %v2135_v59, 16  ;;  %v2308_v20 = vshrl.u32 %v2136_v45, 16 }
 0x4f2   :  { %v2185_v23 = vcombine.low %v2176_v48, %v2184_v51  ;;  %v2186_v5 = vcombine.high %v2176_v48, %v2184_v51 }
 0x4f4   :  { %v4717_v2 = vpack.i.b16 %v2185_v23, %v2135_v59  ;;  %v2303_v28 = vshrl.u32 %v2185_v23, 16  ;;  %v4719_v54 = vpack.i.b16 %v2186_v5, %v2136_v45  ;;  %v2309_v44 = vshrl.u32 %v2186_v5, 16 }
 0x4f6   :  { %v3549_v33 = vcombine.low %v4717_v2, %v4717_v2  ;;  %v4723_v24 = vpack.i.b16 %v2303_v28, %v2302_v62  ;;  %v4725_v10 = vpack.i.b16 %v2309_v44, %v2308_v20 }
 0x4f8   :  { %v2861_v9 = vsel %vm2859_vm4, %v3549_v33, 0  ;;  %v3553_v57 = vcombine.low %v4723_v24, %v4723_v24 }
 0x4f9   :  { %3724 = vmatpush3.bf16.msra.mxu0 %v2861_v9 }
 0x4fa   :  { %v2780_v7 = vpop.xlane.xlu1 %2779  ;;  %v2959_v56 = vsel %vm2859_vm4, %v3553_v57, 0  ;;  %3729 = vmatprep.subr.bf16.mxu0 %v3977_v43 }
 0x4fb   :  { %v2788_v19 = vsub.f32 %v4584_v63, %v2780_v7  ;;  %3740 = vmatpush3.bf16.msra.mxu1 %v2959_v56 }
 0x4fc   :  { %3753 = vmatprep.subr.bf16.mxu1 %v3977_v43 }
 0x4fd   :  { %v2803_v38 = vmul.f32 1.442695, %v2788_v19 }
 0x4fe   :  { %v1524_v26 = vpop.permute.xlu1 %1523 }
 0x4ff   :  { %3857 = vpow2.f32 %v2803_v38  ;;  %v1579_v61 = vshrl.u32 %v1524_v26, 16 }
 0x502   :  { %v1530_v27 = vpop.permute.xlu1 %1529 }
 0x503   :  { %v1577_v46 = vpack.i.b16 %v1530_v27, %v1524_v26  ;;  %v1580_v50 = vshrl.u32 %v1530_v27, 16 }
 0x505   :  { %v1581_v30 = vpack.i.b16 %v1580_v50, %v1579_v61  ;;  %v1855_v13 = vcombine.high %v1577_v46, %v4193_v36  ;;  %v1862_v14 = vrot.slane %v1577_v46, %v4202_v41 }
 0x506   :  { %v1536_v29 = vpop.permute.xlu1 %1535 }
 0x507   :  { %v1587_v40 = vshrl.u32 %v1536_v29, 16  ;;  %v1869_v55 = vrot.slane %v1855_v13, %v4202_v41  ;;  %v1921_v42 = vcombine.high %v1581_v30, %v4193_v36  ;;  %v1928_v35 = vrot.slane %v1581_v30, %v4202_v41 }
 0x509   :  { %v4734_v16 = vpop.eup %3857  ;;  %v1935_v23 = vrot.slane %v1921_v42, %v4202_v41 }
 0x50a   :  { %v1542_v37 = vpop.permute.xlu1 %1541  ;;  %v2826_v63 = vsel %vm2756_vm3, %v4734_v16, 0.0 }
 0x50b   :  { %v1585_v15 = vpack.i.b16 %v1542_v37, %v1536_v29  ;;  %v1588_v21 = vshrl.u32 %v1542_v37, 16  ;;  %2827 = vadd.xlane.f32.xlu0 %v2826_v63 }
 0x50d   :  { %v1589_v53 = vpack.i.b16 %v1588_v21, %v1587_v40  ;;  %v1870_v22 = vcombine.high %v1585_v15, %v4193_v36  ;;  %v1877_v11 = vrot.slane %v1585_v15, %v4202_v41 }
 0x50f   :  { %v1884_v31 = vrot.slane %v1870_v22, %v4202_v41  ;;  %v1885_v32 = vcombine.low %v1862_v14, %v1877_v11  ;;  %v1886_v39 = vcombine.high %v1862_v14, %v1877_v11  ;;  %v1936_v0 = vcombine.high %v1589_v53, %v4193_v36 }
 0x510   :  { %v1943_v58 = vrot.slane %v1589_v53, %v4202_v41 }
 0x511   :  { %v1893_v59 = vrot.slane %v1885_v32, %v4210_v47  ;;  %v1900_v45 = vrot.slane %v1886_v39, %v4210_v47  ;;  %v1901_v48 = vcombine.low %v1869_v55, %v1884_v31  ;;  %v1902_v51 = vcombine.high %v1869_v55, %v1884_v31 }
 0x512   :  { %v1950_v5 = vrot.slane %v1936_v0, %v4202_v41  ;;  %v1951_v62 = vcombine.low %v1928_v35, %v1943_v58  ;;  %v1952_v28 = vcombine.high %v1928_v35, %v1943_v58 }
 0x513   :  { %v1909_v44 = vrot.slane %v1901_v48, %v4210_v47  ;;  %v1916_v36 = vrot.slane %v1902_v51, %v4210_v47  ;;  %v2187_v20 = vcombine.low %v1893_v59, %v1900_v45  ;;  %v3529_v33 = vcombine.high %v1893_v59, %v1900_v45  ;;  %v3875_v59 = vld [vmem:[%s4882_s5] ss:$0 sm:$0xff]  ;;  %s3987_s5 = smov [#allocation8]  }
 0x514   :  { %v1959_v9 = vrot.slane %v1951_v62, %v4210_v47  ;;  %v1966_v57 = vrot.slane %v1952_v28, %v4210_v47  ;;  %v1967_v7 = vcombine.low %v1935_v23, %v1950_v5  ;;  %v1968_v56 = vcombine.high %v1935_v23, %v1950_v5  ;;  %s3471_s27 = sshll.u32 %s3987_s5, 4  ;;  %s3472_s27 = int_to_ptr.vmem [resolvable:$true] %s3471_s27 }
 0x515   :  { %v2194_v19 = vrot.slane %v2187_v20, %v4202_v41  ;;  %v2202_v38 = vrot.slane %v3529_v33, %v4202_v41  ;;  %v2203_v26 = vcombine.low %v1909_v44, %v1916_v36  ;;  %v3530_v27 = vcombine.high %v1909_v44, %v1916_v36  ;;  %s3942_s28 = scalar_lea.vmem %s3472_s27, 256  ;;  %p3947_p11 = scmp.lt.s32.totalorder %s3472_s27, %s3472_s27 }
 0x516   :  { %v1975_v46 = vrot.slane %v1967_v7, %v4210_v47  ;;  %v1982_v50 = vrot.slane %v1968_v56, %v4210_v47  ;;  %v2237_v29 = vcombine.low %v1959_v9, %v1966_v57  ;;  %v3531_v61 = vcombine.high %v1959_v9, %v1966_v57  ;;  %p3943_p10 = scmp.ne.s32.totalorder %s3472_s27, %s3942_s28  ;;  %p3948_p12 = scmp.lt.s32.totalorder %s3942_s28, %s3942_s28 }
 0x517   :  { %v2210_v30 = vrot.slane %v2203_v26, %v4202_v41  ;;  %v2218_v13 = vrot.slane %v3530_v27, %v4202_v41  ;;  %v2219_v21 = vcombine.low %v2194_v19, %v2202_v38  ;;  %v2326_v23 = vunpack.c.h.b16 %v4717_v2 }
 0x518   :  { %v2244_v37 = vrot.slane %v2237_v29, %v4202_v41  ;;  %v2252_v63 = vrot.slane %v3531_v61, %v4202_v41  ;;  %v2253_v40 = vcombine.low %v1975_v46, %v1982_v50  ;;  %v3532_v15 = vcombine.high %v1975_v46, %v1982_v50  ;;  %p3949_p13 = por %p3948_p12, %p3947_p11 }
 0x519   :  { %v2227_v14 = vcombine.low %v2210_v30, %v2218_v13  ;;  %v2807_v53 = vpop.xlane.xlu0 %2806  ;;  %v2226_v32 = vrot.slane %v2219_v21, %v4210_v47  ;;  %v3557_v20 = vcombine.low %v4719_v54, %v4719_v54  ;;  %v2332_v26 = vunpack.c.h.b16 %v4723_v24 }
 0x51a   :  { %v2260_v22 = vrot.slane %v2253_v40, %v4202_v41  ;;  %v2268_v11 = vrot.slane %v3532_v15, %v4202_v41  ;;  %v2269_v55 = vcombine.low %v2244_v37, %v2252_v63  ;;  %3859 = vrcp.f32 %v2807_v53  ;;  %p3950_p0 = pnand %p3949_p13, %p3943_p10 }
 0x51b   :  { %v2234_v42 = vrot.slane %v2227_v14, %v4210_v47  ;;  %v3057_v9 = vsel %vm2859_vm4, %v3557_v20, 0  ;;  %v2338_v15 = vunpack.c.h.b16 %v4719_v54  ;;  %v3561_v14 = vcombine.low %v4725_v10, %v4725_v10 }
 0x51c   :  { %v2277_v31 = vcombine.low %v2260_v22, %v2268_v11  ;;  %v2276_v39 = vrot.slane %v2269_v55, %v4210_v47 }
 0x51d   :  { %v2235_v35 = vcombine.low %v2226_v32, %v2234_v42  ;;  %v2236_v27 = vcombine.high %v2226_v32, %v2234_v42 }
 0x51e   :  { %v2284_v0 = vrot.slane %v2277_v31, %v4210_v47 }
 0x51f   :  { %v2314_v7 = vshrl.u32 %v2235_v35, 16  ;;  %v2320_v11 = vshrl.u32 %v2236_v27, 16 }
 0x520   :  { %v2285_v58 = vcombine.low %v2276_v39, %v2284_v0 }
 0x521   :  { %3457 = vrot.lane.b32.xlu0 %v3875_v59, %s3986_s24 }
 0x522   :  { %v2313_v41 = vpack.i.b16 %v2285_v58, %v2235_v35  ;;  %v2315_v57 = vshrl.u32 %v2285_v58, 16 }
 0x524   :  { %v3860_v45 = vpop.eup %3859  ;;  %v2327_v48 = vunpack.c.l.b16 %v2313_v41  ;;  %v3551_v28 = vcombine.high %v2313_v41, %v2313_v41  ;;  %v2316_v19 = vpack.i.b16 %v2315_v57, %v2314_v7 }
 0x525   :  { %v2837_v51 = vmul.f32 %v3860_v45, %v4606_v12 }
 0x526   :  { %v2903_v62 = vpack.c.b16 %v2327_v48, %v2326_v23  ;;  %v2910_v44 = vsel %vm2859_vm4, %v3551_v28, 0  ;;  %v2333_v52 = vunpack.c.l.b16 %v2316_v19  ;;  %v3555_v13 = vcombine.high %v2316_v19, %v2316_v19  ;;  %v3251_v28 = vld [vmem:[#allocation7 + $0x4] sm:$0xf] }
 0x527   :  { %v2845_v5 = vpack.c.bf16 %v2837_v51, %v2837_v51  ;;  %v3250_v51 = vld [vmem:[#allocation7] sm:$0xf] }
 0x528   :  { %v3001_v29 = vpack.c.b16 %v2333_v52, %v2332_v26  ;;  %v3008_v63 = vsel %vm2859_vm4, %v3555_v13, 0  ;;  %v3258_v23 = vsel %vm2859_vm4, %v3250_v51, 0 }
 0x529   :  { %3726 = vmatmul.mubr.msk.bf16.vlgmr.msra.gmra.mrb[20].mxu0 %vm2756_vm3, %v2845_v5  ;;  %v2813_v47 = vpop.xlane.xlu0 %2812 }
 0x52a   :  { %3730 = vmatpush3.bf16.msra.mxu0 %v2903_v62  ;;  %3861 = vrcp.f32 %v2813_v47  ;;  %3733 = vmatprep.mubr.msk.bf16.mxu0 %vm3978_vm1, %v3977_v43 }
 0x52b   :  { %3731 = vmatprep.subr.bf16.mxu0 %v3977_v43 }
 0x52e   :  { %3732 = vmatpush3.bf16.msra.mxu0 %v2910_v44 }
 0x52f   :  { %3745 = vmatprep.subr.bf16.mxu0 %v3977_v43 }
 0x534   :  { %v3862_v12 = vpop.eup %3861 }
 0x535   :  { %v2839_v2 = vmul.f32 %v3862_v12, %v4613_v6 }
 0x537   :  { %v2847_v36 = vpack.c.bf16 %v2839_v2, %v2839_v2 }
 0x539   :  { %3742 = vmatmul.mubr.msk.bf16.vlgmr.msra.gmra.mrb[28].mxu1 %vm2756_vm3, %v2847_v36 }
 0x53a   :  { %3754 = vmatpush3.bf16.msra.mxu1 %v2295_v4  ;;  %3757 = vmatprep.mubr.msk.bf16.mxu1 %vm3978_vm1, %v3977_v43  ;;  %v2286_v4 = vcombine.high %v2276_v39, %v2284_v0  ;;  %v2344_v39 = vunpack.c.h.b16 %v4725_v10 }
 0x53b   :  { %v2810_v33 = vpop.xlane.xlu1 %2809  ;;  %3755 = vmatprep.subr.bf16.mxu1 %v3977_v43 }
 0x53c   :  { %3863 = vrcp.f32 %v2810_v33  ;;  %v2319_v61 = vpack.i.b16 %v2286_v4, %v2236_v27  ;;  %v2321_v22 = vshrl.u32 %v2286_v4, 16  ;;  %v3253_v4 = vld [vmem:[#allocation7 + $0xc] sm:$0xf] }
 0x53e   :  { %3756 = vmatpush3.bf16.msra.mxu1 %v3057_v9  ;;  %v2816_v6 = vpop.xlane.xlu0 %2815  ;;  %v2339_v24 = vunpack.c.l.b16 %v2319_v61  ;;  %v3559_v53 = vcombine.high %v2319_v61, %v2319_v61  ;;  %v2322_v55 = vpack.i.b16 %v2321_v22, %v2320_v11  ;;  %v3399_v61 = vsel %vm2859_vm4, %v3253_v4, 0 }
 0x53f   :  { %3865 = vrcp.f32 %v2816_v6  ;;  %3769 = vmatprep.subr.bf16.mxu1 %v3977_v43  ;;  %v3252_v6 = vld [vmem:[#allocation7 + $0x8] sm:$0xf] }
 0x540   :  { %v3099_v21 = vpack.c.b16 %v2339_v24, %v2338_v15  ;;  %v3106_v54 = vsel %vm2859_vm4, %v3559_v53, 0  ;;  %v2345_v31 = vunpack.c.l.b16 %v2322_v55  ;;  %v3563_v59 = vcombine.high %v2322_v55, %v2322_v55 }
 0x541   :  { %v3352_v19 = vsel %vm2859_vm4, %v3252_v6, 0 }
 0x542   :  { %v2819_v56 = vpop.xlane.xlu0 %2818  ;;  %v3197_v35 = vpack.c.b16 %v2345_v31, %v2344_v39  ;;  %v3204_v41 = vsel %vm2859_vm4, %v3563_v59, 0 }
 0x543   :  { %3867 = vrcp.f32 %v2819_v56 }
 0x546   :  { %v3864_v1 = vpop.eup %3863 }
 0x547   :  { %v2838_v38 = vmul.f32 %v3864_v1, %v4620_v34 }
 0x549   :  { %v3866_v46 = vpop.eup %3865  ;;  %v2846_v50 = vpack.c.bf16 %v2838_v38, %v2838_v38 }
 0x54a   :  { %v2840_v30 = vmul.f32 %v3866_v46, %v4641_v8 }
 0x54b   :  { %3734 = vmatmul.mubr.msk.bf16.vlgmr.msra.gmra.mrb[24].mxu0 %vm2756_vm3, %v2846_v50 }
 0x54c   :  { %3746 = vmatpush3.bf16.msra.mxu0 %v3001_v29  ;;  %3749 = vmatprep.mubr.msk.bf16.mxu0 %vm3978_vm1, %v3977_v43  ;;  %v2848_v40 = vpack.c.bf16 %v2840_v30, %v2840_v30 }
 0x54d   :  { %v3868_v37 = vpop.eup %3867  ;;  %3747 = vmatprep.subr.bf16.mxu0 %v3977_v43 }
 0x54e   :  { %v2841_v34 = vmul.f32 %v3868_v37, %v4651_v60  ;;  %v3155_v60 = vsel %vm2859_vm4, %v3561_v14, 0 }
 0x550   :  { %3748 = vmatpush3.bf16.msra.mxu0 %v3008_v63  ;;  %v2849_v8 = vpack.c.bf16 %v2841_v34, %v2841_v34 }
 0x551   :  { %3761 = vmatprep.subr.bf16.mxu0 %v3977_v43 }
 0x552   :  { %3758 = vmatmul.mubr.msk.bf16.vlgmr.msra.gmra.mrb[32].mxu1 %vm2756_vm3, %v2849_v8 }
 0x553   :  { %3750 = vmatmul.mubr.msk.bf16.vlgmr.msra.gmra.mrb[28].mxu0 %vm2756_vm3, %v2848_v40  ;;  %3770 = vmatpush3.bf16.msra.mxu1 %v4671_v17 }
 0x554   :  { %3762 = vmatpush3.bf16.msra.mxu0 %v3099_v21  ;;  %3771 = vmatprep.subr.bf16.mxu1 %v3977_v43 }
 0x555   :  { %3763 = vmatprep.subr.bf16.mxu0 %v3977_v43  ;;  %3765 = vmatprep.mubr.msk.bf16.mxu0 %vm3978_vm1, %v3977_v43 }
 0x556   :  { %3773 = vmatprep.mubr.msk.bf16.mxu1 %vm3978_vm1, %v3977_v43 }
 0x557   :  { %3772 = vmatpush3.bf16.msra.mxu1 %v3155_v60 }
 0x558   :  { %3764 = vmatpush3.bf16.msra.mxu0 %v3106_v54  ;;  %3785 = vmatprep.subr.bf16.mxu1 %v3977_v43 }
 0x559   :  { %3777 = vmatprep.subr.bf16.mxu0 %v3977_v43 }
 0x563   :  { %v2822_v17 = vpop.xlane.xlu0 %2821 }
 0x564   :  { %3869 = vrcp.f32 %v2822_v17 }
 0x56e   :  { %v3870_v42 = vpop.eup %3869 }
 0x56f   :  { %v2842_v32 = vmul.f32 %v3870_v42, %v4676_v18 }
 0x571   :  { %v2850_v0 = vpack.c.bf16 %v2842_v32, %v2842_v32 }
 0x572   :  { %v2825_v58 = vpop.xlane.xlu0 %2824 }
 0x573   :  { %3766 = vmatmul.mubr.msk.bf16.vlgmr.msra.gmra.mrb[32].mxu0 %vm2756_vm3, %v2850_v0  ;;  %3871 = vrcp.f32 %v2825_v58 }
 0x574   :  { %3778 = vmatpush3.bf16.msra.mxu0 %v3197_v35  ;;  %3781 = vmatprep.mubr.msk.bf16.mxu0 %vm3978_vm1, %v3977_v43 }
 0x575   :  { %3779 = vmatprep.subr.bf16.mxu0 %v3977_v43 }
 0x578   :  { %3780 = vmatpush3.bf16.msra.mxu0 %v3204_v41 }
 0x579   :  { %3791 = vmatprep.subr.bf16.mxu0 %v3977_v43 }
 0x57d   :  { %v3872_v18 = vpop.eup %3871 }
 0x57e   :  { %v2843_v10 = vmul.f32 %v3872_v18, %v4692_v3  ;;  %v3305_v3 = vsel %vm2859_vm4, %v3251_v28, 0 }
 0x580   :  { %v2851_v45 = vpack.c.bf16 %v2843_v10, %v2843_v10 }
 0x582   :  { %3774 = vmatmul.mubr.msk.bf16.vlgmr.msra.gmra.mrb[36].mxu1 %vm2756_vm3, %v2851_v45 }
 0x583   :  { %3787 = vmatprep.mubr.msk.bf16.mxu1 %vm3978_vm1, %v3977_v43  ;;  %3786 = vmatpush3.bf16.msra.mxu1 %v3258_v23 }
 0x584   :  { %3797 = vmatprep.subr.bf16.mxu1 %v3977_v43 }
 0x598   :  { %v2828_v48 = vpop.xlane.xlu0 %2827 }
 0x599   :  { %3873 = vrcp.f32 %v2828_v48 }
 0x5a3   :  { %v3874_v5 = vpop.eup %3873 }
 0x5a4   :  { %v2844_v62 = vmul.f32 %v3874_v5, %v4734_v16 }
 0x5a6   :  { %v2852_v47 = vpack.c.bf16 %v2844_v62, %v2844_v62 }
 0x5a8   :  { %3782 = vmatmul.mubr.msk.bf16.vlgmr.msra.gmra.mrb[36].mxu0 %vm2756_vm3, %v2852_v47 }
 0x5a9   :  { %3792 = vmatpush3.bf16.msra.mxu0 %v3305_v3  ;;  %3793 = vmatprep.mubr.msk.bf16.mxu0 %vm3978_vm1, %v3977_v43 }
 0x5aa   :  { %3803 = vmatprep.subr.bf16.mxu0 %v3977_v43 }
 0x5fc   :  { %v2897_v44 = vpop.f32.mrb[20].mxu0 }
 0x5fd   :  { %v3727_v12 = vpop.f32.mrb[21].mxu0 }
 0x5fe   :  { %v2900_v2 = vpop.f32.mrb[22].mxu0 }
 0x5ff   :  { %v3728_v36 = vpop.f32.mrb[23].mxu0 }
 0x600   :  { %v3458_v36 = vpop.permute.xlu0 %3457 }
 0x60c   :  { %v2995_v20 = vpop.f32.mrb[28].mxu1 }
 0x60d   :  { %v3743_v33 = vpop.f32.mrb[29].mxu1 }
 0x60e   :  { %v2998_v9 = vpop.f32.mrb[30].mxu1 }
 0x60f   :  { %v3744_v16 = vpop.f32.mrb[31].mxu1 }
 0x61e   :  { %v2946_v57 = vpop.f32.mrb[24].mxu0 }
 0x61f   :  { %v3246_v7 = vpack.c.bf16 %v2946_v57, %v2897_v44  ;;  %v3735_v56 = vpop.f32.mrb[25].mxu0 }
 0x620   :  { %v2949_v1 = vpop.f32.mrb[26].mxu0 }
 0x621   :  { %v3736_v52 = vpop.f32.mrb[27].mxu0  ;;  %3788 = vmatmul.mubr.msk.bf16.vlgmr.msra.gmra.mrb[40].mxu1 %vm2349_vm2, %v3246_v7 }
 0x622   :  { %3798 = vmatpush3.bf16.msra.mxu1 %v3352_v19  ;;  %3799 = vmatprep.mubr.msk.bf16.mxu1 %vm3978_vm1, %v3977_v43 }
 0x625   :  { %v3093_v38 = vpop.f32.mrb[32].mxu1 }
 0x626   :  { %v3044_v26 = vpop.f32.mrb[28].mxu0  ;;  %v3759_v27 = vpop.f32.mrb[33].mxu1 }
 0x627   :  { %v3247_v46 = vpack.c.bf16 %v3044_v26, %v2995_v20  ;;  %v3751_v50 = vpop.f32.mrb[29].mxu0  ;;  %v3096_v29 = vpop.f32.mrb[34].mxu1 }
 0x628   :  { %v3047_v30 = vpop.f32.mrb[30].mxu0  ;;  %v3760_v13 = vpop.f32.mrb[35].mxu1 }
 0x629   :  { %v3752_v37 = vpop.f32.mrb[31].mxu0  ;;  %3794 = vmatmul.mubr.msk.bf16.vlgmr.msra.gmra.mrb[40].mxu0 %vm2349_vm2, %v3247_v46 }
 0x62a   :  { %3804 = vmatpush3.bf16.msra.mxu0 %v3399_v61  ;;  %3805 = vmatprep.mubr.msk.bf16.mxu0 %vm3978_vm1, %v3977_v43 }
 0x646   :  { %v3142_v34 = vpop.f32.mrb[32].mxu0 }
 0x647   :  { %v3248_v24 = vpack.c.bf16 %v3142_v34, %v3093_v38  ;;  %v3767_v63 = vpop.f32.mrb[33].mxu0 }
 0x648   :  { %v3145_v40 = vpop.f32.mrb[34].mxu0 }
 0x649   :  { %v3768_v15 = vpop.f32.mrb[35].mxu0  ;;  %3800 = vmatmul.mubr.msk.bf16.vlgmr.msra.gmra.mrb[44].mxu1 %vm2349_vm2, %v3248_v24 }
 0x655   :  { %v3191_v8 = vpop.f32.mrb[36].mxu1 }
 0x656   :  { %v3775_v21 = vpop.f32.mrb[37].mxu1 }
 0x657   :  { %v3194_v14 = vpop.f32.mrb[38].mxu1 }
 0x658   :  { %v3776_v53 = vpop.f32.mrb[39].mxu1 }
 0x67b   :  { %v3240_v60 = vpop.f32.mrb[36].mxu0 }
 0x67c   :  { %v3249_v54 = vpack.c.bf16 %v3240_v60, %v3191_v8  ;;  %v3783_v17 = vpop.f32.mrb[37].mxu0 }
 0x67d   :  { %v3243_v22 = vpop.f32.mrb[38].mxu0 }
 0x67e   :  { %v3784_v11 = vpop.f32.mrb[39].mxu0  ;;  %3806 = vmatmul.mubr.msk.bf16.vlgmr.msra.gmra.mrb[44].mxu0 %vm2349_vm2, %v3249_v54 }
 0x6f4   :  { %v3294_v55 = vpop.f32.mrb[40].mxu1 }
 0x6f5   :  { %v3789_v43 = vpop.f32.mrb[41].mxu1  ;;  %v3442_v39 = vsel %vm123_vm0, %v3294_v55, 0.0 }
 0x6f6   :  { %v3297_v42 = vpop.f32.mrb[42].mxu1 }
 0x6f7   :  { %v3790_v31 = vpop.f32.mrb[43].mxu1  ;;  %v3449_v41 = vsel %vm123_vm0, %v3297_v42, 0.0 }
 0x6fc   :  { %v3341_v32 = vpop.f32.mrb[40].mxu0 }
 0x6fd   :  { %v3443_v0 = vsel %vm123_vm0, %v3341_v32, 0.0  ;;  %v3795_v35 = vpop.f32.mrb[41].mxu0 }
 0x6fe   :  { %v3444_v58 = vadd.f32 %v3443_v0, %v3442_v39  ;;  %v3344_v59 = vpop.f32.mrb[42].mxu0 }
 0x6ff   :  { %v3450_v18 = vsel %vm123_vm0, %v3344_v59, 0.0  ;;  %v3796_v10 = vpop.f32.mrb[43].mxu0 }
 0x700   :  { %v3451_v45 = vadd.f32 %v3450_v18, %v3449_v41 }
 0x71c   :  { %v3388_v48 = vpop.f32.mrb[44].mxu1 }
 0x71d   :  { %v3445_v51 = vsel %vm123_vm0, %v3388_v48, 0.0  ;;  %v3801_v23 = vpop.f32.mrb[45].mxu1 }
 0x71e   :  { %v3446_v5 = vadd.f32 %v3445_v51, %v3444_v58  ;;  %v3391_v62 = vpop.f32.mrb[46].mxu1 }
 0x71f   :  { %v3452_v47 = vsel %vm123_vm0, %v3391_v62, 0.0  ;;  %v3802_v28 = vpop.f32.mrb[47].mxu1 }
 0x720   :  { %v3453_v3 = vadd.f32 %v3452_v47, %v3451_v45 }
 0x751   :  { %v3435_v44 = vpop.f32.mrb[44].mxu0 }
 0x752   :  { %v3447_v12 = vsel %vm123_vm0, %v3435_v44, 0.0  ;;  %v3807_v2 = vpop.f32.mrb[45].mxu0 }
 0x753   :  { %v3448_v20 = vadd.f32 %v3447_v12, %v3446_v5  ;;  %v3438_v33 = vpop.f32.mrb[46].mxu0 }
 0x754   :  { %v3454_v9 = vsel %vm123_vm0, %v3438_v33, 0.0  ;;  %v3808_v16 = vpop.f32.mrb[47].mxu0 }
 0x755   :  { %v3455_v6 = vadd.f32 %v3454_v9, %v3453_v3  ;;  %v3460_v57 = vadd.f32 %v3458_v36, %v3448_v20 }
 0x757   :  { %v3461_v7 = vadd.f32 %v3458_v36, %v3455_v6  ;;  %v3462_v56 = vadd.f32 %v3460_v57, %v4139_v25 }
 0x759   :  { %v3463_v19 = vadd.f32 %v3461_v7, %v4141_v49  ;;  %3464 = vst.msk [vmem:[#allocation8] sm:$0xff] %vm123_vm0, %v3462_v56 }
 0x75b   :  { %3465 = vst.msk [vmem:[#allocation8 + $0x8] sm:$0xff] %vm123_vm0, %v3463_v19 }
 0x75c   :  { %3953 = shalt.err (!%p3950_p0)
}
 0x75d   :  { %s3954_s9 = scalar_lea.hbm %s4883_s6, 256 }
 0x75e   :  { %p3955_p1 = scmp.ne.s32.totalorder %s4883_s6, %s3954_s9  ;;  %p3958_p2 = scmp.lt.u32.totalorder %s3954_s9, %s4883_s6 }
 0x760   :  { %p3960_p3 = pnand %p3958_p2, %p3955_p1 }
 0x762   :  { %3963 = shalt.err (!%p3960_p3)
}
 0x763   :  { %3477 = dma.vmem_to_hbm [thread:$0]  %s3472_s27, 256, %s4883_s6, [#allocation4], %s3974_s3, %s3974_s3, %s3975_s21  }
 0x764   :  { %3968 = dma.done.wait [#allocation4], 256  }
 0x765   :  { %3969 = vsyncadd [#allocation4], 4294967040 }
 0x766   :  { %3481 = vsyncpa [#allocation3], 1 }
 0x767   :  { %3482 = vsyncpa [#allocation6], 1 }
 0x768   :  { %3483 = vsyncpa [#allocation4], 1 }

</bundles_post_ra>
